<compile_context>
chip_gen: v7x
topology: tpu7x:2x2x1
jax: 0.10.0
libtpu: 0.0.40
codegen_flags: <defaults>
</compile_context>

<pallas_src>
import functools

import numpy as np
import jax
import jax.numpy as jnp
from jax.experimental import pallas as pl
from jax.experimental.pallas import tpu as pltpu

# ----------------------- small OwlViT config -----------------------
B = 2                 # images
IMG = 32              # image side
PATCH = 8             # patch size
GRID_SIDE = IMG // PATCH
NUM_PATCHES = GRID_SIDE * GRID_SIDE       # 16
S_VIS = NUM_PATCHES + 1                   # +CLS token -> 17
D_V = 32              # vision hidden
D_T = 32              # text hidden
PROJ = 32             # shared projection dim
HEADS = 2
NUM_LAYERS = 2
MLP_V = 64
MLP_T = 64
VOCAB = 64
L_TXT = 8             # text sequence length
NUM_QUERIES = 3       # number of text queries


# ============================ in-kernel helpers ============================

def _sigmoid(x):
    return 1.0 / (1.0 + jnp.exp(-x))


def _quick_gelu(x):
    return x * _sigmoid(1.702 * x)


def _gelu_tanh(x):
    # TODO(synk): HF box head uses erf-GELU; tanh approximation differs slightly.
    return 0.5 * x * (1.0 + jnp.tanh(0.7978845608028654 * (x + 0.044715 * x * x * x)))


def _ln(x, g, b):
    mu = jnp.mean(x, axis=-1, keepdims=True)
    xc = x - mu
    var = jnp.mean(xc * xc, axis=-1, keepdims=True)
    return xc * jax.lax.rsqrt(var + 1e-5) * g + b


def _dense(x2d, w, b=None):
    y = jnp.dot(x2d, w, preferred_element_type=jnp.float32)
    if b is not None:
        y = y + b
    return y


def _encoder_layer(x, l, p, num_heads, bias):
    """One CLIP-style pre-LN encoder layer; x: [G, S, D], everything in VMEM."""
    G, S, D = x.shape
    dh = D // num_heads
    scale = dh ** -0.5

    h = _ln(x, p["ln1_g"][l], p["ln1_b"][l])
    # fused Q/K/V projection: one (D, 3D) matmul
    qkv = _dense(h.reshape(G * S, D), p["qkv_w"][l], p["qkv_b"][l]).reshape(G, S, 3 * D)

    head_outs = []
    for hd in range(num_heads):
        q = qkv[:, :, hd * dh:(hd + 1) * dh] * scale
        k = qkv[:, :, D + hd * dh:D + (hd + 1) * dh]
        v = qkv[:, :, 2 * D + hd * dh:2 * D + (hd + 1) * dh]
        # contract over dh directly (no explicit K transpose)
        s = jax.lax.dot_general(q, k, (((2,), (2,)), ((0,), (0,))),
                                preferred_element_type=jnp.float32)       # [G, S, S]
        if bias is not None:
            s = s + bias
        m = jnp.max(s, axis=-1, keepdims=True)
        e = jnp.exp(s - m)
        probs = e * pl.reciprocal(jnp.sum(e, axis=-1, keepdims=True), approx=True)
        head_outs.append(
            jax.lax.dot_general(probs, v, (((2,), (1,)), ((0,), (0,))),
                                preferred_element_type=jnp.float32))      # [G, S, dh]

    attn = jnp.concatenate(head_outs, axis=-1).reshape(G * S, D)
    x = x + _dense(attn, p["o_w"][l], p["o_b"][l]).reshape(G, S, D)

    h = _ln(x, p["ln2_g"][l], p["ln2_b"][l]).reshape(G * S, D)
    h = _quick_gelu(_dense(h, p["fc1_w"][l], p["fc1_b"][l]))
    h = _dense(h, p["fc2_w"][l], p["fc2_b"][l]).reshape(G, S, D)
    return x + h


# ============================ fused Pallas kernels ============================

def _text_tower_kernel(x0_ref, mask_ref, *refs, treedef):
    """Whole text tower in one program.  Output: L2-normalized query embeds."""
    out_ref = refs[-1]
    p = jax.tree_util.tree_unflatten(treedef, refs[:-1])

    x = x0_ref[...]                                     # [Q, L, D]
    mask = mask_ref[...]                                # [Q, L] (1./0.)
    Q, L, _ = x.shape

    # causal + padding attention bias built in-kernel (no HBM round-trip)
    row = jax.lax.broadcasted_iota(jnp.int32, (L, L), 0)
    col = jax.lax.broadcasted_iota(jnp.int32, (L, L), 1)
    causal = jnp.where(col <= row, 0.0, -1e9)                          # [L, L]
    bias = causal[None, :, :] + ((1.0 - mask) * -1e9)[:, None, :]      # [Q, L, L]

    for l in range(NUM_LAYERS):
        x = _encoder_layer(x, l, p, HEADS, bias)

    x = _ln(x, p["final_g"][...], p["final_b"][...])                   # [Q, L, D]

    # pool the hidden state at the EOS (= last real token) position
    eos = (jnp.sum(mask, axis=-1, keepdims=True) - 1.0).astype(jnp.int32)   # [Q, 1]
    lane = jax.lax.broadcasted_iota(jnp.int32, (Q, L), 1)
    sel = (lane == eos).astype(jnp.float32)                            # [Q, L]
    pooled = jnp.sum(x * sel[:, :, None], axis=1)                      # [Q, D]

    q = _dense(pooled, p["proj_w"][...])                               # bias=False
    out_ref[...] = q / (jnp.sqrt(jnp.sum(q * q, axis=-1, keepdims=True)) + 1e-6)


def _vision_det_kernel(patches_ref, query_ref, *refs, treedef):
    """Vision tower + detection head + post-processing for ONE image."""
    out_ref = refs[-1]
    p = jax.tree_util.tree_unflatten(treedef, refs[:-1])

    # --- patch embedding (+CLS, +positional) + pre-LN ---
    pe = _dense(patches_ref[...], p["patch_w"][...])                   # [NP, D] (conv bias=False)
    x = jnp.concatenate([p["cls_pos0"][...], pe + p["pos_rest"][...]], axis=0)   # [S, D]
    x = _ln(x, p["pre_g"][...], p["pre_b"][...])[None, :, :]           # [1, S, D]

    # --- transformer encoder, weights resident in VMEM (no zero attn bias) ---
    for l in range(NUM_LAYERS):
        x = _encoder_layer(x, l, p, HEADS, None)

    # --- post LN + class-token merge ---
    x = _ln(x[0], p["post_g"][...], p["post_b"][...])                  # [S, D]
    feats = _ln(x[1:, :] * x[0:1, :], p["merge_g"][...], p["merge_b"][...])   # [NP, D]

    # --- fused class/box-head projection: columns [cls0 | box0 | shift | scale] ---
    y = _dense(feats, p["head_w"][...], p["head_b"][...])              # [NP, 66]
    img_cls = y[:, 0:PROJ]
    hbox = _gelu_tanh(y[:, PROJ:PROJ + D_V])
    shift = y[:, PROJ + D_V:PROJ + D_V + 1]
    scl = y[:, PROJ + D_V + 1:PROJ + D_V + 2]

    # --- class logits: normalized image/query similarity, shift & elu-scale ---
    img_n = img_cls / (jnp.sqrt(jnp.sum(img_cls * img_cls, axis=-1, keepdims=True)) + 1e-6)
    logits = jax.lax.dot_general(img_n, query_ref[...], (((1,), (1,)), ((), ())),
                                 preferred_element_type=jnp.float32)   # [NP, Q]
    scl = jnp.where(scl > 0, scl, jnp.exp(jnp.minimum(scl, 0.0)) - 1.0) + 1.0   # elu(x)+1
    logits = (logits + shift) * scl

    # --- box head MLP (first layer already done by the fused projection) ---
    hbox = _gelu_tanh(_dense(hbox, p["box1_w"][...], p["box1_b"][...]))
    box_raw = _dense(hbox, p["box2_w"][...], p["box2_b"][...])         # [NP, 4]

    # --- post_process_object_detection ---
    probs = _sigmoid(logits)                                           # [NP, Q]
    maxv = jnp.max(probs, axis=-1, keepdims=True)                      # [NP, 1] (reused as scores)
    qidx = jax.lax.broadcasted_iota(jnp.int32, probs.shape, 1)
    labels = jnp.min(jnp.where(probs >= maxv, qidx, NUM_QUERIES),
                     axis=-1, keepdims=True)                           # [NP, 1] int32
    bxy = _sigmoid(box_raw + p["box_bias"][...])                       # cxcywh in [0, 1]
    c, wh = bxy[:, 0:2], bxy[:, 2:4]
    xyxy = jnp.concatenate([c - 0.5 * wh, c + 0.5 * wh], axis=-1) * float(IMG)

    # single lane-packed output slab: [score, label, x0, y0, x1, y1, 0, 0]
    out_ref[...] = jnp.concatenate(
        [maxv, labels.astype(jnp.float32), xyxy,
         jnp.zeros((NUM_PATCHES, 2), jnp.float32)], axis=-1)           # [NP, 8]


# ============================ model glue ============================

def _full_spec(shape):
    nd = len(shape)
    return pl.BlockSpec(tuple(shape), lambda b, _nd=nd: (0,) * _nd)


def compute_box_bias(n_side):
    xs = jnp.arange(1, n_side + 1, dtype=jnp.float32) / n_side
    xx, yy = jnp.meshgrid(xs, xs)
    coords = jnp.stack([xx, yy], axis=-1).reshape(-1, 2)
    coords = jnp.clip(coords, 1e-4, 1.0 - 1e-4)
    coord_bias = jnp.log(coords / (1.0 - coords))
    size = jnp.full_like(coords, 1.0 / n_side)
    size_bias = jnp.log(size / (1.0 - size))
    return jnp.concatenate([coord_bias, size_bias], axis=-1)           # [NUM_PATCHES, 4]


def owlvit_forward(pixel, input_ids, attn_mask, params):
    Bn, C, H, W = pixel.shape
    gh, gw = H // PATCH, W // PATCH

    # unfold NCHW image into per-patch rows (stride==kernel==PATCH conv, bias=False)
    patches = pixel.reshape(Bn, C, gh, PATCH, gw, PATCH)
    patches = patches.transpose(0, 2, 4, 1, 3, 5).reshape(Bn, gh * gw, C * PATCH * PATCH)

    # ---- text tower: one fused gridless pallas_call ----
    tp = params["text"]
    x0 = jnp.take(tp["tok"], input_ids, axis=0) + tp["pos"][None]      # [Q, L, D_T]
    mask_f = attn_mask.astype(jnp.float32)
    tflat, tdef = jax.tree_util.tree_flatten(tp["enc"])
    query_n = pl.pallas_call(
        functools.partial(_text_tower_kernel, treedef=tdef),
        out_shape=jax.ShapeDtypeStruct((NUM_QUERIES, PROJ), jnp.float32),
    )(x0, mask_f, *tflat)

    # ---- vision tower + detection head: one fused pallas_call, grid over images ----
    vflat, vdef = jax.tree_util.tree_flatten(params["vision"])
    dets = pl.pallas_call(
        functools.partial(_vision_det_kernel, treedef=vdef),
        out_shape=jax.ShapeDtypeStruct((Bn, NUM_PATCHES, 8), jnp.float32),
        grid=(Bn,),
        in_specs=[pl.BlockSpec((None, gh * gw, C * PATCH * PATCH), lambda b: (b, 0, 0)),
                  pl.BlockSpec((NUM_QUERIES, PROJ), lambda b: (0, 0))]
                 + [_full_spec(a.shape) for a in vflat],
        out_specs=pl.BlockSpec((None, NUM_PATCHES, 8), lambda b: (b, 0, 0)),
        compiler_params=pltpu.CompilerParams(dimension_semantics=("parallel",)),
    )(patches, query_n, *vflat)

    scores = dets[:, :, 0]
    labels = dets[:, :, 1].astype(jnp.int32)
    boxes = dets[:, :, 2:6]
    return scores, labels, boxes


# ============================ parameter init ============================

def init_params(key):
    keys = iter(jax.random.split(key, 128))
    nk = lambda: next(keys)

    def w(din, dout):
        return 0.02 * jax.random.normal(nk(), (din, dout), jnp.float32)

    def ones(*s):
        return jnp.ones(s, jnp.float32)

    def zeros(*s):
        return jnp.zeros(s, jnp.float32)

    def enc_stack(d, mlp):
        L = NUM_LAYERS
        return {
            "ln1_g": ones(L, 1, d), "ln1_b": zeros(L, 1, d),
            "qkv_w": jnp.stack([jnp.concatenate([w(d, d), w(d, d), w(d, d)], axis=1)
                                for _ in range(L)]),
            "qkv_b": zeros(L, 1, 3 * d),
            "o_w": jnp.stack([w(d, d) for _ in range(L)]), "o_b": zeros(L, 1, d),
            "ln2_g": ones(L, 1, d), "ln2_b": zeros(L, 1, d),
            "fc1_w": jnp.stack([w(d, mlp) for _ in range(L)]), "fc1_b": zeros(L, 1, mlp),
            "fc2_w": jnp.stack([w(mlp, d) for _ in range(L)]), "fc2_b": zeros(L, 1, d),
        }

    cls_tok = 0.02 * jax.random.normal(nk(), (D_V,), jnp.float32)
    pos_emb = 0.02 * jax.random.normal(nk(), (S_VIS, D_V), jnp.float32)

    vision = dict(
        patch_w=w(3 * PATCH * PATCH, D_V),                 # conv weight, bias=False
        cls_pos0=(cls_tok + pos_emb[0])[None, :],          # CLS token + its positional, [1, D]
        pos_rest=pos_emb[1:],                              # [NP, D]
        pre_g=ones(1, D_V), pre_b=zeros(1, D_V),
        post_g=ones(1, D_V), post_b=zeros(1, D_V),
        merge_g=ones(1, D_V), merge_b=zeros(1, D_V),
        # fused detection-head projection: [cls0 | box0 | shift | scale]
        head_w=jnp.concatenate([w(D_V, PROJ), w(D_V, D_V), w(D_V, 1), w(D_V, 1)], axis=1),
        head_b=zeros(1, PROJ + D_V + 2),
        box1_w=w(D_V, D_V), box1_b=zeros(1, D_V),
        box2_w=w(D_V, 4), box2_b=zeros(1, 4),
        box_bias=compute_box_bias(GRID_SIDE),
        **enc_stack(D_V, MLP_V),
    )

    text = dict(
        tok=0.02 * jax.random.normal(nk(), (VOCAB, D_T), jnp.float32),
        pos=0.02 * jax.random.normal(nk(), (L_TXT, D_T), jnp.float32),
        enc=dict(
            final_g=ones(1, D_T), final_b=zeros(1, D_T),
            proj_w=w(D_T, PROJ),                           # text projection, bias=False
            **enc_stack(D_T, MLP_T),
        ),
    )
    return {"vision": vision, "text": text}


# ============================ main ============================

if __name__ == "__main__":
    key = jax.random.PRNGKey(0)
    kp, kimg, kids = jax.random.split(key, 3)

    params = init_params(kp)
    pixel = jax.random.normal(kimg, (B, 3, IMG, IMG), jnp.float32)
    input_ids = jax.random.randint(kids, (NUM_QUERIES, L_TXT), 1, VOCAB).astype(jnp.int32)
    lengths = jnp.array([L_TXT, 5, 6], jnp.int32)
    attn_mask = (jnp.arange(L_TXT)[None, :] < lengths[:, None]).astype(jnp.int32)

    fwd = jax.jit(owlvit_forward)
    scores, labels, boxes = jax.block_until_ready(fwd(pixel, input_ids, attn_mask, params))

    # threshold filtering (dynamic shapes) done host-side, like
    # processor.post_process_object_detection(..., threshold=0.5)
    threshold = 0.5
    s, l, bx = np.asarray(scores), np.asarray(labels), np.asarray(boxes)
    results = []
    for i in range(s.shape[0]):
        keep = s[i] > threshold
        results.append({"scores": s[i][keep], "labels": l[i][keep], "boxes": bx[i][keep]})

    assert s.shape == (B, NUM_PATCHES)
    assert l.shape == (B, NUM_PATCHES) and l.dtype == np.int32
    assert bx.shape == (B, NUM_PATCHES, 4)
    assert len(results) == B
    print("KERNEL_OK")
</pallas_src>

<mosaic_0001>
module attributes {stable_mosaic.version = 11 : i64} {
  func.func @_text_tower_kernel(%arg0: memref<3x8x32xf32, #tpu.memory_space<vmem>>, %arg1: memref<3x8xf32, #tpu.memory_space<vmem>>, %arg2: memref<2x1x64xf32, #tpu.memory_space<vmem>>, %arg3: memref<2x32x64xf32, #tpu.memory_space<vmem>>, %arg4: memref<2x1x32xf32, #tpu.memory_space<vmem>>, %arg5: memref<2x64x32xf32, #tpu.memory_space<vmem>>, %arg6: memref<1x32xf32, #tpu.memory_space<vmem>>, %arg7: memref<1x32xf32, #tpu.memory_space<vmem>>, %arg8: memref<2x1x32xf32, #tpu.memory_space<vmem>>, %arg9: memref<2x1x32xf32, #tpu.memory_space<vmem>>, %arg10: memref<2x1x32xf32, #tpu.memory_space<vmem>>, %arg11: memref<2x1x32xf32, #tpu.memory_space<vmem>>, %arg12: memref<2x1x32xf32, #tpu.memory_space<vmem>>, %arg13: memref<2x32x32xf32, #tpu.memory_space<vmem>>, %arg14: memref<32x32xf32, #tpu.memory_space<vmem>>, %arg15: memref<2x1x96xf32, #tpu.memory_space<vmem>>, %arg16: memref<2x32x96xf32, #tpu.memory_space<vmem>>, %arg17: memref<3x32xf32, #tpu.memory_space<vmem>>) attributes {dimension_semantics = [], scalar_prefetch = 0 : i64, scratch_operands = 0 : i64, tpu.core_type = #tpu.core_type<tc>} {
    %c0 = arith.constant 0 : index
    %c0_0 = arith.constant 0 : index
    %c0_1 = arith.constant 0 : index
    %0 = vector.load %arg0[%c0, %c0_0, %c0_1] : memref<3x8x32xf32, #tpu.memory_space<vmem>>, vector<3x8x32xf32>
    %c0_2 = arith.constant 0 : index
    %c0_3 = arith.constant 0 : index
    %1 = vector.load %arg1[%c0_2, %c0_3] : memref<3x8xf32, #tpu.memory_space<vmem>>, vector<3x8xf32>
    %2 = tpu.iota {dimensions = array<i32: 0>} : vector<8x8xi32>
    %3 = tpu.iota {dimensions = array<i32: 1>} : vector<8x8xi32>
    %4 = arith.cmpi sle, %3, %2 : vector<8x8xi32>
    %cst = arith.constant 0.000000e+00 : f32
    %cst_4 = arith.constant -1.000000e+09 : f32
    %5 = vector.broadcast %cst : f32 to vector<8x8xf32>
    %6 = vector.broadcast %cst_4 : f32 to vector<8x8xf32>
    %7 = arith.select %4, %5, %6 : vector<8x8xi1>, vector<8x8xf32>
    %8 = vector.shape_cast %7 : vector<8x8xf32> to vector<1x8x8xf32>
    %cst_5 = arith.constant 1.000000e+00 : f32
    %9 = vector.broadcast %cst_5 : f32 to vector<3x8xf32>
    %10 = arith.subf %9, %1 : vector<3x8xf32>
    %cst_6 = arith.constant -1.000000e+09 : f32
    %11 = vector.broadcast %cst_6 : f32 to vector<3x8xf32>
    %12 = arith.mulf %10, %11 : vector<3x8xf32>
    %13 = vector.shape_cast %12 : vector<3x8xf32> to vector<3x1x8xf32>
    %14 = vector.broadcast %8 : vector<1x8x8xf32> to vector<3x8x8xf32>
    %15 = vector.broadcast %13 : vector<3x1x8xf32> to vector<3x8x8xf32>
    %16 = arith.addf %14, %15 : vector<3x8x8xf32>
    %c0_7 = arith.constant 0 : index
    %c0_8 = arith.constant 0 : index
    %c0_9 = arith.constant 0 : index
    %17 = vector.load %arg9[%c0_7, %c0_8, %c0_9] : memref<2x1x32xf32, #tpu.memory_space<vmem>>, vector<1x1x32xf32>
    %18 = vector.shape_cast %17 : vector<1x1x32xf32> to vector<1x32xf32>
    %c0_10 = arith.constant 0 : index
    %c0_11 = arith.constant 0 : index
    %c0_12 = arith.constant 0 : index
    %19 = vector.load %arg8[%c0_10, %c0_11, %c0_12] : memref<2x1x32xf32, #tpu.memory_space<vmem>>, vector<1x1x32xf32>
    %20 = vector.shape_cast %19 : vector<1x1x32xf32> to vector<1x32xf32>
    %cst_13 = arith.constant dense<0.000000e+00> : vector<3x8xf32>
    %21 = vector.multi_reduction <add>, %0, %cst_13 [2] : vector<3x8x32xf32> to vector<3x8xf32>
    %22 = vector.shape_cast %21 : vector<3x8xf32> to vector<3x8x1xf32>
    %cst_14 = arith.constant 3.200000e+01 : f32
    %23 = vector.broadcast %cst_14 : f32 to vector<3x8x1xf32>
    %24 = arith.divf %22, %23 : vector<3x8x1xf32>
    %25 = vector.broadcast %24 : vector<3x8x1xf32> to vector<3x8x32xf32>
    %26 = arith.subf %0, %25 : vector<3x8x32xf32>
    %27 = arith.mulf %26, %26 : vector<3x8x32xf32>
    %cst_15 = arith.constant dense<0.000000e+00> : vector<3x8xf32>
    %28 = vector.multi_reduction <add>, %27, %cst_15 [2] : vector<3x8x32xf32> to vector<3x8xf32>
    %29 = vector.shape_cast %28 : vector<3x8xf32> to vector<3x8x1xf32>
    %cst_16 = arith.constant 3.200000e+01 : f32
    %30 = vector.broadcast %cst_16 : f32 to vector<3x8x1xf32>
    %31 = arith.divf %29, %30 : vector<3x8x1xf32>
    %cst_17 = arith.constant 9.99999974E-6 : f32
    %32 = vector.broadcast %cst_17 : f32 to vector<3x8x1xf32>
    %33 = arith.addf %31, %32 : vector<3x8x1xf32>
    %34 = math.rsqrt %33 : vector<3x8x1xf32>
    %35 = vector.broadcast %34 : vector<3x8x1xf32> to vector<3x8x32xf32>
    %36 = arith.mulf %26, %35 : vector<3x8x32xf32>
    %37 = vector.shape_cast %18 : vector<1x32xf32> to vector<1x1x32xf32>
    %38 = vector.broadcast %37 : vector<1x1x32xf32> to vector<3x8x32xf32>
    %39 = arith.mulf %36, %38 : vector<3x8x32xf32>
    %40 = vector.shape_cast %20 : vector<1x32xf32> to vector<1x1x32xf32>
    %41 = vector.broadcast %40 : vector<1x1x32xf32> to vector<3x8x32xf32>
    %42 = arith.addf %39, %41 : vector<3x8x32xf32>
    %43 = vector.shape_cast %42 : vector<3x8x32xf32> to vector<24x32xf32>
    %c0_18 = arith.constant 0 : index
    %c0_19 = arith.constant 0 : index
    %c0_20 = arith.constant 0 : index
    %44 = vector.load %arg16[%c0_18, %c0_19, %c0_20] : memref<2x32x96xf32, #tpu.memory_space<vmem>>, vector<1x32x96xf32>
    %45 = vector.shape_cast %44 : vector<1x32x96xf32> to vector<32x96xf32>
    %c0_21 = arith.constant 0 : index
    %c0_22 = arith.constant 0 : index
    %c0_23 = arith.constant 0 : index
    %46 = vector.load %arg15[%c0_21, %c0_22, %c0_23] : memref<2x1x96xf32, #tpu.memory_space<vmem>>, vector<1x1x96xf32>
    %47 = vector.shape_cast %46 : vector<1x1x96xf32> to vector<1x96xf32>
    %cst_24 = arith.constant dense<0.000000e+00> : vector<24x96xf32>
    %48 = tpu.matmul %43, %45, %cst_24 {dimension_numbers = #tpu.dot_dimension_numbers<[1], [0], [0], [1], [0, 0, 1, 1], [], []>} : vector<24x32xf32>, vector<32x96xf32>, vector<24x96xf32> -> vector<24x96xf32>
    %49 = vector.broadcast %47 : vector<1x96xf32> to vector<24x96xf32>
    %50 = arith.addf %48, %49 : vector<24x96xf32>
    %51 = vector.shape_cast %50 : vector<24x96xf32> to vector<3x8x96xf32>
    %52 = vector.extract_strided_slice %51 {offsets = [0, 0, 0], sizes = [3, 8, 16], strides = [1, 1, 1]} : vector<3x8x96xf32> to vector<3x8x16xf32>
    %cst_25 = arith.constant 2.500000e-01 : f32
    %53 = vector.broadcast %cst_25 : f32 to vector<3x8x16xf32>
    %54 = arith.mulf %52, %53 : vector<3x8x16xf32>
    %55 = vector.extract_strided_slice %51 {offsets = [0, 0, 32], sizes = [3, 8, 16], strides = [1, 1, 1]} : vector<3x8x96xf32> to vector<3x8x16xf32>
    %56 = vector.extract_strided_slice %51 {offsets = [0, 0, 64], sizes = [3, 8, 16], strides = [1, 1, 1]} : vector<3x8x96xf32> to vector<3x8x16xf32>
    %cst_26 = arith.constant dense<0.000000e+00> : vector<3x8x8xf32>
    %57 = tpu.matmul %54, %55, %cst_26 {dimension_numbers = #tpu.dot_dimension_numbers<[2], [2], [1], [1], [0, 0, 0, 1, 1, 1], [0], [0]>} : vector<3x8x16xf32>, vector<3x8x16xf32>, vector<3x8x8xf32> -> vector<3x8x8xf32>
    %58 = arith.addf %57, %16 : vector<3x8x8xf32>
    %cst_27 = arith.constant dense<0xFF800000> : vector<3x8xf32>
    %59 = vector.multi_reduction <maximumf>, %58, %cst_27 [2] : vector<3x8x8xf32> to vector<3x8xf32>
    %60 = vector.shape_cast %59 : vector<3x8xf32> to vector<3x8x1xf32>
    %61 = vector.broadcast %60 : vector<3x8x1xf32> to vector<3x8x8xf32>
    %62 = arith.subf %58, %61 : vector<3x8x8xf32>
    %63 = math.exp %62 : vector<3x8x8xf32>
    %cst_28 = arith.constant dense<0.000000e+00> : vector<3x8xf32>
    %64 = vector.multi_reduction <add>, %63, %cst_28 [2] : vector<3x8x8xf32> to vector<3x8xf32>
    %65 = vector.shape_cast %64 : vector<3x8xf32> to vector<3x8x1xf32>
    %66 = tpu.reciprocal %65 {approx = true} : vector<3x8x1xf32> -> vector<3x8x1xf32>
    %67 = vector.broadcast %66 : vector<3x8x1xf32> to vector<3x8x8xf32>
    %68 = arith.mulf %63, %67 : vector<3x8x8xf32>
    %cst_29 = arith.constant dense<0.000000e+00> : vector<3x8x16xf32>
    %69 = tpu.matmul %68, %56, %cst_29 {dimension_numbers = #tpu.dot_dimension_numbers<[2], [1], [1], [2], [0, 0, 0, 1, 1, 2], [0], [0]>} : vector<3x8x8xf32>, vector<3x8x16xf32>, vector<3x8x16xf32> -> vector<3x8x16xf32>
    %70 = vector.extract_strided_slice %51 {offsets = [0, 0, 16], sizes = [3, 8, 16], strides = [1, 1, 1]} : vector<3x8x96xf32> to vector<3x8x16xf32>
    %cst_30 = arith.constant 2.500000e-01 : f32
    %71 = vector.broadcast %cst_30 : f32 to vector<3x8x16xf32>
    %72 = arith.mulf %70, %71 : vector<3x8x16xf32>
    %73 = vector.extract_strided_slice %51 {offsets = [0, 0, 48], sizes = [3, 8, 16], strides = [1, 1, 1]} : vector<3x8x96xf32> to vector<3x8x16xf32>
    %74 = vector.extract_strided_slice %51 {offsets = [0, 0, 80], sizes = [3, 8, 16], strides = [1, 1, 1]} : vector<3x8x96xf32> to vector<3x8x16xf32>
    %cst_31 = arith.constant dense<0.000000e+00> : vector<3x8x8xf32>
    %75 = tpu.matmul %72, %73, %cst_31 {dimension_numbers = #tpu.dot_dimension_numbers<[2], [2], [1], [1], [0, 0, 0, 1, 1, 1], [0], [0]>} : vector<3x8x16xf32>, vector<3x8x16xf32>, vector<3x8x8xf32> -> vector<3x8x8xf32>
    %76 = arith.addf %75, %16 : vector<3x8x8xf32>
    %cst_32 = arith.constant dense<0xFF800000> : vector<3x8xf32>
    %77 = vector.multi_reduction <maximumf>, %76, %cst_32 [2] : vector<3x8x8xf32> to vector<3x8xf32>
    %78 = vector.shape_cast %77 : vector<3x8xf32> to vector<3x8x1xf32>
    %79 = vector.broadcast %78 : vector<3x8x1xf32> to vector<3x8x8xf32>
    %80 = arith.subf %76, %79 : vector<3x8x8xf32>
    %81 = math.exp %80 : vector<3x8x8xf32>
    %cst_33 = arith.constant dense<0.000000e+00> : vector<3x8xf32>
    %82 = vector.multi_reduction <add>, %81, %cst_33 [2] : vector<3x8x8xf32> to vector<3x8xf32>
    %83 = vector.shape_cast %82 : vector<3x8xf32> to vector<3x8x1xf32>
    %84 = tpu.reciprocal %83 {approx = true} : vector<3x8x1xf32> -> vector<3x8x1xf32>
    %85 = vector.broadcast %84 : vector<3x8x1xf32> to vector<3x8x8xf32>
    %86 = arith.mulf %81, %85 : vector<3x8x8xf32>
    %cst_34 = arith.constant dense<0.000000e+00> : vector<3x8x16xf32>
    %87 = tpu.matmul %86, %74, %cst_34 {dimension_numbers = #tpu.dot_dimension_numbers<[2], [1], [1], [2], [0, 0, 0, 1, 1, 2], [0], [0]>} : vector<3x8x8xf32>, vector<3x8x16xf32>, vector<3x8x16xf32> -> vector<3x8x16xf32>
    %88 = tpu.concatenate %69, %87 in 2 : vector<3x8x16xf32>, vector<3x8x16xf32> -> vector<3x8x32xf32>
    %89 = vector.shape_cast %88 : vector<3x8x32xf32> to vector<24x32xf32>
    %c0_35 = arith.constant 0 : index
    %c0_36 = arith.constant 0 : index
    %c0_37 = arith.constant 0 : index
    %90 = vector.load %arg13[%c0_35, %c0_36, %c0_37] : memref<2x32x32xf32, #tpu.memory_space<vmem>>, vector<1x32x32xf32>
    %91 = vector.shape_cast %90 : vector<1x32x32xf32> to vector<32x32xf32>
    %c0_38 = arith.constant 0 : index
    %c0_39 = arith.constant 0 : index
    %c0_40 = arith.constant 0 : index
    %92 = vector.load %arg12[%c0_38, %c0_39, %c0_40] : memref<2x1x32xf32, #tpu.memory_space<vmem>>, vector<1x1x32xf32>
    %93 = vector.shape_cast %92 : vector<1x1x32xf32> to vector<1x32xf32>
    %cst_41 = arith.constant dense<0.000000e+00> : vector<24x32xf32>
    %94 = tpu.matmul %89, %91, %cst_41 {dimension_numbers = #tpu.dot_dimension_numbers<[1], [0], [0], [1], [0, 0, 1, 1], [], []>} : vector<24x32xf32>, vector<32x32xf32>, vector<24x32xf32> -> vector<24x32xf32>
    %95 = vector.broadcast %93 : vector<1x32xf32> to vector<24x32xf32>
    %96 = arith.addf %94, %95 : vector<24x32xf32>
    %97 = vector.shape_cast %96 : vector<24x32xf32> to vector<3x8x32xf32>
    %98 = arith.addf %0, %97 : vector<3x8x32xf32>
    %c0_42 = arith.constant 0 : index
    %c0_43 = arith.constant 0 : index
    %c0_44 = arith.constant 0 : index
    %99 = vector.load %arg11[%c0_42, %c0_43, %c0_44] : memref<2x1x32xf32, #tpu.memory_space<vmem>>, vector<1x1x32xf32>
    %100 = vector.shape_cast %99 : vector<1x1x32xf32> to vector<1x32xf32>
    %c0_45 = arith.constant 0 : index
    %c0_46 = arith.constant 0 : index
    %c0_47 = arith.constant 0 : index
    %101 = vector.load %arg10[%c0_45, %c0_46, %c0_47] : memref<2x1x32xf32, #tpu.memory_space<vmem>>, vector<1x1x32xf32>
    %102 = vector.shape_cast %101 : vector<1x1x32xf32> to vector<1x32xf32>
    %cst_48 = arith.constant dense<0.000000e+00> : vector<3x8xf32>
    %103 = vector.multi_reduction <add>, %98, %cst_48 [2] : vector<3x8x32xf32> to vector<3x8xf32>
    %104 = vector.shape_cast %103 : vector<3x8xf32> to vector<3x8x1xf32>
    %cst_49 = arith.constant 3.200000e+01 : f32
    %105 = vector.broadcast %cst_49 : f32 to vector<3x8x1xf32>
    %106 = arith.divf %104, %105 : vector<3x8x1xf32>
    %107 = vector.broadcast %106 : vector<3x8x1xf32> to vector<3x8x32xf32>
    %108 = arith.subf %98, %107 : vector<3x8x32xf32>
    %109 = arith.mulf %108, %108 : vector<3x8x32xf32>
    %cst_50 = arith.constant dense<0.000000e+00> : vector<3x8xf32>
    %110 = vector.multi_reduction <add>, %109, %cst_50 [2] : vector<3x8x32xf32> to vector<3x8xf32>
    %111 = vector.shape_cast %110 : vector<3x8xf32> to vector<3x8x1xf32>
    %cst_51 = arith.constant 3.200000e+01 : f32
    %112 = vector.broadcast %cst_51 : f32 to vector<3x8x1xf32>
    %113 = arith.divf %111, %112 : vector<3x8x1xf32>
    %cst_52 = arith.constant 9.99999974E-6 : f32
    %114 = vector.broadcast %cst_52 : f32 to vector<3x8x1xf32>
    %115 = arith.addf %113, %114 : vector<3x8x1xf32>
    %116 = math.rsqrt %115 : vector<3x8x1xf32>
    %117 = vector.broadcast %116 : vector<3x8x1xf32> to vector<3x8x32xf32>
    %118 = arith.mulf %108, %117 : vector<3x8x32xf32>
    %119 = vector.shape_cast %100 : vector<1x32xf32> to vector<1x1x32xf32>
    %120 = vector.broadcast %119 : vector<1x1x32xf32> to vector<3x8x32xf32>
    %121 = arith.mulf %118, %120 : vector<3x8x32xf32>
    %122 = vector.shape_cast %102 : vector<1x32xf32> to vector<1x1x32xf32>
    %123 = vector.broadcast %122 : vector<1x1x32xf32> to vector<3x8x32xf32>
    %124 = arith.addf %121, %123 : vector<3x8x32xf32>
    %125 = vector.shape_cast %124 : vector<3x8x32xf32> to vector<24x32xf32>
    %c0_53 = arith.constant 0 : index
    %c0_54 = arith.constant 0 : index
    %c0_55 = arith.constant 0 : index
    %126 = vector.load %arg3[%c0_53, %c0_54, %c0_55] : memref<2x32x64xf32, #tpu.memory_space<vmem>>, vector<1x32x64xf32>
    %127 = vector.shape_cast %126 : vector<1x32x64xf32> to vector<32x64xf32>
    %c0_56 = arith.constant 0 : index
    %c0_57 = arith.constant 0 : index
    %c0_58 = arith.constant 0 : index
    %128 = vector.load %arg2[%c0_56, %c0_57, %c0_58] : memref<2x1x64xf32, #tpu.memory_space<vmem>>, vector<1x1x64xf32>
    %129 = vector.shape_cast %128 : vector<1x1x64xf32> to vector<1x64xf32>
    %cst_59 = arith.constant dense<0.000000e+00> : vector<24x64xf32>
    %130 = tpu.matmul %125, %127, %cst_59 {dimension_numbers = #tpu.dot_dimension_numbers<[1], [0], [0], [1], [0, 0, 1, 1], [], []>} : vector<24x32xf32>, vector<32x64xf32>, vector<24x64xf32> -> vector<24x64xf32>
    %131 = vector.broadcast %129 : vector<1x64xf32> to vector<24x64xf32>
    %132 = arith.addf %130, %131 : vector<24x64xf32>
    %cst_60 = arith.constant 1.702000e+00 : f32
    %133 = vector.broadcast %cst_60 : f32 to vector<24x64xf32>
    %134 = arith.mulf %133, %132 : vector<24x64xf32>
    %cst_61 = arith.constant 0.000000e+00 : f32
    %135 = vector.broadcast %cst_61 : f32 to vector<24x64xf32>
    %136 = arith.subf %135, %134 : vector<24x64xf32>
    %137 = math.exp %136 : vector<24x64xf32>
    %cst_62 = arith.constant 1.000000e+00 : f32
    %138 = vector.broadcast %cst_62 : f32 to vector<24x64xf32>
    %139 = arith.addf %138, %137 : vector<24x64xf32>
    %cst_63 = arith.constant 1.000000e+00 : f32
    %140 = vector.broadcast %cst_63 : f32 to vector<24x64xf32>
    %141 = arith.divf %140, %139 : vector<24x64xf32>
    %142 = arith.mulf %132, %141 : vector<24x64xf32>
    %c0_64 = arith.constant 0 : index
    %c0_65 = arith.constant 0 : index
    %c0_66 = arith.constant 0 : index
    %143 = vector.load %arg5[%c0_64, %c0_65, %c0_66] : memref<2x64x32xf32, #tpu.memory_space<vmem>>, vector<1x64x32xf32>
    %144 = vector.shape_cast %143 : vector<1x64x32xf32> to vector<64x32xf32>
    %c0_67 = arith.constant 0 : index
    %c0_68 = arith.constant 0 : index
    %c0_69 = arith.constant 0 : index
    %145 = vector.load %arg4[%c0_67, %c0_68, %c0_69] : memref<2x1x32xf32, #tpu.memory_space<vmem>>, vector<1x1x32xf32>
    %146 = vector.shape_cast %145 : vector<1x1x32xf32> to vector<1x32xf32>
    %cst_70 = arith.constant dense<0.000000e+00> : vector<24x32xf32>
    %147 = tpu.matmul %142, %144, %cst_70 {dimension_numbers = #tpu.dot_dimension_numbers<[1], [0], [0], [1], [0, 0, 1, 1], [], []>} : vector<24x64xf32>, vector<64x32xf32>, vector<24x32xf32> -> vector<24x32xf32>
    %148 = vector.broadcast %146 : vector<1x32xf32> to vector<24x32xf32>
    %149 = arith.addf %147, %148 : vector<24x32xf32>
    %150 = vector.shape_cast %149 : vector<24x32xf32> to vector<3x8x32xf32>
    %151 = arith.addf %98, %150 : vector<3x8x32xf32>
    %c1 = arith.constant 1 : index
    %c0_71 = arith.constant 0 : index
    %c0_72 = arith.constant 0 : index
    %152 = vector.load %arg9[%c1, %c0_71, %c0_72] : memref<2x1x32xf32, #tpu.memory_space<vmem>>, vector<1x1x32xf32>
    %153 = vector.shape_cast %152 : vector<1x1x32xf32> to vector<1x32xf32>
    %c1_73 = arith.constant 1 : index
    %c0_74 = arith.constant 0 : index
    %c0_75 = arith.constant 0 : index
    %154 = vector.load %arg8[%c1_73, %c0_74, %c0_75] : memref<2x1x32xf32, #tpu.memory_space<vmem>>, vector<1x1x32xf32>
    %155 = vector.shape_cast %154 : vector<1x1x32xf32> to vector<1x32xf32>
    %cst_76 = arith.constant dense<0.000000e+00> : vector<3x8xf32>
    %156 = vector.multi_reduction <add>, %151, %cst_76 [2] : vector<3x8x32xf32> to vector<3x8xf32>
    %157 = vector.shape_cast %156 : vector<3x8xf32> to vector<3x8x1xf32>
    %cst_77 = arith.constant 3.200000e+01 : f32
    %158 = vector.broadcast %cst_77 : f32 to vector<3x8x1xf32>
    %159 = arith.divf %157, %158 : vector<3x8x1xf32>
    %160 = vector.broadcast %159 : vector<3x8x1xf32> to vector<3x8x32xf32>
    %161 = arith.subf %151, %160 : vector<3x8x32xf32>
    %162 = arith.mulf %161, %161 : vector<3x8x32xf32>
    %cst_78 = arith.constant dense<0.000000e+00> : vector<3x8xf32>
    %163 = vector.multi_reduction <add>, %162, %cst_78 [2] : vector<3x8x32xf32> to vector<3x8xf32>
    %164 = vector.shape_cast %163 : vector<3x8xf32> to vector<3x8x1xf32>
    %cst_79 = arith.constant 3.200000e+01 : f32
    %165 = vector.broadcast %cst_79 : f32 to vector<3x8x1xf32>
    %166 = arith.divf %164, %165 : vector<3x8x1xf32>
    %cst_80 = arith.constant 9.99999974E-6 : f32
    %167 = vector.broadcast %cst_80 : f32 to vector<3x8x1xf32>
    %168 = arith.addf %166, %167 : vector<3x8x1xf32>
    %169 = math.rsqrt %168 : vector<3x8x1xf32>
    %170 = vector.broadcast %169 : vector<3x8x1xf32> to vector<3x8x32xf32>
    %171 = arith.mulf %161, %170 : vector<3x8x32xf32>
    %172 = vector.shape_cast %153 : vector<1x32xf32> to vector<1x1x32xf32>
    %173 = vector.broadcast %172 : vector<1x1x32xf32> to vector<3x8x32xf32>
    %174 = arith.mulf %171, %173 : vector<3x8x32xf32>
    %175 = vector.shape_cast %155 : vector<1x32xf32> to vector<1x1x32xf32>
    %176 = vector.broadcast %175 : vector<1x1x32xf32> to vector<3x8x32xf32>
    %177 = arith.addf %174, %176 : vector<3x8x32xf32>
    %178 = vector.shape_cast %177 : vector<3x8x32xf32> to vector<24x32xf32>
    %c1_81 = arith.constant 1 : index
    %c0_82 = arith.constant 0 : index
    %c0_83 = arith.constant 0 : index
    %179 = vector.load %arg16[%c1_81, %c0_82, %c0_83] : memref<2x32x96xf32, #tpu.memory_space<vmem>>, vector<1x32x96xf32>
    %180 = vector.shape_cast %179 : vector<1x32x96xf32> to vector<32x96xf32>
    %c1_84 = arith.constant 1 : index
    %c0_85 = arith.constant 0 : index
    %c0_86 = arith.constant 0 : index
    %181 = vector.load %arg15[%c1_84, %c0_85, %c0_86] : memref<2x1x96xf32, #tpu.memory_space<vmem>>, vector<1x1x96xf32>
    %182 = vector.shape_cast %181 : vector<1x1x96xf32> to vector<1x96xf32>
    %cst_87 = arith.constant dense<0.000000e+00> : vector<24x96xf32>
    %183 = tpu.matmul %178, %180, %cst_87 {dimension_numbers = #tpu.dot_dimension_numbers<[1], [0], [0], [1], [0, 0, 1, 1], [], []>} : vector<24x32xf32>, vector<32x96xf32>, vector<24x96xf32> -> vector<24x96xf32>
    %184 = vector.broadcast %182 : vector<1x96xf32> to vector<24x96xf32>
    %185 = arith.addf %183, %184 : vector<24x96xf32>
    %186 = vector.shape_cast %185 : vector<24x96xf32> to vector<3x8x96xf32>
    %187 = vector.extract_strided_slice %186 {offsets = [0, 0, 0], sizes = [3, 8, 16], strides = [1, 1, 1]} : vector<3x8x96xf32> to vector<3x8x16xf32>
    %cst_88 = arith.constant 2.500000e-01 : f32
    %188 = vector.broadcast %cst_88 : f32 to vector<3x8x16xf32>
    %189 = arith.mulf %187, %188 : vector<3x8x16xf32>
    %190 = vector.extract_strided_slice %186 {offsets = [0, 0, 32], sizes = [3, 8, 16], strides = [1, 1, 1]} : vector<3x8x96xf32> to vector<3x8x16xf32>
    %191 = vector.extract_strided_slice %186 {offsets = [0, 0, 64], sizes = [3, 8, 16], strides = [1, 1, 1]} : vector<3x8x96xf32> to vector<3x8x16xf32>
    %cst_89 = arith.constant dense<0.000000e+00> : vector<3x8x8xf32>
    %192 = tpu.matmul %189, %190, %cst_89 {dimension_numbers = #tpu.dot_dimension_numbers<[2], [2], [1], [1], [0, 0, 0, 1, 1, 1], [0], [0]>} : vector<3x8x16xf32>, vector<3x8x16xf32>, vector<3x8x8xf32> -> vector<3x8x8xf32>
    %193 = arith.addf %192, %16 : vector<3x8x8xf32>
    %cst_90 = arith.constant dense<0xFF800000> : vector<3x8xf32>
    %194 = vector.multi_reduction <maximumf>, %193, %cst_90 [2] : vector<3x8x8xf32> to vector<3x8xf32>
    %195 = vector.shape_cast %194 : vector<3x8xf32> to vector<3x8x1xf32>
    %196 = vector.broadcast %195 : vector<3x8x1xf32> to vector<3x8x8xf32>
    %197 = arith.subf %193, %196 : vector<3x8x8xf32>
    %198 = math.exp %197 : vector<3x8x8xf32>
    %cst_91 = arith.constant dense<0.000000e+00> : vector<3x8xf32>
    %199 = vector.multi_reduction <add>, %198, %cst_91 [2] : vector<3x8x8xf32> to vector<3x8xf32>
    %200 = vector.shape_cast %199 : vector<3x8xf32> to vector<3x8x1xf32>
    %201 = tpu.reciprocal %200 {approx = true} : vector<3x8x1xf32> -> vector<3x8x1xf32>
    %202 = vector.broadcast %201 : vector<3x8x1xf32> to vector<3x8x8xf32>
    %203 = arith.mulf %198, %202 : vector<3x8x8xf32>
    %cst_92 = arith.constant dense<0.000000e+00> : vector<3x8x16xf32>
    %204 = tpu.matmul %203, %191, %cst_92 {dimension_numbers = #tpu.dot_dimension_numbers<[2], [1], [1], [2], [0, 0, 0, 1, 1, 2], [0], [0]>} : vector<3x8x8xf32>, vector<3x8x16xf32>, vector<3x8x16xf32> -> vector<3x8x16xf32>
    %205 = vector.extract_strided_slice %186 {offsets = [0, 0, 16], sizes = [3, 8, 16], strides = [1, 1, 1]} : vector<3x8x96xf32> to vector<3x8x16xf32>
    %cst_93 = arith.constant 2.500000e-01 : f32
    %206 = vector.broadcast %cst_93 : f32 to vector<3x8x16xf32>
    %207 = arith.mulf %205, %206 : vector<3x8x16xf32>
    %208 = vector.extract_strided_slice %186 {offsets = [0, 0, 48], sizes = [3, 8, 16], strides = [1, 1, 1]} : vector<3x8x96xf32> to vector<3x8x16xf32>
    %209 = vector.extract_strided_slice %186 {offsets = [0, 0, 80], sizes = [3, 8, 16], strides = [1, 1, 1]} : vector<3x8x96xf32> to vector<3x8x16xf32>
    %cst_94 = arith.constant dense<0.000000e+00> : vector<3x8x8xf32>
    %210 = tpu.matmul %207, %208, %cst_94 {dimension_numbers = #tpu.dot_dimension_numbers<[2], [2], [1], [1], [0, 0, 0, 1, 1, 1], [0], [0]>} : vector<3x8x16xf32>, vector<3x8x16xf32>, vector<3x8x8xf32> -> vector<3x8x8xf32>
    %211 = arith.addf %210, %16 : vector<3x8x8xf32>
    %cst_95 = arith.constant dense<0xFF800000> : vector<3x8xf32>
    %212 = vector.multi_reduction <maximumf>, %211, %cst_95 [2] : vector<3x8x8xf32> to vector<3x8xf32>
    %213 = vector.shape_cast %212 : vector<3x8xf32> to vector<3x8x1xf32>
    %214 = vector.broadcast %213 : vector<3x8x1xf32> to vector<3x8x8xf32>
    %215 = arith.subf %211, %214 : vector<3x8x8xf32>
    %216 = math.exp %215 : vector<3x8x8xf32>
    %cst_96 = arith.constant dense<0.000000e+00> : vector<3x8xf32>
    %217 = vector.multi_reduction <add>, %216, %cst_96 [2] : vector<3x8x8xf32> to vector<3x8xf32>
    %218 = vector.shape_cast %217 : vector<3x8xf32> to vector<3x8x1xf32>
    %219 = tpu.reciprocal %218 {approx = true} : vector<3x8x1xf32> -> vector<3x8x1xf32>
    %220 = vector.broadcast %219 : vector<3x8x1xf32> to vector<3x8x8xf32>
    %221 = arith.mulf %216, %220 : vector<3x8x8xf32>
    %cst_97 = arith.constant dense<0.000000e+00> : vector<3x8x16xf32>
    %222 = tpu.matmul %221, %209, %cst_97 {dimension_numbers = #tpu.dot_dimension_numbers<[2], [1], [1], [2], [0, 0, 0, 1, 1, 2], [0], [0]>} : vector<3x8x8xf32>, vector<3x8x16xf32>, vector<3x8x16xf32> -> vector<3x8x16xf32>
    %223 = tpu.concatenate %204, %222 in 2 : vector<3x8x16xf32>, vector<3x8x16xf32> -> vector<3x8x32xf32>
    %224 = vector.shape_cast %223 : vector<3x8x32xf32> to vector<24x32xf32>
    %c1_98 = arith.constant 1 : index
    %c0_99 = arith.constant 0 : index
    %c0_100 = arith.constant 0 : index
    %225 = vector.load %arg13[%c1_98, %c0_99, %c0_100] : memref<2x32x32xf32, #tpu.memory_space<vmem>>, vector<1x32x32xf32>
    %226 = vector.shape_cast %225 : vector<1x32x32xf32> to vector<32x32xf32>
    %c1_101 = arith.constant 1 : index
    %c0_102 = arith.constant 0 : index
    %c0_103 = arith.constant 0 : index
    %227 = vector.load %arg12[%c1_101, %c0_102, %c0_103] : memref<2x1x32xf32, #tpu.memory_space<vmem>>, vector<1x1x32xf32>
    %228 = vector.shape_cast %227 : vector<1x1x32xf32> to vector<1x32xf32>
    %cst_104 = arith.constant dense<0.000000e+00> : vector<24x32xf32>
    %229 = tpu.matmul %224, %226, %cst_104 {dimension_numbers = #tpu.dot_dimension_numbers<[1], [0], [0], [1], [0, 0, 1, 1], [], []>} : vector<24x32xf32>, vector<32x32xf32>, vector<24x32xf32> -> vector<24x32xf32>
    %230 = vector.broadcast %228 : vector<1x32xf32> to vector<24x32xf32>
    %231 = arith.addf %229, %230 : vector<24x32xf32>
    %232 = vector.shape_cast %231 : vector<24x32xf32> to vector<3x8x32xf32>
    %233 = arith.addf %151, %232 : vector<3x8x32xf32>
    %c1_105 = arith.constant 1 : index
    %c0_106 = arith.constant 0 : index
    %c0_107 = arith.constant 0 : index
    %234 = vector.load %arg11[%c1_105, %c0_106, %c0_107] : memref<2x1x32xf32, #tpu.memory_space<vmem>>, vector<1x1x32xf32>
    %235 = vector.shape_cast %234 : vector<1x1x32xf32> to vector<1x32xf32>
    %c1_108 = arith.constant 1 : index
    %c0_109 = arith.constant 0 : index
    %c0_110 = arith.constant 0 : index
    %236 = vector.load %arg10[%c1_108, %c0_109, %c0_110] : memref<2x1x32xf32, #tpu.memory_space<vmem>>, vector<1x1x32xf32>
    %237 = vector.shape_cast %236 : vector<1x1x32xf32> to vector<1x32xf32>
    %cst_111 = arith.constant dense<0.000000e+00> : vector<3x8xf32>
    %238 = vector.multi_reduction <add>, %233, %cst_111 [2] : vector<3x8x32xf32> to vector<3x8xf32>
    %239 = vector.shape_cast %238 : vector<3x8xf32> to vector<3x8x1xf32>
    %cst_112 = arith.constant 3.200000e+01 : f32
    %240 = vector.broadcast %cst_112 : f32 to vector<3x8x1xf32>
    %241 = arith.divf %239, %240 : vector<3x8x1xf32>
    %242 = vector.broadcast %241 : vector<3x8x1xf32> to vector<3x8x32xf32>
    %243 = arith.subf %233, %242 : vector<3x8x32xf32>
    %244 = arith.mulf %243, %243 : vector<3x8x32xf32>
    %cst_113 = arith.constant dense<0.000000e+00> : vector<3x8xf32>
    %245 = vector.multi_reduction <add>, %244, %cst_113 [2] : vector<3x8x32xf32> to vector<3x8xf32>
    %246 = vector.shape_cast %245 : vector<3x8xf32> to vector<3x8x1xf32>
    %cst_114 = arith.constant 3.200000e+01 : f32
    %247 = vector.broadcast %cst_114 : f32 to vector<3x8x1xf32>
    %248 = arith.divf %246, %247 : vector<3x8x1xf32>
    %cst_115 = arith.constant 9.99999974E-6 : f32
    %249 = vector.broadcast %cst_115 : f32 to vector<3x8x1xf32>
    %250 = arith.addf %248, %249 : vector<3x8x1xf32>
    %251 = math.rsqrt %250 : vector<3x8x1xf32>
    %252 = vector.broadcast %251 : vector<3x8x1xf32> to vector<3x8x32xf32>
    %253 = arith.mulf %243, %252 : vector<3x8x32xf32>
    %254 = vector.shape_cast %235 : vector<1x32xf32> to vector<1x1x32xf32>
    %255 = vector.broadcast %254 : vector<1x1x32xf32> to vector<3x8x32xf32>
    %256 = arith.mulf %253, %255 : vector<3x8x32xf32>
    %257 = vector.shape_cast %237 : vector<1x32xf32> to vector<1x1x32xf32>
    %258 = vector.broadcast %257 : vector<1x1x32xf32> to vector<3x8x32xf32>
    %259 = arith.addf %256, %258 : vector<3x8x32xf32>
    %260 = vector.shape_cast %259 : vector<3x8x32xf32> to vector<24x32xf32>
    %c1_116 = arith.constant 1 : index
    %c0_117 = arith.constant 0 : index
    %c0_118 = arith.constant 0 : index
    %261 = vector.load %arg3[%c1_116, %c0_117, %c0_118] : memref<2x32x64xf32, #tpu.memory_space<vmem>>, vector<1x32x64xf32>
    %262 = vector.shape_cast %261 : vector<1x32x64xf32> to vector<32x64xf32>
    %c1_119 = arith.constant 1 : index
    %c0_120 = arith.constant 0 : index
    %c0_121 = arith.constant 0 : index
    %263 = vector.load %arg2[%c1_119, %c0_120, %c0_121] : memref<2x1x64xf32, #tpu.memory_space<vmem>>, vector<1x1x64xf32>
    %264 = vector.shape_cast %263 : vector<1x1x64xf32> to vector<1x64xf32>
    %cst_122 = arith.constant dense<0.000000e+00> : vector<24x64xf32>
    %265 = tpu.matmul %260, %262, %cst_122 {dimension_numbers = #tpu.dot_dimension_numbers<[1], [0], [0], [1], [0, 0, 1, 1], [], []>} : vector<24x32xf32>, vector<32x64xf32>, vector<24x64xf32> -> vector<24x64xf32>
    %266 = vector.broadcast %264 : vector<1x64xf32> to vector<24x64xf32>
    %267 = arith.addf %265, %266 : vector<24x64xf32>
    %cst_123 = arith.constant 1.702000e+00 : f32
    %268 = vector.broadcast %cst_123 : f32 to vector<24x64xf32>
    %269 = arith.mulf %268, %267 : vector<24x64xf32>
    %cst_124 = arith.constant 0.000000e+00 : f32
    %270 = vector.broadcast %cst_124 : f32 to vector<24x64xf32>
    %271 = arith.subf %270, %269 : vector<24x64xf32>
    %272 = math.exp %271 : vector<24x64xf32>
    %cst_125 = arith.constant 1.000000e+00 : f32
    %273 = vector.broadcast %cst_125 : f32 to vector<24x64xf32>
    %274 = arith.addf %273, %272 : vector<24x64xf32>
    %cst_126 = arith.constant 1.000000e+00 : f32
    %275 = vector.broadcast %cst_126 : f32 to vector<24x64xf32>
    %276 = arith.divf %275, %274 : vector<24x64xf32>
    %277 = arith.mulf %267, %276 : vector<24x64xf32>
    %c1_127 = arith.constant 1 : index
    %c0_128 = arith.constant 0 : index
    %c0_129 = arith.constant 0 : index
    %278 = vector.load %arg5[%c1_127, %c0_128, %c0_129] : memref<2x64x32xf32, #tpu.memory_space<vmem>>, vector<1x64x32xf32>
    %279 = vector.shape_cast %278 : vector<1x64x32xf32> to vector<64x32xf32>
    %c1_130 = arith.constant 1 : index
    %c0_131 = arith.constant 0 : index
    %c0_132 = arith.constant 0 : index
    %280 = vector.load %arg4[%c1_130, %c0_131, %c0_132] : memref<2x1x32xf32, #tpu.memory_space<vmem>>, vector<1x1x32xf32>
    %281 = vector.shape_cast %280 : vector<1x1x32xf32> to vector<1x32xf32>
    %cst_133 = arith.constant dense<0.000000e+00> : vector<24x32xf32>
    %282 = tpu.matmul %277, %279, %cst_133 {dimension_numbers = #tpu.dot_dimension_numbers<[1], [0], [0], [1], [0, 0, 1, 1], [], []>} : vector<24x64xf32>, vector<64x32xf32>, vector<24x32xf32> -> vector<24x32xf32>
    %283 = vector.broadcast %281 : vector<1x32xf32> to vector<24x32xf32>
    %284 = arith.addf %282, %283 : vector<24x32xf32>
    %285 = vector.shape_cast %284 : vector<24x32xf32> to vector<3x8x32xf32>
    %286 = arith.addf %233, %285 : vector<3x8x32xf32>
    %c0_134 = arith.constant 0 : index
    %c0_135 = arith.constant 0 : index
    %287 = vector.load %arg7[%c0_134, %c0_135] : memref<1x32xf32, #tpu.memory_space<vmem>>, vector<1x32xf32>
    %c0_136 = arith.constant 0 : index
    %c0_137 = arith.constant 0 : index
    %288 = vector.load %arg6[%c0_136, %c0_137] : memref<1x32xf32, #tpu.memory_space<vmem>>, vector<1x32xf32>
    %cst_138 = arith.constant dense<0.000000e+00> : vector<3x8xf32>
    %289 = vector.multi_reduction <add>, %286, %cst_138 [2] : vector<3x8x32xf32> to vector<3x8xf32>
    %290 = vector.shape_cast %289 : vector<3x8xf32> to vector<3x8x1xf32>
    %cst_139 = arith.constant 3.200000e+01 : f32
    %291 = vector.broadcast %cst_139 : f32 to vector<3x8x1xf32>
    %292 = arith.divf %290, %291 : vector<3x8x1xf32>
    %293 = vector.broadcast %292 : vector<3x8x1xf32> to vector<3x8x32xf32>
    %294 = arith.subf %286, %293 : vector<3x8x32xf32>
    %295 = arith.mulf %294, %294 : vector<3x8x32xf32>
    %cst_140 = arith.constant dense<0.000000e+00> : vector<3x8xf32>
    %296 = vector.multi_reduction <add>, %295, %cst_140 [2] : vector<3x8x32xf32> to vector<3x8xf32>
    %297 = vector.shape_cast %296 : vector<3x8xf32> to vector<3x8x1xf32>
    %cst_141 = arith.constant 3.200000e+01 : f32
    %298 = vector.broadcast %cst_141 : f32 to vector<3x8x1xf32>
    %299 = arith.divf %297, %298 : vector<3x8x1xf32>
    %cst_142 = arith.constant 9.99999974E-6 : f32
    %300 = vector.broadcast %cst_142 : f32 to vector<3x8x1xf32>
    %301 = arith.addf %299, %300 : vector<3x8x1xf32>
    %302 = math.rsqrt %301 : vector<3x8x1xf32>
    %303 = vector.broadcast %302 : vector<3x8x1xf32> to vector<3x8x32xf32>
    %304 = arith.mulf %294, %303 : vector<3x8x32xf32>
    %305 = vector.shape_cast %287 : vector<1x32xf32> to vector<1x1x32xf32>
    %306 = vector.broadcast %305 : vector<1x1x32xf32> to vector<3x8x32xf32>
    %307 = arith.mulf %304, %306 : vector<3x8x32xf32>
    %308 = vector.shape_cast %288 : vector<1x32xf32> to vector<1x1x32xf32>
    %309 = vector.broadcast %308 : vector<1x1x32xf32> to vector<3x8x32xf32>
    %310 = arith.addf %307, %309 : vector<3x8x32xf32>
    %cst_143 = arith.constant dense<0.000000e+00> : vector<3xf32>
    %311 = vector.multi_reduction <add>, %1, %cst_143 [1] : vector<3x8xf32> to vector<3xf32>
    %312 = vector.shape_cast %311 : vector<3xf32> to vector<3x1xf32>
    %cst_144 = arith.constant 1.000000e+00 : f32
    %313 = vector.broadcast %cst_144 : f32 to vector<3x1xf32>
    %314 = arith.subf %312, %313 : vector<3x1xf32>
    %315 = arith.fptosi %314 : vector<3x1xf32> to vector<3x1xi32>
    %316 = tpu.iota {dimensions = array<i32: 1>} : vector<3x8xi32>
    %317 = vector.broadcast %315 : vector<3x1xi32> to vector<3x8xi32>
    %318 = arith.cmpi eq, %316, %317 : vector<3x8xi32>
    %319 = arith.extui %318 : vector<3x8xi1> to vector<3x8xi32>
    %320 = arith.sitofp %319 : vector<3x8xi32> to vector<3x8xf32>
    %321 = vector.shape_cast %320 : vector<3x8xf32> to vector<3x8x1xf32>
    %322 = vector.broadcast %321 : vector<3x8x1xf32> to vector<3x8x32xf32>
    %323 = arith.mulf %310, %322 : vector<3x8x32xf32>
    %cst_145 = arith.constant dense<0.000000e+00> : vector<3x32xf32>
    %324 = vector.multi_reduction <add>, %323, %cst_145 [1] : vector<3x8x32xf32> to vector<3x32xf32>
    %c0_146 = arith.constant 0 : index
    %c0_147 = arith.constant 0 : index
    %325 = vector.load %arg14[%c0_146, %c0_147] : memref<32x32xf32, #tpu.memory_space<vmem>>, vector<32x32xf32>
    %cst_148 = arith.constant dense<0.000000e+00> : vector<3x32xf32>
    %326 = tpu.matmul %324, %325, %cst_148 {dimension_numbers = #tpu.dot_dimension_numbers<[1], [0], [0], [1], [0, 0, 1, 1], [], []>} : vector<3x32xf32>, vector<32x32xf32>, vector<3x32xf32> -> vector<3x32xf32>
    %327 = arith.mulf %326, %326 : vector<3x32xf32>
    %cst_149 = arith.constant dense<0.000000e+00> : vector<3xf32>
    %328 = vector.multi_reduction <add>, %327, %cst_149 [1] : vector<3x32xf32> to vector<3xf32>
    %329 = vector.shape_cast %328 : vector<3xf32> to vector<3x1xf32>
    %330 = math.sqrt %329 : vector<3x1xf32>
    %cst_150 = arith.constant 9.99999997E-7 : f32
    %331 = vector.broadcast %cst_150 : f32 to vector<3x1xf32>
    %332 = arith.addf %330, %331 : vector<3x1xf32>
    %333 = vector.broadcast %332 : vector<3x1xf32> to vector<3x32xf32>
    %334 = arith.divf %326, %333 : vector<3x32xf32>
    %c0_151 = arith.constant 0 : index
    %c0_152 = arith.constant 0 : index
    %335 = vector.load %arg17[%c0_151, %c0_152] : memref<3x32xf32, #tpu.memory_space<vmem>>, vector<3x32xf32>
    tpu.vector_store %arg17[%c0_151, %c0_152], %334 {strides = array<i32>} : memref<3x32xf32, #tpu.memory_space<vmem>>, vector<3x32xf32>,
    return
  }
}

module attributes {stable_mosaic.version = 11 : i64} {
  func.func @_vision_det_kernel(%arg0: i32, %arg1: memref<1x16x192xf32, #tpu.memory_space<vmem>>, %arg2: memref<3x32xf32, #tpu.memory_space<vmem>>, %arg3: memref<1x32xf32, #tpu.memory_space<vmem>>, %arg4: memref<32x32xf32, #tpu.memory_space<vmem>>, %arg5: memref<1x4xf32, #tpu.memory_space<vmem>>, %arg6: memref<32x4xf32, #tpu.memory_space<vmem>>, %arg7: memref<16x4xf32, #tpu.memory_space<vmem>>, %arg8: memref<1x32xf32, #tpu.memory_space<vmem>>, %arg9: memref<2x1x64xf32, #tpu.memory_space<vmem>>, %arg10: memref<2x32x64xf32, #tpu.memory_space<vmem>>, %arg11: memref<2x1x32xf32, #tpu.memory_space<vmem>>, %arg12: memref<2x64x32xf32, #tpu.memory_space<vmem>>, %arg13: memref<1x66xf32, #tpu.memory_space<vmem>>, %arg14: memref<32x66xf32, #tpu.memory_space<vmem>>, %arg15: memref<2x1x32xf32, #tpu.memory_space<vmem>>, %arg16: memref<2x1x32xf32, #tpu.memory_space<vmem>>, %arg17: memref<2x1x32xf32, #tpu.memory_space<vmem>>, %arg18: memref<2x1x32xf32, #tpu.memory_space<vmem>>, %arg19: memref<1x32xf32, #tpu.memory_space<vmem>>, %arg20: memref<1x32xf32, #tpu.memory_space<vmem>>, %arg21: memref<2x1x32xf32, #tpu.memory_space<vmem>>, %arg22: memref<2x32x32xf32, #tpu.memory_space<vmem>>, %arg23: memref<192x32xf32, #tpu.memory_space<vmem>>, %arg24: memref<16x32xf32, #tpu.memory_space<vmem>>, %arg25: memref<1x32xf32, #tpu.memory_space<vmem>>, %arg26: memref<1x32xf32, #tpu.memory_space<vmem>>, %arg27: memref<1x32xf32, #tpu.memory_space<vmem>>, %arg28: memref<1x32xf32, #tpu.memory_space<vmem>>, %arg29: memref<2x1x96xf32, #tpu.memory_space<vmem>>, %arg30: memref<2x32x96xf32, #tpu.memory_space<vmem>>, %arg31: memref<1x16x8xf32, #tpu.memory_space<vmem>>) attributes {dimension_semantics = [#tpu.dimension_semantics<parallel>], iteration_bounds = array<i64: 2>, scalar_prefetch = 0 : i64, scratch_operands = 0 : i64, tpu.core_type = #tpu.core_type<tc>, window_params = [{transform_indices = @transform_0, window_bounds = array<i64: 1, 16, 192>}, {pipeline_mode = #tpu.pipeline_mode<synchronous>, transform_indices = @transform_1, window_bounds = array<i64: 3, 32>}, {pipeline_mode = #tpu.pipeline_mode<synchronous>, transform_indices = @transform_2, window_bounds = array<i64: 1, 32>}, {pipeline_mode = #tpu.pipeline_mode<synchronous>, transform_indices = @transform_3, window_bounds = array<i64: 32, 32>}, {pipeline_mode = #tpu.pipeline_mode<synchronous>, transform_indices = @transform_4, window_bounds = array<i64: 1, 4>}, {pipeline_mode = #tpu.pipeline_mode<synchronous>, transform_indices = @transform_5, window_bounds = array<i64: 32, 4>}, {pipeline_mode = #tpu.pipeline_mode<synchronous>, transform_indices = @transform_6, window_bounds = array<i64: 16, 4>}, {pipeline_mode = #tpu.pipeline_mode<synchronous>, transform_indices = @transform_7, window_bounds = array<i64: 1, 32>}, {pipeline_mode = #tpu.pipeline_mode<synchronous>, transform_indices = @transform_8, window_bounds = array<i64: 2, 1, 64>}, {pipeline_mode = #tpu.pipeline_mode<synchronous>, transform_indices = @transform_9, window_bounds = array<i64: 2, 32, 64>}, {pipeline_mode = #tpu.pipeline_mode<synchronous>, transform_indices = @transform_10, window_bounds = array<i64: 2, 1, 32>}, {pipeline_mode = #tpu.pipeline_mode<synchronous>, transform_indices = @transform_11, window_bounds = array<i64: 2, 64, 32>}, {pipeline_mode = #tpu.pipeline_mode<synchronous>, transform_indices = @transform_12, window_bounds = array<i64: 1, 66>}, {pipeline_mode = #tpu.pipeline_mode<synchronous>, transform_indices = @transform_13, window_bounds = array<i64: 32, 66>}, {pipeline_mode = #tpu.pipeline_mode<synchronous>, transform_indices = @transform_14, window_bounds = array<i64: 2, 1, 32>}, {pipeline_mode = #tpu.pipeline_mode<synchronous>, transform_indices = @transform_15, window_bounds = array<i64: 2, 1, 32>}, {pipeline_mode = #tpu.pipeline_mode<synchronous>, transform_indices = @transform_16, window_bounds = array<i64: 2, 1, 32>}, {pipeline_mode = #tpu.pipeline_mode<synchronous>, transform_indices = @transform_17, window_bounds = array<i64: 2, 1, 32>}, {pipeline_mode = #tpu.pipeline_mode<synchronous>, transform_indices = @transform_18, window_bounds = array<i64: 1, 32>}, {pipeline_mode = #tpu.pipeline_mode<synchronous>, transform_indices = @transform_19, window_bounds = array<i64: 1, 32>}, {pipeline_mode = #tpu.pipeline_mode<synchronous>, transform_indices = @transform_20, window_bounds = array<i64: 2, 1, 32>}, {pipeline_mode = #tpu.pipeline_mode<synchronous>, transform_indices = @transform_21, window_bounds = array<i64: 2, 32, 32>}, {pipeline_mode = #tpu.pipeline_mode<synchronous>, transform_indices = @transform_22, window_bounds = array<i64: 192, 32>}, {pipeline_mode = #tpu.pipeline_mode<synchronous>, transform_indices = @transform_23, window_bounds = array<i64: 16, 32>}, {pipeline_mode = #tpu.pipeline_mode<synchronous>, transform_indices = @transform_24, window_bounds = array<i64: 1, 32>}, {pipeline_mode = #tpu.pipeline_mode<synchronous>, transform_indices = @transform_25, window_bounds = array<i64: 1, 32>}, {pipeline_mode = #tpu.pipeline_mode<synchronous>, transform_indices = @transform_26, window_bounds = array<i64: 1, 32>}, {pipeline_mode = #tpu.pipeline_mode<synchronous>, transform_indices = @transform_27, window_bounds = array<i64: 1, 32>}, {pipeline_mode = #tpu.pipeline_mode<synchronous>, transform_indices = @transform_28, window_bounds = array<i64: 2, 1, 96>}, {pipeline_mode = #tpu.pipeline_mode<synchronous>, transform_indices = @transform_29, window_bounds = array<i64: 2, 32, 96>}, {transform_indices = @transform_30, window_bounds = array<i64: 1, 16, 8>}]} {
    %c0 = arith.constant 0 : index
    %c0_0 = arith.constant 0 : index
    %c0_1 = arith.constant 0 : index
    %0 = vector.load %arg1[%c0, %c0_0, %c0_1] : memref<1x16x192xf32, #tpu.memory_space<vmem>>, vector<1x16x192xf32>
    %1 = vector.shape_cast %0 : vector<1x16x192xf32> to vector<16x192xf32>
    %c0_2 = arith.constant 0 : index
    %c0_3 = arith.constant 0 : index
    %2 = vector.load %arg23[%c0_2, %c0_3] : memref<192x32xf32, #tpu.memory_space<vmem>>, vector<192x32xf32>
    %cst = arith.constant dense<0.000000e+00> : vector<16x32xf32>
    %3 = tpu.matmul %1, %2, %cst {dimension_numbers = #tpu.dot_dimension_numbers<[1], [0], [0], [1], [0, 0, 1, 1], [], []>} : vector<16x192xf32>, vector<192x32xf32>, vector<16x32xf32> -> vector<16x32xf32>
    %c0_4 = arith.constant 0 : index
    %c0_5 = arith.constant 0 : index
    %4 = vector.load %arg8[%c0_4, %c0_5] : memref<1x32xf32, #tpu.memory_space<vmem>>, vector<1x32xf32>
    %c0_6 = arith.constant 0 : index
    %c0_7 = arith.constant 0 : index
    %5 = vector.load %arg24[%c0_6, %c0_7] : memref<16x32xf32, #tpu.memory_space<vmem>>, vector<16x32xf32>
    %6 = arith.addf %3, %5 : vector<16x32xf32>
    %7 = tpu.concatenate %4, %6 in 0 : vector<1x32xf32>, vector<16x32xf32> -> vector<17x32xf32>
    %c0_8 = arith.constant 0 : index
    %c0_9 = arith.constant 0 : index
    %8 = vector.load %arg28[%c0_8, %c0_9] : memref<1x32xf32, #tpu.memory_space<vmem>>, vector<1x32xf32>
    %c0_10 = arith.constant 0 : index
    %c0_11 = arith.constant 0 : index
    %9 = vector.load %arg27[%c0_10, %c0_11] : memref<1x32xf32, #tpu.memory_space<vmem>>, vector<1x32xf32>
    %cst_12 = arith.constant dense<0.000000e+00> : vector<17xf32>
    %10 = vector.multi_reduction <add>, %7, %cst_12 [1] : vector<17x32xf32> to vector<17xf32>
    %11 = vector.shape_cast %10 : vector<17xf32> to vector<17x1xf32>
    %cst_13 = arith.constant 3.200000e+01 : f32
    %12 = vector.broadcast %cst_13 : f32 to vector<17x1xf32>
    %13 = arith.divf %11, %12 : vector<17x1xf32>
    %14 = vector.broadcast %13 : vector<17x1xf32> to vector<17x32xf32>
    %15 = arith.subf %7, %14 : vector<17x32xf32>
    %16 = arith.mulf %15, %15 : vector<17x32xf32>
    %cst_14 = arith.constant dense<0.000000e+00> : vector<17xf32>
    %17 = vector.multi_reduction <add>, %16, %cst_14 [1] : vector<17x32xf32> to vector<17xf32>
    %18 = vector.shape_cast %17 : vector<17xf32> to vector<17x1xf32>
    %cst_15 = arith.constant 3.200000e+01 : f32
    %19 = vector.broadcast %cst_15 : f32 to vector<17x1xf32>
    %20 = arith.divf %18, %19 : vector<17x1xf32>
    %cst_16 = arith.constant 9.99999974E-6 : f32
    %21 = vector.broadcast %cst_16 : f32 to vector<17x1xf32>
    %22 = arith.addf %20, %21 : vector<17x1xf32>
    %23 = math.rsqrt %22 : vector<17x1xf32>
    %24 = vector.broadcast %23 : vector<17x1xf32> to vector<17x32xf32>
    %25 = arith.mulf %15, %24 : vector<17x32xf32>
    %26 = vector.broadcast %8 : vector<1x32xf32> to vector<17x32xf32>
    %27 = arith.mulf %25, %26 : vector<17x32xf32>
    %28 = vector.broadcast %9 : vector<1x32xf32> to vector<17x32xf32>
    %29 = arith.addf %27, %28 : vector<17x32xf32>
    %30 = vector.shape_cast %29 : vector<17x32xf32> to vector<1x17x32xf32>
    %c0_17 = arith.constant 0 : index
    %c0_18 = arith.constant 0 : index
    %c0_19 = arith.constant 0 : index
    %31 = vector.load %arg16[%c0_17, %c0_18, %c0_19] : memref<2x1x32xf32, #tpu.memory_space<vmem>>, vector<1x1x32xf32>
    %32 = vector.shape_cast %31 : vector<1x1x32xf32> to vector<1x32xf32>
    %c0_20 = arith.constant 0 : index
    %c0_21 = arith.constant 0 : index
    %c0_22 = arith.constant 0 : index
    %33 = vector.load %arg15[%c0_20, %c0_21, %c0_22] : memref<2x1x32xf32, #tpu.memory_space<vmem>>, vector<1x1x32xf32>
    %34 = vector.shape_cast %33 : vector<1x1x32xf32> to vector<1x32xf32>
    %cst_23 = arith.constant dense<0.000000e+00> : vector<1x17xf32>
    %35 = vector.multi_reduction <add>, %30, %cst_23 [2] : vector<1x17x32xf32> to vector<1x17xf32>
    %36 = vector.shape_cast %35 : vector<1x17xf32> to vector<1x17x1xf32>
    %cst_24 = arith.constant 3.200000e+01 : f32
    %37 = vector.broadcast %cst_24 : f32 to vector<1x17x1xf32>
    %38 = arith.divf %36, %37 : vector<1x17x1xf32>
    %39 = vector.broadcast %38 : vector<1x17x1xf32> to vector<1x17x32xf32>
    %40 = arith.subf %30, %39 : vector<1x17x32xf32>
    %41 = arith.mulf %40, %40 : vector<1x17x32xf32>
    %cst_25 = arith.constant dense<0.000000e+00> : vector<1x17xf32>
    %42 = vector.multi_reduction <add>, %41, %cst_25 [2] : vector<1x17x32xf32> to vector<1x17xf32>
    %43 = vector.shape_cast %42 : vector<1x17xf32> to vector<1x17x1xf32>
    %cst_26 = arith.constant 3.200000e+01 : f32
    %44 = vector.broadcast %cst_26 : f32 to vector<1x17x1xf32>
    %45 = arith.divf %43, %44 : vector<1x17x1xf32>
    %cst_27 = arith.constant 9.99999974E-6 : f32
    %46 = vector.broadcast %cst_27 : f32 to vector<1x17x1xf32>
    %47 = arith.addf %45, %46 : vector<1x17x1xf32>
    %48 = math.rsqrt %47 : vector<1x17x1xf32>
    %49 = vector.broadcast %48 : vector<1x17x1xf32> to vector<1x17x32xf32>
    %50 = arith.mulf %40, %49 : vector<1x17x32xf32>
    %51 = vector.shape_cast %32 : vector<1x32xf32> to vector<1x1x32xf32>
    %52 = vector.broadcast %51 : vector<1x1x32xf32> to vector<1x17x32xf32>
    %53 = arith.mulf %50, %52 : vector<1x17x32xf32>
    %54 = vector.shape_cast %34 : vector<1x32xf32> to vector<1x1x32xf32>
    %55 = vector.broadcast %54 : vector<1x1x32xf32> to vector<1x17x32xf32>
    %56 = arith.addf %53, %55 : vector<1x17x32xf32>
    %57 = vector.shape_cast %56 : vector<1x17x32xf32> to vector<17x32xf32>
    %c0_28 = arith.constant 0 : index
    %c0_29 = arith.constant 0 : index
    %c0_30 = arith.constant 0 : index
    %58 = vector.load %arg30[%c0_28, %c0_29, %c0_30] : memref<2x32x96xf32, #tpu.memory_space<vmem>>, vector<1x32x96xf32>
    %59 = vector.shape_cast %58 : vector<1x32x96xf32> to vector<32x96xf32>
    %c0_31 = arith.constant 0 : index
    %c0_32 = arith.constant 0 : index
    %c0_33 = arith.constant 0 : index
    %60 = vector.load %arg29[%c0_31, %c0_32, %c0_33] : memref<2x1x96xf32, #tpu.memory_space<vmem>>, vector<1x1x96xf32>
    %61 = vector.shape_cast %60 : vector<1x1x96xf32> to vector<1x96xf32>
    %cst_34 = arith.constant dense<0.000000e+00> : vector<17x96xf32>
    %62 = tpu.matmul %57, %59, %cst_34 {dimension_numbers = #tpu.dot_dimension_numbers<[1], [0], [0], [1], [0, 0, 1, 1], [], []>} : vector<17x32xf32>, vector<32x96xf32>, vector<17x96xf32> -> vector<17x96xf32>
    %63 = vector.broadcast %61 : vector<1x96xf32> to vector<17x96xf32>
    %64 = arith.addf %62, %63 : vector<17x96xf32>
    %65 = vector.shape_cast %64 : vector<17x96xf32> to vector<1x17x96xf32>
    %66 = vector.extract_strided_slice %65 {offsets = [0, 0, 0], sizes = [1, 17, 16], strides = [1, 1, 1]} : vector<1x17x96xf32> to vector<1x17x16xf32>
    %cst_35 = arith.constant 2.500000e-01 : f32
    %67 = vector.broadcast %cst_35 : f32 to vector<1x17x16xf32>
    %68 = arith.mulf %66, %67 : vector<1x17x16xf32>
    %69 = vector.extract_strided_slice %65 {offsets = [0, 0, 32], sizes = [1, 17, 16], strides = [1, 1, 1]} : vector<1x17x96xf32> to vector<1x17x16xf32>
    %70 = vector.extract_strided_slice %65 {offsets = [0, 0, 64], sizes = [1, 17, 16], strides = [1, 1, 1]} : vector<1x17x96xf32> to vector<1x17x16xf32>
    %cst_36 = arith.constant dense<0.000000e+00> : vector<1x17x17xf32>
    %71 = tpu.matmul %68, %69, %cst_36 {dimension_numbers = #tpu.dot_dimension_numbers<[2], [2], [1], [1], [0, 0, 0, 1, 1, 1], [0], [0]>} : vector<1x17x16xf32>, vector<1x17x16xf32>, vector<1x17x17xf32> -> vector<1x17x17xf32>
    %cst_37 = arith.constant dense<0xFF800000> : vector<1x17xf32>
    %72 = vector.multi_reduction <maximumf>, %71, %cst_37 [2] : vector<1x17x17xf32> to vector<1x17xf32>
    %73 = vector.shape_cast %72 : vector<1x17xf32> to vector<1x17x1xf32>
    %74 = vector.broadcast %73 : vector<1x17x1xf32> to vector<1x17x17xf32>
    %75 = arith.subf %71, %74 : vector<1x17x17xf32>
    %76 = math.exp %75 : vector<1x17x17xf32>
    %cst_38 = arith.constant dense<0.000000e+00> : vector<1x17xf32>
    %77 = vector.multi_reduction <add>, %76, %cst_38 [2] : vector<1x17x17xf32> to vector<1x17xf32>
    %78 = vector.shape_cast %77 : vector<1x17xf32> to vector<1x17x1xf32>
    %79 = tpu.reciprocal %78 {approx = true} : vector<1x17x1xf32> -> vector<1x17x1xf32>
    %80 = vector.broadcast %79 : vector<1x17x1xf32> to vector<1x17x17xf32>
    %81 = arith.mulf %76, %80 : vector<1x17x17xf32>
    %cst_39 = arith.constant dense<0.000000e+00> : vector<1x17x16xf32>
    %82 = tpu.matmul %81, %70, %cst_39 {dimension_numbers = #tpu.dot_dimension_numbers<[2], [1], [1], [2], [0, 0, 0, 1, 1, 2], [0], [0]>} : vector<1x17x17xf32>, vector<1x17x16xf32>, vector<1x17x16xf32> -> vector<1x17x16xf32>
    %83 = vector.extract_strided_slice %65 {offsets = [0, 0, 16], sizes = [1, 17, 16], strides = [1, 1, 1]} : vector<1x17x96xf32> to vector<1x17x16xf32>
    %cst_40 = arith.constant 2.500000e-01 : f32
    %84 = vector.broadcast %cst_40 : f32 to vector<1x17x16xf32>
    %85 = arith.mulf %83, %84 : vector<1x17x16xf32>
    %86 = vector.extract_strided_slice %65 {offsets = [0, 0, 48], sizes = [1, 17, 16], strides = [1, 1, 1]} : vector<1x17x96xf32> to vector<1x17x16xf32>
    %87 = vector.extract_strided_slice %65 {offsets = [0, 0, 80], sizes = [1, 17, 16], strides = [1, 1, 1]} : vector<1x17x96xf32> to vector<1x17x16xf32>
    %cst_41 = arith.constant dense<0.000000e+00> : vector<1x17x17xf32>
    %88 = tpu.matmul %85, %86, %cst_41 {dimension_numbers = #tpu.dot_dimension_numbers<[2], [2], [1], [1], [0, 0, 0, 1, 1, 1], [0], [0]>} : vector<1x17x16xf32>, vector<1x17x16xf32>, vector<1x17x17xf32> -> vector<1x17x17xf32>
    %cst_42 = arith.constant dense<0xFF800000> : vector<1x17xf32>
    %89 = vector.multi_reduction <maximumf>, %88, %cst_42 [2] : vector<1x17x17xf32> to vector<1x17xf32>
    %90 = vector.shape_cast %89 : vector<1x17xf32> to vector<1x17x1xf32>
    %91 = vector.broadcast %90 : vector<1x17x1xf32> to vector<1x17x17xf32>
    %92 = arith.subf %88, %91 : vector<1x17x17xf32>
    %93 = math.exp %92 : vector<1x17x17xf32>
    %cst_43 = arith.constant dense<0.000000e+00> : vector<1x17xf32>
    %94 = vector.multi_reduction <add>, %93, %cst_43 [2] : vector<1x17x17xf32> to vector<1x17xf32>
    %95 = vector.shape_cast %94 : vector<1x17xf32> to vector<1x17x1xf32>
    %96 = tpu.reciprocal %95 {approx = true} : vector<1x17x1xf32> -> vector<1x17x1xf32>
    %97 = vector.broadcast %96 : vector<1x17x1xf32> to vector<1x17x17xf32>
    %98 = arith.mulf %93, %97 : vector<1x17x17xf32>
    %cst_44 = arith.constant dense<0.000000e+00> : vector<1x17x16xf32>
    %99 = tpu.matmul %98, %87, %cst_44 {dimension_numbers = #tpu.dot_dimension_numbers<[2], [1], [1], [2], [0, 0, 0, 1, 1, 2], [0], [0]>} : vector<1x17x17xf32>, vector<1x17x16xf32>, vector<1x17x16xf32> -> vector<1x17x16xf32>
    %100 = tpu.concatenate %82, %99 in 2 : vector<1x17x16xf32>, vector<1x17x16xf32> -> vector<1x17x32xf32>
    %101 = vector.shape_cast %100 : vector<1x17x32xf32> to vector<17x32xf32>
    %c0_45 = arith.constant 0 : index
    %c0_46 = arith.constant 0 : index
    %c0_47 = arith.constant 0 : index
    %102 = vector.load %arg22[%c0_45, %c0_46, %c0_47] : memref<2x32x32xf32, #tpu.memory_space<vmem>>, vector<1x32x32xf32>
    %103 = vector.shape_cast %102 : vector<1x32x32xf32> to vector<32x32xf32>
    %c0_48 = arith.constant 0 : index
    %c0_49 = arith.constant 0 : index
    %c0_50 = arith.constant 0 : index
    %104 = vector.load %arg21[%c0_48, %c0_49, %c0_50] : memref<2x1x32xf32, #tpu.memory_space<vmem>>, vector<1x1x32xf32>
    %105 = vector.shape_cast %104 : vector<1x1x32xf32> to vector<1x32xf32>
    %cst_51 = arith.constant dense<0.000000e+00> : vector<17x32xf32>
    %106 = tpu.matmul %101, %103, %cst_51 {dimension_numbers = #tpu.dot_dimension_numbers<[1], [0], [0], [1], [0, 0, 1, 1], [], []>} : vector<17x32xf32>, vector<32x32xf32>, vector<17x32xf32> -> vector<17x32xf32>
    %107 = vector.broadcast %105 : vector<1x32xf32> to vector<17x32xf32>
    %108 = arith.addf %106, %107 : vector<17x32xf32>
    %109 = vector.shape_cast %108 : vector<17x32xf32> to vector<1x17x32xf32>
    %110 = arith.addf %30, %109 : vector<1x17x32xf32>
    %c0_52 = arith.constant 0 : index
    %c0_53 = arith.constant 0 : index
    %c0_54 = arith.constant 0 : index
    %111 = vector.load %arg18[%c0_52, %c0_53, %c0_54] : memref<2x1x32xf32, #tpu.memory_space<vmem>>, vector<1x1x32xf32>
    %112 = vector.shape_cast %111 : vector<1x1x32xf32> to vector<1x32xf32>
    %c0_55 = arith.constant 0 : index
    %c0_56 = arith.constant 0 : index
    %c0_57 = arith.constant 0 : index
    %113 = vector.load %arg17[%c0_55, %c0_56, %c0_57] : memref<2x1x32xf32, #tpu.memory_space<vmem>>, vector<1x1x32xf32>
    %114 = vector.shape_cast %113 : vector<1x1x32xf32> to vector<1x32xf32>
    %cst_58 = arith.constant dense<0.000000e+00> : vector<1x17xf32>
    %115 = vector.multi_reduction <add>, %110, %cst_58 [2] : vector<1x17x32xf32> to vector<1x17xf32>
    %116 = vector.shape_cast %115 : vector<1x17xf32> to vector<1x17x1xf32>
    %cst_59 = arith.constant 3.200000e+01 : f32
    %117 = vector.broadcast %cst_59 : f32 to vector<1x17x1xf32>
    %118 = arith.divf %116, %117 : vector<1x17x1xf32>
    %119 = vector.broadcast %118 : vector<1x17x1xf32> to vector<1x17x32xf32>
    %120 = arith.subf %110, %119 : vector<1x17x32xf32>
    %121 = arith.mulf %120, %120 : vector<1x17x32xf32>
    %cst_60 = arith.constant dense<0.000000e+00> : vector<1x17xf32>
    %122 = vector.multi_reduction <add>, %121, %cst_60 [2] : vector<1x17x32xf32> to vector<1x17xf32>
    %123 = vector.shape_cast %122 : vector<1x17xf32> to vector<1x17x1xf32>
    %cst_61 = arith.constant 3.200000e+01 : f32
    %124 = vector.broadcast %cst_61 : f32 to vector<1x17x1xf32>
    %125 = arith.divf %123, %124 : vector<1x17x1xf32>
    %cst_62 = arith.constant 9.99999974E-6 : f32
    %126 = vector.broadcast %cst_62 : f32 to vector<1x17x1xf32>
    %127 = arith.addf %125, %126 : vector<1x17x1xf32>
    %128 = math.rsqrt %127 : vector<1x17x1xf32>
    %129 = vector.broadcast %128 : vector<1x17x1xf32> to vector<1x17x32xf32>
    %130 = arith.mulf %120, %129 : vector<1x17x32xf32>
    %131 = vector.shape_cast %112 : vector<1x32xf32> to vector<1x1x32xf32>
    %132 = vector.broadcast %131 : vector<1x1x32xf32> to vector<1x17x32xf32>
    %133 = arith.mulf %130, %132 : vector<1x17x32xf32>
    %134 = vector.shape_cast %114 : vector<1x32xf32> to vector<1x1x32xf32>
    %135 = vector.broadcast %134 : vector<1x1x32xf32> to vector<1x17x32xf32>
    %136 = arith.addf %133, %135 : vector<1x17x32xf32>
    %137 = vector.shape_cast %136 : vector<1x17x32xf32> to vector<17x32xf32>
    %c0_63 = arith.constant 0 : index
    %c0_64 = arith.constant 0 : index
    %c0_65 = arith.constant 0 : index
    %138 = vector.load %arg10[%c0_63, %c0_64, %c0_65] : memref<2x32x64xf32, #tpu.memory_space<vmem>>, vector<1x32x64xf32>
    %139 = vector.shape_cast %138 : vector<1x32x64xf32> to vector<32x64xf32>
    %c0_66 = arith.constant 0 : index
    %c0_67 = arith.constant 0 : index
    %c0_68 = arith.constant 0 : index
    %140 = vector.load %arg9[%c0_66, %c0_67, %c0_68] : memref<2x1x64xf32, #tpu.memory_space<vmem>>, vector<1x1x64xf32>
    %141 = vector.shape_cast %140 : vector<1x1x64xf32> to vector<1x64xf32>
    %cst_69 = arith.constant dense<0.000000e+00> : vector<17x64xf32>
    %142 = tpu.matmul %137, %139, %cst_69 {dimension_numbers = #tpu.dot_dimension_numbers<[1], [0], [0], [1], [0, 0, 1, 1], [], []>} : vector<17x32xf32>, vector<32x64xf32>, vector<17x64xf32> -> vector<17x64xf32>
    %143 = vector.broadcast %141 : vector<1x64xf32> to vector<17x64xf32>
    %144 = arith.addf %142, %143 : vector<17x64xf32>
    %cst_70 = arith.constant 1.702000e+00 : f32
    %145 = vector.broadcast %cst_70 : f32 to vector<17x64xf32>
    %146 = arith.mulf %145, %144 : vector<17x64xf32>
    %cst_71 = arith.constant 0.000000e+00 : f32
    %147 = vector.broadcast %cst_71 : f32 to vector<17x64xf32>
    %148 = arith.subf %147, %146 : vector<17x64xf32>
    %149 = math.exp %148 : vector<17x64xf32>
    %cst_72 = arith.constant 1.000000e+00 : f32
    %150 = vector.broadcast %cst_72 : f32 to vector<17x64xf32>
    %151 = arith.addf %150, %149 : vector<17x64xf32>
    %cst_73 = arith.constant 1.000000e+00 : f32
    %152 = vector.broadcast %cst_73 : f32 to vector<17x64xf32>
    %153 = arith.divf %152, %151 : vector<17x64xf32>
    %154 = arith.mulf %144, %153 : vector<17x64xf32>
    %c0_74 = arith.constant 0 : index
    %c0_75 = arith.constant 0 : index
    %c0_76 = arith.constant 0 : index
    %155 = vector.load %arg12[%c0_74, %c0_75, %c0_76] : memref<2x64x32xf32, #tpu.memory_space<vmem>>, vector<1x64x32xf32>
    %156 = vector.shape_cast %155 : vector<1x64x32xf32> to vector<64x32xf32>
    %c0_77 = arith.constant 0 : index
    %c0_78 = arith.constant 0 : index
    %c0_79 = arith.constant 0 : index
    %157 = vector.load %arg11[%c0_77, %c0_78, %c0_79] : memref<2x1x32xf32, #tpu.memory_space<vmem>>, vector<1x1x32xf32>
    %158 = vector.shape_cast %157 : vector<1x1x32xf32> to vector<1x32xf32>
    %cst_80 = arith.constant dense<0.000000e+00> : vector<17x32xf32>
    %159 = tpu.matmul %154, %156, %cst_80 {dimension_numbers = #tpu.dot_dimension_numbers<[1], [0], [0], [1], [0, 0, 1, 1], [], []>} : vector<17x64xf32>, vector<64x32xf32>, vector<17x32xf32> -> vector<17x32xf32>
    %160 = vector.broadcast %158 : vector<1x32xf32> to vector<17x32xf32>
    %161 = arith.addf %159, %160 : vector<17x32xf32>
    %162 = vector.shape_cast %161 : vector<17x32xf32> to vector<1x17x32xf32>
    %163 = arith.addf %110, %162 : vector<1x17x32xf32>
    %c1 = arith.constant 1 : index
    %c0_81 = arith.constant 0 : index
    %c0_82 = arith.constant 0 : index
    %164 = vector.load %arg16[%c1, %c0_81, %c0_82] : memref<2x1x32xf32, #tpu.memory_space<vmem>>, vector<1x1x32xf32>
    %165 = vector.shape_cast %164 : vector<1x1x32xf32> to vector<1x32xf32>
    %c1_83 = arith.constant 1 : index
    %c0_84 = arith.constant 0 : index
    %c0_85 = arith.constant 0 : index
    %166 = vector.load %arg15[%c1_83, %c0_84, %c0_85] : memref<2x1x32xf32, #tpu.memory_space<vmem>>, vector<1x1x32xf32>
    %167 = vector.shape_cast %166 : vector<1x1x32xf32> to vector<1x32xf32>
    %cst_86 = arith.constant dense<0.000000e+00> : vector<1x17xf32>
    %168 = vector.multi_reduction <add>, %163, %cst_86 [2] : vector<1x17x32xf32> to vector<1x17xf32>
    %169 = vector.shape_cast %168 : vector<1x17xf32> to vector<1x17x1xf32>
    %cst_87 = arith.constant 3.200000e+01 : f32
    %170 = vector.broadcast %cst_87 : f32 to vector<1x17x1xf32>
    %171 = arith.divf %169, %170 : vector<1x17x1xf32>
    %172 = vector.broadcast %171 : vector<1x17x1xf32> to vector<1x17x32xf32>
    %173 = arith.subf %163, %172 : vector<1x17x32xf32>
    %174 = arith.mulf %173, %173 : vector<1x17x32xf32>
    %cst_88 = arith.constant dense<0.000000e+00> : vector<1x17xf32>
    %175 = vector.multi_reduction <add>, %174, %cst_88 [2] : vector<1x17x32xf32> to vector<1x17xf32>
    %176 = vector.shape_cast %175 : vector<1x17xf32> to vector<1x17x1xf32>
    %cst_89 = arith.constant 3.200000e+01 : f32
    %177 = vector.broadcast %cst_89 : f32 to vector<1x17x1xf32>
    %178 = arith.divf %176, %177 : vector<1x17x1xf32>
    %cst_90 = arith.constant 9.99999974E-6 : f32
    %179 = vector.broadcast %cst_90 : f32 to vector<1x17x1xf32>
    %180 = arith.addf %178, %179 : vector<1x17x1xf32>
    %181 = math.rsqrt %180 : vector<1x17x1xf32>
    %182 = vector.broadcast %181 : vector<1x17x1xf32> to vector<1x17x32xf32>
    %183 = arith.mulf %173, %182 : vector<1x17x32xf32>
    %184 = vector.shape_cast %165 : vector<1x32xf32> to vector<1x1x32xf32>
    %185 = vector.broadcast %184 : vector<1x1x32xf32> to vector<1x17x32xf32>
    %186 = arith.mulf %183, %185 : vector<1x17x32xf32>
    %187 = vector.shape_cast %167 : vector<1x32xf32> to vector<1x1x32xf32>
    %188 = vector.broadcast %187 : vector<1x1x32xf32> to vector<1x17x32xf32>
    %189 = arith.addf %186, %188 : vector<1x17x32xf32>
    %190 = vector.shape_cast %189 : vector<1x17x32xf32> to vector<17x32xf32>
    %c1_91 = arith.constant 1 : index
    %c0_92 = arith.constant 0 : index
    %c0_93 = arith.constant 0 : index
    %191 = vector.load %arg30[%c1_91, %c0_92, %c0_93] : memref<2x32x96xf32, #tpu.memory_space<vmem>>, vector<1x32x96xf32>
    %192 = vector.shape_cast %191 : vector<1x32x96xf32> to vector<32x96xf32>
    %c1_94 = arith.constant 1 : index
    %c0_95 = arith.constant 0 : index
    %c0_96 = arith.constant 0 : index
    %193 = vector.load %arg29[%c1_94, %c0_95, %c0_96] : memref<2x1x96xf32, #tpu.memory_space<vmem>>, vector<1x1x96xf32>
    %194 = vector.shape_cast %193 : vector<1x1x96xf32> to vector<1x96xf32>
    %cst_97 = arith.constant dense<0.000000e+00> : vector<17x96xf32>
    %195 = tpu.matmul %190, %192, %cst_97 {dimension_numbers = #tpu.dot_dimension_numbers<[1], [0], [0], [1], [0, 0, 1, 1], [], []>} : vector<17x32xf32>, vector<32x96xf32>, vector<17x96xf32> -> vector<17x96xf32>
    %196 = vector.broadcast %194 : vector<1x96xf32> to vector<17x96xf32>
    %197 = arith.addf %195, %196 : vector<17x96xf32>
    %198 = vector.shape_cast %197 : vector<17x96xf32> to vector<1x17x96xf32>
    %199 = vector.extract_strided_slice %198 {offsets = [0, 0, 0], sizes = [1, 17, 16], strides = [1, 1, 1]} : vector<1x17x96xf32> to vector<1x17x16xf32>
    %cst_98 = arith.constant 2.500000e-01 : f32
    %200 = vector.broadcast %cst_98 : f32 to vector<1x17x16xf32>
    %201 = arith.mulf %199, %200 : vector<1x17x16xf32>
    %202 = vector.extract_strided_slice %198 {offsets = [0, 0, 32], sizes = [1, 17, 16], strides = [1, 1, 1]} : vector<1x17x96xf32> to vector<1x17x16xf32>
    %203 = vector.extract_strided_slice %198 {offsets = [0, 0, 64], sizes = [1, 17, 16], strides = [1, 1, 1]} : vector<1x17x96xf32> to vector<1x17x16xf32>
    %cst_99 = arith.constant dense<0.000000e+00> : vector<1x17x17xf32>
    %204 = tpu.matmul %201, %202, %cst_99 {dimension_numbers = #tpu.dot_dimension_numbers<[2], [2], [1], [1], [0, 0, 0, 1, 1, 1], [0], [0]>} : vector<1x17x16xf32>, vector<1x17x16xf32>, vector<1x17x17xf32> -> vector<1x17x17xf32>
    %cst_100 = arith.constant dense<0xFF800000> : vector<1x17xf32>
    %205 = vector.multi_reduction <maximumf>, %204, %cst_100 [2] : vector<1x17x17xf32> to vector<1x17xf32>
    %206 = vector.shape_cast %205 : vector<1x17xf32> to vector<1x17x1xf32>
    %207 = vector.broadcast %206 : vector<1x17x1xf32> to vector<1x17x17xf32>
    %208 = arith.subf %204, %207 : vector<1x17x17xf32>
    %209 = math.exp %208 : vector<1x17x17xf32>
    %cst_101 = arith.constant dense<0.000000e+00> : vector<1x17xf32>
    %210 = vector.multi_reduction <add>, %209, %cst_101 [2] : vector<1x17x17xf32> to vector<1x17xf32>
    %211 = vector.shape_cast %210 : vector<1x17xf32> to vector<1x17x1xf32>
    %212 = tpu.reciprocal %211 {approx = true} : vector<1x17x1xf32> -> vector<1x17x1xf32>
    %213 = vector.broadcast %212 : vector<1x17x1xf32> to vector<1x17x17xf32>
    %214 = arith.mulf %209, %213 : vector<1x17x17xf32>
    %cst_102 = arith.constant dense<0.000000e+00> : vector<1x17x16xf32>
    %215 = tpu.matmul %214, %203, %cst_102 {dimension_numbers = #tpu.dot_dimension_numbers<[2], [1], [1], [2], [0, 0, 0, 1, 1, 2], [0], [0]>} : vector<1x17x17xf32>, vector<1x17x16xf32>, vector<1x17x16xf32> -> vector<1x17x16xf32>
    %216 = vector.extract_strided_slice %198 {offsets = [0, 0, 16], sizes = [1, 17, 16], strides = [1, 1, 1]} : vector<1x17x96xf32> to vector<1x17x16xf32>
    %cst_103 = arith.constant 2.500000e-01 : f32
    %217 = vector.broadcast %cst_103 : f32 to vector<1x17x16xf32>
    %218 = arith.mulf %216, %217 : vector<1x17x16xf32>
    %219 = vector.extract_strided_slice %198 {offsets = [0, 0, 48], sizes = [1, 17, 16], strides = [1, 1, 1]} : vector<1x17x96xf32> to vector<1x17x16xf32>
    %220 = vector.extract_strided_slice %198 {offsets = [0, 0, 80], sizes = [1, 17, 16], strides = [1, 1, 1]} : vector<1x17x96xf32> to vector<1x17x16xf32>
    %cst_104 = arith.constant dense<0.000000e+00> : vector<1x17x17xf32>
    %221 = tpu.matmul %218, %219, %cst_104 {dimension_numbers = #tpu.dot_dimension_numbers<[2], [2], [1], [1], [0, 0, 0, 1, 1, 1], [0], [0]>} : vector<1x17x16xf32>, vector<1x17x16xf32>, vector<1x17x17xf32> -> vector<1x17x17xf32>
    %cst_105 = arith.constant dense<0xFF800000> : vector<1x17xf32>
    %222 = vector.multi_reduction <maximumf>, %221, %cst_105 [2] : vector<1x17x17xf32> to vector<1x17xf32>
    %223 = vector.shape_cast %222 : vector<1x17xf32> to vector<1x17x1xf32>
    %224 = vector.broadcast %223 : vector<1x17x1xf32> to vector<1x17x17xf32>
    %225 = arith.subf %221, %224 : vector<1x17x17xf32>
    %226 = math.exp %225 : vector<1x17x17xf32>
    %cst_106 = arith.constant dense<0.000000e+00> : vector<1x17xf32>
    %227 = vector.multi_reduction <add>, %226, %cst_106 [2] : vector<1x17x17xf32> to vector<1x17xf32>
    %228 = vector.shape_cast %227 : vector<1x17xf32> to vector<1x17x1xf32>
    %229 = tpu.reciprocal %228 {approx = true} : vector<1x17x1xf32> -> vector<1x17x1xf32>
    %230 = vector.broadcast %229 : vector<1x17x1xf32> to vector<1x17x17xf32>
    %231 = arith.mulf %226, %230 : vector<1x17x17xf32>
    %cst_107 = arith.constant dense<0.000000e+00> : vector<1x17x16xf32>
    %232 = tpu.matmul %231, %220, %cst_107 {dimension_numbers = #tpu.dot_dimension_numbers<[2], [1], [1], [2], [0, 0, 0, 1, 1, 2], [0], [0]>} : vector<1x17x17xf32>, vector<1x17x16xf32>, vector<1x17x16xf32> -> vector<1x17x16xf32>
    %233 = tpu.concatenate %215, %232 in 2 : vector<1x17x16xf32>, vector<1x17x16xf32> -> vector<1x17x32xf32>
    %234 = vector.shape_cast %233 : vector<1x17x32xf32> to vector<17x32xf32>
    %c1_108 = arith.constant 1 : index
    %c0_109 = arith.constant 0 : index
    %c0_110 = arith.constant 0 : index
    %235 = vector.load %arg22[%c1_108, %c0_109, %c0_110] : memref<2x32x32xf32, #tpu.memory_space<vmem>>, vector<1x32x32xf32>
    %236 = vector.shape_cast %235 : vector<1x32x32xf32> to vector<32x32xf32>
    %c1_111 = arith.constant 1 : index
    %c0_112 = arith.constant 0 : index
    %c0_113 = arith.constant 0 : index
    %237 = vector.load %arg21[%c1_111, %c0_112, %c0_113] : memref<2x1x32xf32, #tpu.memory_space<vmem>>, vector<1x1x32xf32>
    %238 = vector.shape_cast %237 : vector<1x1x32xf32> to vector<1x32xf32>
    %cst_114 = arith.constant dense<0.000000e+00> : vector<17x32xf32>
    %239 = tpu.matmul %234, %236, %cst_114 {dimension_numbers = #tpu.dot_dimension_numbers<[1], [0], [0], [1], [0, 0, 1, 1], [], []>} : vector<17x32xf32>, vector<32x32xf32>, vector<17x32xf32> -> vector<17x32xf32>
    %240 = vector.broadcast %238 : vector<1x32xf32> to vector<17x32xf32>
    %241 = arith.addf %239, %240 : vector<17x32xf32>
    %242 = vector.shape_cast %241 : vector<17x32xf32> to vector<1x17x32xf32>
    %243 = arith.addf %163, %242 : vector<1x17x32xf32>
    %c1_115 = arith.constant 1 : index
    %c0_116 = arith.constant 0 : index
    %c0_117 = arith.constant 0 : index
    %244 = vector.load %arg18[%c1_115, %c0_116, %c0_117] : memref<2x1x32xf32, #tpu.memory_space<vmem>>, vector<1x1x32xf32>
    %245 = vector.shape_cast %244 : vector<1x1x32xf32> to vector<1x32xf32>
    %c1_118 = arith.constant 1 : index
    %c0_119 = arith.constant 0 : index
    %c0_120 = arith.constant 0 : index
    %246 = vector.load %arg17[%c1_118, %c0_119, %c0_120] : memref<2x1x32xf32, #tpu.memory_space<vmem>>, vector<1x1x32xf32>
    %247 = vector.shape_cast %246 : vector<1x1x32xf32> to vector<1x32xf32>
    %cst_121 = arith.constant dense<0.000000e+00> : vector<1x17xf32>
    %248 = vector.multi_reduction <add>, %243, %cst_121 [2] : vector<1x17x32xf32> to vector<1x17xf32>
    %249 = vector.shape_cast %248 : vector<1x17xf32> to vector<1x17x1xf32>
    %cst_122 = arith.constant 3.200000e+01 : f32
    %250 = vector.broadcast %cst_122 : f32 to vector<1x17x1xf32>
    %251 = arith.divf %249, %250 : vector<1x17x1xf32>
    %252 = vector.broadcast %251 : vector<1x17x1xf32> to vector<1x17x32xf32>
    %253 = arith.subf %243, %252 : vector<1x17x32xf32>
    %254 = arith.mulf %253, %253 : vector<1x17x32xf32>
    %cst_123 = arith.constant dense<0.000000e+00> : vector<1x17xf32>
    %255 = vector.multi_reduction <add>, %254, %cst_123 [2] : vector<1x17x32xf32> to vector<1x17xf32>
    %256 = vector.shape_cast %255 : vector<1x17xf32> to vector<1x17x1xf32>
    %cst_124 = arith.constant 3.200000e+01 : f32
    %257 = vector.broadcast %cst_124 : f32 to vector<1x17x1xf32>
    %258 = arith.divf %256, %257 : vector<1x17x1xf32>
    %cst_125 = arith.constant 9.99999974E-6 : f32
    %259 = vector.broadcast %cst_125 : f32 to vector<1x17x1xf32>
    %260 = arith.addf %258, %259 : vector<1x17x1xf32>
    %261 = math.rsqrt %260 : vector<1x17x1xf32>
    %262 = vector.broadcast %261 : vector<1x17x1xf32> to vector<1x17x32xf32>
    %263 = arith.mulf %253, %262 : vector<1x17x32xf32>
    %264 = vector.shape_cast %245 : vector<1x32xf32> to vector<1x1x32xf32>
    %265 = vector.broadcast %264 : vector<1x1x32xf32> to vector<1x17x32xf32>
    %266 = arith.mulf %263, %265 : vector<1x17x32xf32>
    %267 = vector.shape_cast %247 : vector<1x32xf32> to vector<1x1x32xf32>
    %268 = vector.broadcast %267 : vector<1x1x32xf32> to vector<1x17x32xf32>
    %269 = arith.addf %266, %268 : vector<1x17x32xf32>
    %270 = vector.shape_cast %269 : vector<1x17x32xf32> to vector<17x32xf32>
    %c1_126 = arith.constant 1 : index
    %c0_127 = arith.constant 0 : index
    %c0_128 = arith.constant 0 : index
    %271 = vector.load %arg10[%c1_126, %c0_127, %c0_128] : memref<2x32x64xf32, #tpu.memory_space<vmem>>, vector<1x32x64xf32>
    %272 = vector.shape_cast %271 : vector<1x32x64xf32> to vector<32x64xf32>
    %c1_129 = arith.constant 1 : index
    %c0_130 = arith.constant 0 : index
    %c0_131 = arith.constant 0 : index
    %273 = vector.load %arg9[%c1_129, %c0_130, %c0_131] : memref<2x1x64xf32, #tpu.memory_space<vmem>>, vector<1x1x64xf32>
    %274 = vector.shape_cast %273 : vector<1x1x64xf32> to vector<1x64xf32>
    %cst_132 = arith.constant dense<0.000000e+00> : vector<17x64xf32>
    %275 = tpu.matmul %270, %272, %cst_132 {dimension_numbers = #tpu.dot_dimension_numbers<[1], [0], [0], [1], [0, 0, 1, 1], [], []>} : vector<17x32xf32>, vector<32x64xf32>, vector<17x64xf32> -> vector<17x64xf32>
    %276 = vector.broadcast %274 : vector<1x64xf32> to vector<17x64xf32>
    %277 = arith.addf %275, %276 : vector<17x64xf32>
    %cst_133 = arith.constant 1.702000e+00 : f32
    %278 = vector.broadcast %cst_133 : f32 to vector<17x64xf32>
    %279 = arith.mulf %278, %277 : vector<17x64xf32>
    %cst_134 = arith.constant 0.000000e+00 : f32
    %280 = vector.broadcast %cst_134 : f32 to vector<17x64xf32>
    %281 = arith.subf %280, %279 : vector<17x64xf32>
    %282 = math.exp %281 : vector<17x64xf32>
    %cst_135 = arith.constant 1.000000e+00 : f32
    %283 = vector.broadcast %cst_135 : f32 to vector<17x64xf32>
    %284 = arith.addf %283, %282 : vector<17x64xf32>
    %cst_136 = arith.constant 1.000000e+00 : f32
    %285 = vector.broadcast %cst_136 : f32 to vector<17x64xf32>
    %286 = arith.divf %285, %284 : vector<17x64xf32>
    %287 = arith.mulf %277, %286 : vector<17x64xf32>
    %c1_137 = arith.constant 1 : index
    %c0_138 = arith.constant 0 : index
    %c0_139 = arith.constant 0 : index
    %288 = vector.load %arg12[%c1_137, %c0_138, %c0_139] : memref<2x64x32xf32, #tpu.memory_space<vmem>>, vector<1x64x32xf32>
    %289 = vector.shape_cast %288 : vector<1x64x32xf32> to vector<64x32xf32>
    %c1_140 = arith.constant 1 : index
    %c0_141 = arith.constant 0 : index
    %c0_142 = arith.constant 0 : index
    %290 = vector.load %arg11[%c1_140, %c0_141, %c0_142] : memref<2x1x32xf32, #tpu.memory_space<vmem>>, vector<1x1x32xf32>
    %291 = vector.shape_cast %290 : vector<1x1x32xf32> to vector<1x32xf32>
    %cst_143 = arith.constant dense<0.000000e+00> : vector<17x32xf32>
    %292 = tpu.matmul %287, %289, %cst_143 {dimension_numbers = #tpu.dot_dimension_numbers<[1], [0], [0], [1], [0, 0, 1, 1], [], []>} : vector<17x64xf32>, vector<64x32xf32>, vector<17x32xf32> -> vector<17x32xf32>
    %293 = vector.broadcast %291 : vector<1x32xf32> to vector<17x32xf32>
    %294 = arith.addf %292, %293 : vector<17x32xf32>
    %295 = vector.shape_cast %294 : vector<17x32xf32> to vector<1x17x32xf32>
    %296 = arith.addf %243, %295 : vector<1x17x32xf32>
    %297 = vector.shape_cast %296 : vector<1x17x32xf32> to vector<17x32xf32>
    %c0_144 = arith.constant 0 : index
    %c0_145 = arith.constant 0 : index
    %298 = vector.load %arg26[%c0_144, %c0_145] : memref<1x32xf32, #tpu.memory_space<vmem>>, vector<1x32xf32>
    %c0_146 = arith.constant 0 : index
    %c0_147 = arith.constant 0 : index
    %299 = vector.load %arg25[%c0_146, %c0_147] : memref<1x32xf32, #tpu.memory_space<vmem>>, vector<1x32xf32>
    %cst_148 = arith.constant dense<0.000000e+00> : vector<17xf32>
    %300 = vector.multi_reduction <add>, %297, %cst_148 [1] : vector<17x32xf32> to vector<17xf32>
    %301 = vector.shape_cast %300 : vector<17xf32> to vector<17x1xf32>
    %cst_149 = arith.constant 3.200000e+01 : f32
    %302 = vector.broadcast %cst_149 : f32 to vector<17x1xf32>
    %303 = arith.divf %301, %302 : vector<17x1xf32>
    %304 = vector.broadcast %303 : vector<17x1xf32> to vector<17x32xf32>
    %305 = arith.subf %297, %304 : vector<17x32xf32>
    %306 = arith.mulf %305, %305 : vector<17x32xf32>
    %cst_150 = arith.constant dense<0.000000e+00> : vector<17xf32>
    %307 = vector.multi_reduction <add>, %306, %cst_150 [1] : vector<17x32xf32> to vector<17xf32>
    %308 = vector.shape_cast %307 : vector<17xf32> to vector<17x1xf32>
    %cst_151 = arith.constant 3.200000e+01 : f32
    %309 = vector.broadcast %cst_151 : f32 to vector<17x1xf32>
    %310 = arith.divf %308, %309 : vector<17x1xf32>
    %cst_152 = arith.constant 9.99999974E-6 : f32
    %311 = vector.broadcast %cst_152 : f32 to vector<17x1xf32>
    %312 = arith.addf %310, %311 : vector<17x1xf32>
    %313 = math.rsqrt %312 : vector<17x1xf32>
    %314 = vector.broadcast %313 : vector<17x1xf32> to vector<17x32xf32>
    %315 = arith.mulf %305, %314 : vector<17x32xf32>
    %316 = vector.broadcast %298 : vector<1x32xf32> to vector<17x32xf32>
    %317 = arith.mulf %315, %316 : vector<17x32xf32>
    %318 = vector.broadcast %299 : vector<1x32xf32> to vector<17x32xf32>
    %319 = arith.addf %317, %318 : vector<17x32xf32>
    %320 = vector.extract_strided_slice %319 {offsets = [1, 0], sizes = [16, 32], strides = [1, 1]} : vector<17x32xf32> to vector<16x32xf32>
    %321 = vector.extract_strided_slice %319 {offsets = [0, 0], sizes = [1, 32], strides = [1, 1]} : vector<17x32xf32> to vector<1x32xf32>
    %322 = vector.broadcast %321 : vector<1x32xf32> to vector<16x32xf32>
    %323 = arith.mulf %320, %322 : vector<16x32xf32>
    %c0_153 = arith.constant 0 : index
    %c0_154 = arith.constant 0 : index
    %324 = vector.load %arg20[%c0_153, %c0_154] : memref<1x32xf32, #tpu.memory_space<vmem>>, vector<1x32xf32>
    %c0_155 = arith.constant 0 : index
    %c0_156 = arith.constant 0 : index
    %325 = vector.load %arg19[%c0_155, %c0_156] : memref<1x32xf32, #tpu.memory_space<vmem>>, vector<1x32xf32>
    %cst_157 = arith.constant dense<0.000000e+00> : vector<16xf32>
    %326 = vector.multi_reduction <add>, %323, %cst_157 [1] : vector<16x32xf32> to vector<16xf32>
    %327 = vector.shape_cast %326 : vector<16xf32> to vector<16x1xf32>
    %cst_158 = arith.constant 3.200000e+01 : f32
    %328 = vector.broadcast %cst_158 : f32 to vector<16x1xf32>
    %329 = arith.divf %327, %328 : vector<16x1xf32>
    %330 = vector.broadcast %329 : vector<16x1xf32> to vector<16x32xf32>
    %331 = arith.subf %323, %330 : vector<16x32xf32>
    %332 = arith.mulf %331, %331 : vector<16x32xf32>
    %cst_159 = arith.constant dense<0.000000e+00> : vector<16xf32>
    %333 = vector.multi_reduction <add>, %332, %cst_159 [1] : vector<16x32xf32> to vector<16xf32>
    %334 = vector.shape_cast %333 : vector<16xf32> to vector<16x1xf32>
    %cst_160 = arith.constant 3.200000e+01 : f32
    %335 = vector.broadcast %cst_160 : f32 to vector<16x1xf32>
    %336 = arith.divf %334, %335 : vector<16x1xf32>
    %cst_161 = arith.constant 9.99999974E-6 : f32
    %337 = vector.broadcast %cst_161 : f32 to vector<16x1xf32>
    %338 = arith.addf %336, %337 : vector<16x1xf32>
    %339 = math.rsqrt %338 : vector<16x1xf32>
    %340 = vector.broadcast %339 : vector<16x1xf32> to vector<16x32xf32>
    %341 = arith.mulf %331, %340 : vector<16x32xf32>
    %342 = vector.broadcast %324 : vector<1x32xf32> to vector<16x32xf32>
    %343 = arith.mulf %341, %342 : vector<16x32xf32>
    %344 = vector.broadcast %325 : vector<1x32xf32> to vector<16x32xf32>
    %345 = arith.addf %343, %344 : vector<16x32xf32>
    %c0_162 = arith.constant 0 : index
    %c0_163 = arith.constant 0 : index
    %346 = vector.load %arg14[%c0_162, %c0_163] : memref<32x66xf32, #tpu.memory_space<vmem>>, vector<32x66xf32>
    %c0_164 = arith.constant 0 : index
    %c0_165 = arith.constant 0 : index
    %347 = vector.load %arg13[%c0_164, %c0_165] : memref<1x66xf32, #tpu.memory_space<vmem>>, vector<1x66xf32>
    %cst_166 = arith.constant dense<0.000000e+00> : vector<16x66xf32>
    %348 = tpu.matmul %345, %346, %cst_166 {dimension_numbers = #tpu.dot_dimension_numbers<[1], [0], [0], [1], [0, 0, 1, 1], [], []>} : vector<16x32xf32>, vector<32x66xf32>, vector<16x66xf32> -> vector<16x66xf32>
    %349 = vector.broadcast %347 : vector<1x66xf32> to vector<16x66xf32>
    %350 = arith.addf %348, %349 : vector<16x66xf32>
    %351 = vector.extract_strided_slice %350 {offsets = [0, 0], sizes = [16, 32], strides = [1, 1]} : vector<16x66xf32> to vector<16x32xf32>
    %352 = vector.extract_strided_slice %350 {offsets = [0, 32], sizes = [16, 32], strides = [1, 1]} : vector<16x66xf32> to vector<16x32xf32>
    %cst_167 = arith.constant 5.000000e-01 : f32
    %353 = vector.broadcast %cst_167 : f32 to vector<16x32xf32>
    %354 = arith.mulf %353, %352 : vector<16x32xf32>
    %cst_168 = arith.constant 4.471500e-02 : f32
    %355 = vector.broadcast %cst_168 : f32 to vector<16x32xf32>
    %356 = arith.mulf %355, %352 : vector<16x32xf32>
    %357 = arith.mulf %356, %352 : vector<16x32xf32>
    %358 = arith.mulf %357, %352 : vector<16x32xf32>
    %359 = arith.addf %352, %358 : vector<16x32xf32>
    %cst_169 = arith.constant 0.797884583 : f32
    %360 = vector.broadcast %cst_169 : f32 to vector<16x32xf32>
    %361 = arith.mulf %360, %359 : vector<16x32xf32>
    %362 = math.tanh %361 : vector<16x32xf32>
    %cst_170 = arith.constant 1.000000e+00 : f32
    %363 = vector.broadcast %cst_170 : f32 to vector<16x32xf32>
    %364 = arith.addf %363, %362 : vector<16x32xf32>
    %365 = arith.mulf %354, %364 : vector<16x32xf32>
    %366 = vector.extract_strided_slice %350 {offsets = [0, 64], sizes = [16, 1], strides = [1, 1]} : vector<16x66xf32> to vector<16x1xf32>
    %367 = vector.extract_strided_slice %350 {offsets = [0, 65], sizes = [16, 1], strides = [1, 1]} : vector<16x66xf32> to vector<16x1xf32>
    %368 = arith.mulf %351, %351 : vector<16x32xf32>
    %cst_171 = arith.constant dense<0.000000e+00> : vector<16xf32>
    %369 = vector.multi_reduction <add>, %368, %cst_171 [1] : vector<16x32xf32> to vector<16xf32>
    %370 = vector.shape_cast %369 : vector<16xf32> to vector<16x1xf32>
    %371 = math.sqrt %370 : vector<16x1xf32>
    %cst_172 = arith.constant 9.99999997E-7 : f32
    %372 = vector.broadcast %cst_172 : f32 to vector<16x1xf32>
    %373 = arith.addf %371, %372 : vector<16x1xf32>
    %374 = vector.broadcast %373 : vector<16x1xf32> to vector<16x32xf32>
    %375 = arith.divf %351, %374 : vector<16x32xf32>
    %c0_173 = arith.constant 0 : index
    %c0_174 = arith.constant 0 : index
    %376 = vector.load %arg2[%c0_173, %c0_174] : memref<3x32xf32, #tpu.memory_space<vmem>>, vector<3x32xf32>
    %cst_175 = arith.constant dense<0.000000e+00> : vector<16x3xf32>
    %377 = tpu.matmul %375, %376, %cst_175 {dimension_numbers = #tpu.dot_dimension_numbers<[1], [1], [0], [0], [0, 0, 1, 0], [], []>} : vector<16x32xf32>, vector<3x32xf32>, vector<16x3xf32> -> vector<16x3xf32>
    %cst_176 = arith.constant 0.000000e+00 : f32
    %378 = vector.broadcast %cst_176 : f32 to vector<16x1xf32>
    %379 = arith.cmpf ogt, %367, %378 : vector<16x1xf32>
    %cst_177 = arith.constant 0.000000e+00 : f32
    %380 = vector.broadcast %cst_177 : f32 to vector<16x1xf32>
    %381 = arith.minimumf %367, %380 : vector<16x1xf32>
    %382 = math.exp %381 : vector<16x1xf32>
    %cst_178 = arith.constant 1.000000e+00 : f32
    %383 = vector.broadcast %cst_178 : f32 to vector<16x1xf32>
    %384 = arith.subf %382, %383 : vector<16x1xf32>
    %385 = arith.select %379, %367, %384 : vector<16x1xi1>, vector<16x1xf32>
    %cst_179 = arith.constant 1.000000e+00 : f32
    %386 = vector.broadcast %cst_179 : f32 to vector<16x1xf32>
    %387 = arith.addf %385, %386 : vector<16x1xf32>
    %388 = vector.broadcast %366 : vector<16x1xf32> to vector<16x3xf32>
    %389 = arith.addf %377, %388 : vector<16x3xf32>
    %390 = vector.broadcast %387 : vector<16x1xf32> to vector<16x3xf32>
    %391 = arith.mulf %389, %390 : vector<16x3xf32>
    %c0_180 = arith.constant 0 : index
    %c0_181 = arith.constant 0 : index
    %392 = vector.load %arg4[%c0_180, %c0_181] : memref<32x32xf32, #tpu.memory_space<vmem>>, vector<32x32xf32>
    %c0_182 = arith.constant 0 : index
    %c0_183 = arith.constant 0 : index
    %393 = vector.load %arg3[%c0_182, %c0_183] : memref<1x32xf32, #tpu.memory_space<vmem>>, vector<1x32xf32>
    %cst_184 = arith.constant dense<0.000000e+00> : vector<16x32xf32>
    %394 = tpu.matmul %365, %392, %cst_184 {dimension_numbers = #tpu.dot_dimension_numbers<[1], [0], [0], [1], [0, 0, 1, 1], [], []>} : vector<16x32xf32>, vector<32x32xf32>, vector<16x32xf32> -> vector<16x32xf32>
    %395 = vector.broadcast %393 : vector<1x32xf32> to vector<16x32xf32>
    %396 = arith.addf %394, %395 : vector<16x32xf32>
    %cst_185 = arith.constant 5.000000e-01 : f32
    %397 = vector.broadcast %cst_185 : f32 to vector<16x32xf32>
    %398 = arith.mulf %397, %396 : vector<16x32xf32>
    %cst_186 = arith.constant 4.471500e-02 : f32
    %399 = vector.broadcast %cst_186 : f32 to vector<16x32xf32>
    %400 = arith.mulf %399, %396 : vector<16x32xf32>
    %401 = arith.mulf %400, %396 : vector<16x32xf32>
    %402 = arith.mulf %401, %396 : vector<16x32xf32>
    %403 = arith.addf %396, %402 : vector<16x32xf32>
    %cst_187 = arith.constant 0.797884583 : f32
    %404 = vector.broadcast %cst_187 : f32 to vector<16x32xf32>
    %405 = arith.mulf %404, %403 : vector<16x32xf32>
    %406 = math.tanh %405 : vector<16x32xf32>
    %cst_188 = arith.constant 1.000000e+00 : f32
    %407 = vector.broadcast %cst_188 : f32 to vector<16x32xf32>
    %408 = arith.addf %407, %406 : vector<16x32xf32>
    %409 = arith.mulf %398, %408 : vector<16x32xf32>
    %c0_189 = arith.constant 0 : index
    %c0_190 = arith.constant 0 : index
    %410 = vector.load %arg6[%c0_189, %c0_190] : memref<32x4xf32, #tpu.memory_space<vmem>>, vector<32x4xf32>
    %c0_191 = arith.constant 0 : index
    %c0_192 = arith.constant 0 : index
    %411 = vector.load %arg5[%c0_191, %c0_192] : memref<1x4xf32, #tpu.memory_space<vmem>>, vector<1x4xf32>
    %cst_193 = arith.constant dense<0.000000e+00> : vector<16x4xf32>
    %412 = tpu.matmul %409, %410, %cst_193 {dimension_numbers = #tpu.dot_dimension_numbers<[1], [0], [0], [1], [0, 0, 1, 1], [], []>} : vector<16x32xf32>, vector<32x4xf32>, vector<16x4xf32> -> vector<16x4xf32>
    %413 = vector.broadcast %411 : vector<1x4xf32> to vector<16x4xf32>
    %414 = arith.addf %412, %413 : vector<16x4xf32>
    %cst_194 = arith.constant 0.000000e+00 : f32
    %415 = vector.broadcast %cst_194 : f32 to vector<16x3xf32>
    %416 = arith.subf %415, %391 : vector<16x3xf32>
    %417 = math.exp %416 : vector<16x3xf32>
    %cst_195 = arith.constant 1.000000e+00 : f32
    %418 = vector.broadcast %cst_195 : f32 to vector<16x3xf32>
    %419 = arith.addf %418, %417 : vector<16x3xf32>
    %cst_196 = arith.constant 1.000000e+00 : f32
    %420 = vector.broadcast %cst_196 : f32 to vector<16x3xf32>
    %421 = arith.divf %420, %419 : vector<16x3xf32>
    %cst_197 = arith.constant dense<0xFF800000> : vector<16xf32>
    %422 = vector.multi_reduction <maximumf>, %421, %cst_197 [1] : vector<16x3xf32> to vector<16xf32>
    %423 = vector.shape_cast %422 : vector<16xf32> to vector<16x1xf32>
    %424 = tpu.iota {dimensions = array<i32: 1>} : vector<16x3xi32>
    %425 = vector.broadcast %423 : vector<16x1xf32> to vector<16x3xf32>
    %426 = arith.cmpf oge, %421, %425 : vector<16x3xf32>
    %c3_i32 = arith.constant 3 : i32
    %427 = vector.broadcast %c3_i32 : i32 to vector<16x3xi32>
    %428 = arith.select %426, %424, %427 : vector<16x3xi1>, vector<16x3xi32>
    %cst_198 = arith.constant dense<2147483647> : vector<16xi32>
    %429 = vector.multi_reduction <minsi>, %428, %cst_198 [1] : vector<16x3xi32> to vector<16xi32>
    %430 = vector.shape_cast %429 : vector<16xi32> to vector<16x1xi32>
    %c0_199 = arith.constant 0 : index
    %c0_200 = arith.constant 0 : index
    %431 = vector.load %arg7[%c0_199, %c0_200] : memref<16x4xf32, #tpu.memory_space<vmem>>, vector<16x4xf32>
    %432 = arith.addf %414, %431 : vector<16x4xf32>
    %cst_201 = arith.constant 0.000000e+00 : f32
    %433 = vector.broadcast %cst_201 : f32 to vector<16x4xf32>
    %434 = arith.subf %433, %432 : vector<16x4xf32>
    %435 = math.exp %434 : vector<16x4xf32>
    %cst_202 = arith.constant 1.000000e+00 : f32
    %436 = vector.broadcast %cst_202 : f32 to vector<16x4xf32>
    %437 = arith.addf %436, %435 : vector<16x4xf32>
    %cst_203 = arith.constant 1.000000e+00 : f32
    %438 = vector.broadcast %cst_203 : f32 to vector<16x4xf32>
    %439 = arith.divf %438, %437 : vector<16x4xf32>
    %440 = vector.extract_strided_slice %439 {offsets = [0, 0], sizes = [16, 2], strides = [1, 1]} : vector<16x4xf32> to vector<16x2xf32>
    %441 = vector.extract_strided_slice %439 {offsets = [0, 2], sizes = [16, 2], strides = [1, 1]} : vector<16x4xf32> to vector<16x2xf32>
    %cst_204 = arith.constant 5.000000e-01 : f32
    %442 = vector.broadcast %cst_204 : f32 to vector<16x2xf32>
    %443 = arith.mulf %442, %441 : vector<16x2xf32>
    %444 = arith.subf %440, %443 : vector<16x2xf32>
    %cst_205 = arith.constant 5.000000e-01 : f32
    %445 = vector.broadcast %cst_205 : f32 to vector<16x2xf32>
    %446 = arith.mulf %445, %441 : vector<16x2xf32>
    %447 = arith.addf %440, %446 : vector<16x2xf32>
    %448 = tpu.concatenate %444, %447 in 1 : vector<16x2xf32>, vector<16x2xf32> -> vector<16x4xf32>
    %cst_206 = arith.constant 3.200000e+01 : f32
    %449 = vector.broadcast %cst_206 : f32 to vector<16x4xf32>
    %450 = arith.mulf %448, %449 : vector<16x4xf32>
    %451 = arith.sitofp %430 : vector<16x1xi32> to vector<16x1xf32>
    %cst_207 = arith.constant 0.000000e+00 : f32
    %452 = vector.broadcast %cst_207 : f32 to vector<16x2xf32>
    %453 = tpu.concatenate %423, %451, %450, %452 in 1 : vector<16x1xf32>, vector<16x1xf32>, vector<16x4xf32>, vector<16x2xf32> -> vector<16x8xf32>
    %c0_208 = arith.constant 0 : index
    %c0_209 = arith.constant 0 : index
    %c0_210 = arith.constant 0 : index
    %454 = vector.load %arg31[%c0_208, %c0_209, %c0_210] : memref<1x16x8xf32, #tpu.memory_space<vmem>>, vector<1x16x8xf32>
    %455 = vector.shape_cast %454 : vector<1x16x8xf32> to vector<16x8xf32>
    %456 = vector.shape_cast %453 : vector<16x8xf32> to vector<1x16x8xf32>
    tpu.vector_store %arg31[%c0_208, %c0_209, %c0_210], %456 {strides = array<i32>} : memref<1x16x8xf32, #tpu.memory_space<vmem>>, vector<1x16x8xf32>,
    return
  }
  func.func @transform_0(%arg0: i32) -> (i32, i32, i32) {
    %c0_i32 = arith.constant 0 : i32
    %c0_i32_0 = arith.constant 0 : i32
    %c0_i32_1 = arith.constant 0 : i32
    return %arg0, %c0_i32, %c0_i32_0 : i32, i32, i32
  }
  func.func @transform_1(%arg0: i32) -> (i32, i32) {
    %c0_i32 = arith.constant 0 : i32
    %c0_i32_0 = arith.constant 0 : i32
    %c0_i32_1 = arith.constant 0 : i32
    return %c0_i32, %c0_i32_0 : i32, i32
  }
  func.func @transform_2(%arg0: i32) -> (i32, i32) {
    %c0_i32 = arith.constant 0 : i32
    %c0_i32_0 = arith.constant 0 : i32
    %c0_i32_1 = arith.constant 0 : i32
    return %c0_i32, %c0_i32_0 : i32, i32
  }
  func.func @transform_3(%arg0: i32) -> (i32, i32) {
    %c0_i32 = arith.constant 0 : i32
    %c0_i32_0 = arith.constant 0 : i32
    %c0_i32_1 = arith.constant 0 : i32
    return %c0_i32, %c0_i32_0 : i32, i32
  }
  func.func @transform_4(%arg0: i32) -> (i32, i32) {
    %c0_i32 = arith.constant 0 : i32
    %c0_i32_0 = arith.constant 0 : i32
    %c0_i32_1 = arith.constant 0 : i32
    return %c0_i32, %c0_i32_0 : i32, i32
  }
  func.func @transform_5(%arg0: i32) -> (i32, i32) {
    %c0_i32 = arith.constant 0 : i32
    %c0_i32_0 = arith.constant 0 : i32
    %c0_i32_1 = arith.constant 0 : i32
    return %c0_i32, %c0_i32_0 : i32, i32
  }
  func.func @transform_6(%arg0: i32) -> (i32, i32) {
    %c0_i32 = arith.constant 0 : i32
    %c0_i32_0 = arith.constant 0 : i32
    %c0_i32_1 = arith.constant 0 : i32
    return %c0_i32, %c0_i32_0 : i32, i32
  }
  func.func @transform_7(%arg0: i32) -> (i32, i32) {
    %c0_i32 = arith.constant 0 : i32
    %c0_i32_0 = arith.constant 0 : i32
    %c0_i32_1 = arith.constant 0 : i32
    return %c0_i32, %c0_i32_0 : i32, i32
  }
  func.func @transform_8(%arg0: i32) -> (i32, i32, i32) {
    %c0_i32 = arith.constant 0 : i32
    %c0_i32_0 = arith.constant 0 : i32
    %c0_i32_1 = arith.constant 0 : i32
    %c0_i32_2 = arith.constant 0 : i32
    return %c0_i32, %c0_i32_0, %c0_i32_1 : i32, i32, i32
  }
  func.func @transform_9(%arg0: i32) -> (i32, i32, i32) {
    %c0_i32 = arith.constant 0 : i32
    %c0_i32_0 = arith.constant 0 : i32
    %c0_i32_1 = arith.constant 0 : i32
    %c0_i32_2 = arith.constant 0 : i32
    return %c0_i32, %c0_i32_0, %c0_i32_1 : i32, i32, i32
  }
  func.func @transform_10(%arg0: i32) -> (i32, i32, i32) {
    %c0_i32 = arith.constant 0 : i32
    %c0_i32_0 = arith.constant 0 : i32
    %c0_i32_1 = arith.constant 0 : i32
    %c0_i32_2 = arith.constant 0 : i32
    return %c0_i32, %c0_i32_0, %c0_i32_1 : i32, i32, i32
  }
  func.func @transform_11(%arg0: i32) -> (i32, i32, i32) {
    %c0_i32 = arith.constant 0 : i32
    %c0_i32_0 = arith.constant 0 : i32
    %c0_i32_1 = arith.constant 0 : i32
    %c0_i32_2 = arith.constant 0 : i32
    return %c0_i32, %c0_i32_0, %c0_i32_1 : i32, i32, i32
  }
  func.func @transform_12(%arg0: i32) -> (i32, i32) {
    %c0_i32 = arith.constant 0 : i32
    %c0_i32_0 = arith.constant 0 : i32
    %c0_i32_1 = arith.constant 0 : i32
    return %c0_i32, %c0_i32_0 : i32, i32
  }
  func.func @transform_13(%arg0: i32) -> (i32, i32) {
    %c0_i32 = arith.constant 0 : i32
    %c0_i32_0 = arith.constant 0 : i32
    %c0_i32_1 = arith.constant 0 : i32
    return %c0_i32, %c0_i32_0 : i32, i32
  }
  func.func @transform_14(%arg0: i32) -> (i32, i32, i32) {
    %c0_i32 = arith.constant 0 : i32
    %c0_i32_0 = arith.constant 0 : i32
    %c0_i32_1 = arith.constant 0 : i32
    %c0_i32_2 = arith.constant 0 : i32
    return %c0_i32, %c0_i32_0, %c0_i32_1 : i32, i32, i32
  }
  func.func @transform_15(%arg0: i32) -> (i32, i32, i32) {
    %c0_i32 = arith.constant 0 : i32
    %c0_i32_0 = arith.constant 0 : i32
    %c0_i32_1 = arith.constant 0 : i32
    %c0_i32_2 = arith.constant 0 : i32
    return %c0_i32, %c0_i32_0, %c0_i32_1 : i32, i32, i32
  }
  func.func @transform_16(%arg0: i32) -> (i32, i32, i32) {
    %c0_i32 = arith.constant 0 : i32
    %c0_i32_0 = arith.constant 0 : i32
    %c0_i32_1 = arith.constant 0 : i32
    %c0_i32_2 = arith.constant 0 : i32
    return %c0_i32, %c0_i32_0, %c0_i32_1 : i32, i32, i32
  }
  func.func @transform_17(%arg0: i32) -> (i32, i32, i32) {
    %c0_i32 = arith.constant 0 : i32
    %c0_i32_0 = arith.constant 0 : i32
    %c0_i32_1 = arith.constant 0 : i32
    %c0_i32_2 = arith.constant 0 : i32
    return %c0_i32, %c0_i32_0, %c0_i32_1 : i32, i32, i32
  }
  func.func @transform_18(%arg0: i32) -> (i32, i32) {
    %c0_i32 = arith.constant 0 : i32
    %c0_i32_0 = arith.constant 0 : i32
    %c0_i32_1 = arith.constant 0 : i32
    return %c0_i32, %c0_i32_0 : i32, i32
  }
  func.func @transform_19(%arg0: i32) -> (i32, i32) {
    %c0_i32 = arith.constant 0 : i32
    %c0_i32_0 = arith.constant 0 : i32
    %c0_i32_1 = arith.constant 0 : i32
    return %c0_i32, %c0_i32_0 : i32, i32
  }
  func.func @transform_20(%arg0: i32) -> (i32, i32, i32) {
    %c0_i32 = arith.constant 0 : i32
    %c0_i32_0 = arith.constant 0 : i32
    %c0_i32_1 = arith.constant 0 : i32
    %c0_i32_2 = arith.constant 0 : i32
    return %c0_i32, %c0_i32_0, %c0_i32_1 : i32, i32, i32
  }
  func.func @transform_21(%arg0: i32) -> (i32, i32, i32) {
    %c0_i32 = arith.constant 0 : i32
    %c0_i32_0 = arith.constant 0 : i32
    %c0_i32_1 = arith.constant 0 : i32
    %c0_i32_2 = arith.constant 0 : i32
    return %c0_i32, %c0_i32_0, %c0_i32_1 : i32, i32, i32
  }
  func.func @transform_22(%arg0: i32) -> (i32, i32) {
    %c0_i32 = arith.constant 0 : i32
    %c0_i32_0 = arith.constant 0 : i32
    %c0_i32_1 = arith.constant 0 : i32
    return %c0_i32, %c0_i32_0 : i32, i32
  }
  func.func @transform_23(%arg0: i32) -> (i32, i32) {
    %c0_i32 = arith.constant 0 : i32
    %c0_i32_0 = arith.constant 0 : i32
    %c0_i32_1 = arith.constant 0 : i32
    return %c0_i32, %c0_i32_0 : i32, i32
  }
  func.func @transform_24(%arg0: i32) -> (i32, i32) {
    %c0_i32 = arith.constant 0 : i32
    %c0_i32_0 = arith.constant 0 : i32
    %c0_i32_1 = arith.constant 0 : i32
    return %c0_i32, %c0_i32_0 : i32, i32
  }
  func.func @transform_25(%arg0: i32) -> (i32, i32) {
    %c0_i32 = arith.constant 0 : i32
    %c0_i32_0 = arith.constant 0 : i32
    %c0_i32_1 = arith.constant 0 : i32
    return %c0_i32, %c0_i32_0 : i32, i32
  }
  func.func @transform_26(%arg0: i32) -> (i32, i32) {
    %c0_i32 = arith.constant 0 : i32
    %c0_i32_0 = arith.constant 0 : i32
    %c0_i32_1 = arith.constant 0 : i32
    return %c0_i32, %c0_i32_0 : i32, i32
  }
  func.func @transform_27(%arg0: i32) -> (i32, i32) {
    %c0_i32 = arith.constant 0 : i32
    %c0_i32_0 = arith.constant 0 : i32
    %c0_i32_1 = arith.constant 0 : i32
    return %c0_i32, %c0_i32_0 : i32, i32
  }
  func.func @transform_28(%arg0: i32) -> (i32, i32, i32) {
    %c0_i32 = arith.constant 0 : i32
    %c0_i32_0 = arith.constant 0 : i32
    %c0_i32_1 = arith.constant 0 : i32
    %c0_i32_2 = arith.constant 0 : i32
    return %c0_i32, %c0_i32_0, %c0_i32_1 : i32, i32, i32
  }
  func.func @transform_29(%arg0: i32) -> (i32, i32, i32) {
    %c0_i32 = arith.constant 0 : i32
    %c0_i32_0 = arith.constant 0 : i32
    %c0_i32_1 = arith.constant 0 : i32
    %c0_i32_2 = arith.constant 0 : i32
    return %c0_i32, %c0_i32_0, %c0_i32_1 : i32, i32, i32
  }
  func.func @transform_30(%arg0: i32) -> (i32, i32, i32) {
    %c0_i32 = arith.constant 0 : i32
    %c0_i32_0 = arith.constant 0 : i32
    %c0_i32_1 = arith.constant 0 : i32
    return %arg0, %c0_i32, %c0_i32_0 : i32, i32, i32
  }
}

</mosaic_0001>

<bundles_post_ra>
// kernel: owlvit_forward.2
= control target key start
LH: loop header
LB: loop body
LE: loop exit
PB: predicated region body
PF: predicated region fallthrough
CT: control target
= control target key end

     0   :  { %vm112_vm0 = vcmask 261120   ;;  %v4158_v21 = vmov 0.0|0.0   ;;  %vm4159_vm1 = vmmov 0   ;;  %v4160_v25 = vmov 0.0   ;;  %s4161_s30 = smov 96   ;;  %s4164_s20 = smov 64   ;;  %s4937_s0 = inlined_call_operand.vmem [shape: f32[3,8,32], index: 0, kind: input, shape index: {}]   ;;  %s4938_s16 = inlined_call_operand.vmem [shape: f32[2,32,96], index: 16, kind: input, shape index: {}]   ;;  %s4939_s9 = inlined_call_operand.vmem [shape: f32[2,1,32], index: 9, kind: input, shape index: {}]   ;;  %s4940_s8 = inlined_call_operand.vmem [shape: f32[2,1,32], index: 8, kind: input, shape index: {}]   ;;  %s4941_s15 = inlined_call_operand.vmem [shape: f32[2,1,96], index: 15, kind: input, shape index: {}]   ;;  %s4942_s1 = inlined_call_operand.vmem [shape: f32[3,8], index: 1, kind: input, shape index: {}]   ;;  %s4943_s13 = inlined_call_operand.vmem [shape: f32[2,32,32], index: 13, kind: input, shape index: {}]   ;;  %s4944_s12 = inlined_call_operand.vmem [shape: f32[2,1,32], index: 12, kind: input, shape index: {}]   ;;  %s4945_s3 = inlined_call_operand.vmem [shape: f32[2,32,64], index: 3, kind: input, shape index: {}]   ;;  %s4946_s11 = inlined_call_operand.vmem [shape: f32[2,1,32], index: 11, kind: input, shape index: {}]   ;;  %s4947_s10 = inlined_call_operand.vmem [shape: f32[2,1,32], index: 10, kind: input, shape index: {}]   ;;  %s4948_s5 = inlined_call_operand.vmem [shape: f32[2,64,32], index: 5, kind: input, shape index: {}]   ;;  %s4949_s2 = inlined_call_operand.vmem [shape: f32[2,1,64], index: 2, kind: input, shape index: {}]   ;;  %s4950_s4 = inlined_call_operand.vmem [shape: f32[2,1,32], index: 4, kind: input, shape index: {}]   ;;  %s4951_s14 = inlined_call_operand.vmem [shape: f32[32,32], index: 14, kind: input, shape index: {}]   ;;  %s4952_s7 = inlined_call_operand.vmem [shape: f32[1,32], index: 7, kind: input, shape index: {}]   ;;  %s4953_s6 = inlined_call_operand.vmem [shape: f32[1,32], index: 6, kind: input, shape index: {}]   ;;  %s4954_s17 = inlined_call_operand.vmem [shape: f32[3,32], index: 17, kind: output, shape index: {}]  }
   0x1   :  { %4957 = sst [smem:[#allocation2_spill]] %s4937_s0  ;;  %3972 = vmatprep.subr.bf16.mxu0 %v4158_v21  ;;  %3697 = vmatprep.mubr.msk.f32.mxu0 %vm4159_vm1, %v4160_v25  ;;  %v3463_v39 = vld [vmem:[%s4939_s9] ss:$0 sm:$0xff]  ;;  %vm277_vm2 = vcmask 130048   ;;  %vm509_vm4 = vcmask 64512   ;;  %s4165_s21 = smov 80  }
   0x2   :  { %4958 = sst [smem:[#allocation3_spill]] %s4938_s16  ;;  %s4959_s26 = sld [smem:[#allocation2_spill]]  ;;  %3711 = vmatprep.subr.mxu1 %v4160_v25  ;;  %3713 = vmatprep.mubr.msk.f32.mxu1 %vm4159_vm1, %v4160_v25  ;;  %v3464_v41 = vld [vmem:[%s4940_s8] ss:$0 sm:$0xff]  ;;  %vm1582_vm5 = vcmask 523264   ;;  %vm3306_vm6 = vcmask 59392  }
   0x3   :  { %s4960_s19 = sld [smem:[#allocation3_spill]]  ;;  %v3465_v52 = vld [vmem:[%s4941_s15] ss:$0 sm:$0xff]  ;;  %s4166_s22 = smov 112   ;;  %vm3367_vm8 = vcmask 1041409   ;;  %vm3369_vm9 = vcmask 1042434  }
   0x4   :  { %s4167_s23 = smov 48   ;;  %s4168_s16 = smov 16   ;;  %vm3444_vm10 = vcmask 256000  }
   0x8   :  { %v4262_v0 = vld [vmem:[%s4959_s26] sm:$0xff]  ;;  %v4267_v1 = vld [vmem:[%s4959_s26 + $0x10] sm:$0xff]  ;;  %v4272_v2 = vld [vmem:[%s4959_s26 + $0x8] sm:$0xff] }
   0x9   :  { %v113_v3 = vsel %vm112_vm0, %v4262_v0, 0.0  ;;  %v119_v4 = vsel %vm112_vm0, %v4267_v1, 0.0  ;;  %v116_v5 = vsel %vm112_vm0, %v4272_v2, 0.0  ;;  %v171_v22 = vld [vmem:[%s4960_s19] sm:$0xff]  ;;  %v172_v23 = vld [vmem:[%s4960_s19 + $0x8] sm:$0xff]  ;;  %v173_v24 = vld [vmem:[%s4960_s19 + $0x10] sm:$0xff] }
   0xa   :  { %114 = vadd.xlane.f32.xlu0 %v113_v3  ;;  %120 = vadd.xlane.f32.xlu1 %v119_v4  ;;  %v3973_v26 = vpack.c.bf16 %v172_v23, %v171_v22  ;;  %v174_v27 = vld [vmem:[%s4960_s19 + $0x18] sm:$0xff]  ;;  %v4163_v23 = vmov -1e+09  }
   0xb   :  { %v3976_v28 = vpack.c.bf16 %v174_v27, %v173_v24 }
   0xc   :  { %3974 = vmatpush3.bf16.msra.mxu0 %v3973_v26 }
   0xd   :  { %3975 = vmatprep.subr.bf16.mxu0 %v4158_v21 }
   0xe   :  { %117 = vadd.xlane.f32.xlu0 %v116_v5 }
  0x10   :  { %3977 = vmatpush3.bf16.msra.mxu0 %v3976_v28 }
  0x11   :  { %3706 = vmatprep.subr.mxu0 %v4160_v25 }
  0x97   :  { %v115_v6 = vpop.xlane.xlu0 %114  ;;  %v121_v7 = vpop.xlane.xlu1 %120 }
  0x98   :  { %v123_v8 = vmul.f32 0.03125, %v115_v6  ;;  %v125_v9 = vmul.f32 0.03125, %v121_v7  ;;  %v60_v7 = vlaneseq }
  0x9a   :  { %v126_v10 = vsub.f32 %v4262_v0, %v123_v8  ;;  %v128_v11 = vsub.f32 %v4267_v1, %v125_v9  ;;  %v4162_v8 = vmov 1966171168  }
  0x9b   :  { %v118_v12 = vpop.xlane.xlu0 %117  ;;  %v70_v9 = vunpack.c.l.s4 %v4162_v8 }
  0x9c   :  { %v124_v13 = vmul.f32 0.03125, %v118_v12  ;;  %v129_v14 = vmul.f32 %v126_v10, %v126_v10  ;;  %v131_v15 = vmul.f32 %v128_v11, %v128_v11 }
  0x9e   :  { %v127_v16 = vsub.f32 %v4272_v2, %v124_v13  ;;  %v132_v17 = vsel %vm112_vm0, %v129_v14, 0.0  ;;  %v138_v18 = vsel %vm112_vm0, %v131_v15, 0.0  ;;  %v71_v13 = vunpack.c.0.s8 %v70_v9 }
  0x9f   :  { %133 = vadd.xlane.f32.xlu1 %v132_v17  ;;  %v4369_v17 = vand.u32 127, %v60_v7 }
  0xa0   :  { %v130_v19 = vmul.f32 %v127_v16, %v127_v16 }
  0xa2   :  { %v135_v20 = vsel %vm112_vm0, %v130_v19, 0.0 }
  0xa3   :  { %139 = vadd.xlane.f32.xlu1 %v138_v18  ;;  %136 = vadd.xlane.f32.xlu0 %v135_v20 }
 0x12c   :  { %v134_v29 = vpop.xlane.xlu1 %133 }
 0x12d   :  { %v141_v30 = vmul.f32 0.03125, %v134_v29 }
 0x12f   :  { %v144_v31 = vadd.f32 1e-05, %v141_v30 }
 0x130   :  { %v140_v32 = vpop.xlane.xlu1 %139  ;;  %v137_v33 = vpop.xlane.xlu0 %136 }
 0x131   :  { %4051 = vrsqrt.f32 %v144_v31  ;;  %v143_v34 = vmul.f32 0.03125, %v140_v32  ;;  %v142_v35 = vmul.f32 0.03125, %v137_v33 }
 0x133   :  { %v146_v36 = vadd.f32 1e-05, %v143_v34  ;;  %v145_v37 = vadd.f32 1e-05, %v142_v35 }
 0x135   :  { %4053 = vrsqrt.f32 %v146_v36 }
 0x136   :  { %4055 = vrsqrt.f32 %v145_v37 }
 0x13b   :  { %v4052_v38 = vpop.eup %4051 }
 0x13c   :  { %v150_v40 = vmul.f32 %v4052_v38, %v126_v10  ;;  %v59_v10 = vld [vmem:[%s4942_s1] sm:$0x7] }
 0x13d   :  { %v66_v12 = vsub.f32 1.0, %v59_v10 }
 0x13e   :  { %v159_v42 = vmul.f32 %v3463_v39, %v150_v40 }
 0x13f   :  { %v4054_v43 = vpop.eup %4053  ;;  %v67_v14 = vmul.f32 -1e+09, %v66_v12 }
 0x140   :  { %v4056_v44 = vpop.eup %4055  ;;  %v168_v45 = vadd.f32 %v3464_v41, %v159_v42  ;;  %v152_v47 = vmul.f32 %v4054_v43, %v128_v11  ;;  %v4366_v11 = vshrl.u32 %v60_v7, 7 }
 0x141   :  { %v151_v46 = vmul.f32 %v4056_v44, %v127_v16 }
 0x142   :  { %3698 = vmatmul.mubr.msk.f32.vlgmr.msra.gmra.mrb[0].mxu0 %vm112_vm0, %v168_v45  ;;  %v161_v50 = vmul.f32 %v3463_v39, %v152_v47  ;;  %v74_v15 = vsub.s32 %v71_v13, %v4366_v11  ;;  %v4372_v19 = vsub.s32 0, %v4366_v11  ;;  %vm64_vm3 = vcmp.le.s32.totalorder %v4369_v17, %v4366_v11 }
 0x143   :  { %3700 = vmatprep.mubr.msk.f32.mxu0 %vm4159_vm1, %v4160_v25  ;;  %v160_v48 = vmul.f32 %v3463_v39, %v151_v46  ;;  %v65_v24 = vsel %vm64_vm3, 0.0, %v4163_v23 }
 0x144   :  { %v170_v51 = vadd.f32 %v3464_v41, %v161_v50  ;;  %v75_v16 = vrot.slane %v67_v14, %v74_v15 }
 0x145   :  { %v169_v49 = vadd.f32 %v3464_v41, %v160_v48 }
 0x146   :  { %v83_v18 = vrot.slane %v75_v16, %v74_v15  ;;  %v76_v20 = vcombine.high %v75_v16, %v75_v16 }
 0x147   :  { %3701 = vmatmul.mubr.msk.f32.gmra.mrb[2].mxu0 %vm112_vm0, %v169_v49 }
 0x148   :  { %3703 = vmatprep.mubr.msk.f32.mxu0 %vm4159_vm1, %v4160_v25  ;;  %v95_v22 = vrot.slane %v83_v18, %v4372_v19  ;;  %v90_v26 = vrot.slane %v76_v20, %v74_v15  ;;  %v91_v29 = vcombine.high %v83_v18, %v83_v18 }
 0x14a   :  { %v4377_v27 = vadd.f32 %v95_v22, %v65_v24  ;;  %v99_v28 = vrot.slane %v90_v26, %v4372_v19  ;;  %v103_v34 = vrot.slane %v91_v29, %v4372_v19 }
 0x14b   :  { %3704 = vmatmul.mubr.msk.f32.gmra.mrb[4].mxu0 %vm112_vm0, %v170_v51 }
 0x14c   :  { %3708 = vmatprep.mubr.msk.f32.mxu0 %vm4159_vm1, %v4160_v25  ;;  %v4381_v33 = vadd.f32 %v99_v28, %v65_v24  ;;  %v4386_v39 = vadd.f32 %v103_v34, %v65_v24 }
 0x215   :  { %v257_v53 = vpop.f32.mrb[0].mxu0 }
 0x216   :  { %v4324_v54 = vadd.f32 %v3465_v52, %v257_v53  ;;  %v3699_v55 = vpop.f32.mrb[1].mxu0 }
 0x218   :  { %275 = vrot.lane.b32.xlu0 %v4324_v54, %s4161_s30  ;;  %v4338_v63 = vmul.f32 0.25, %v4324_v54 }
 0x21a   :  { %v262_v56 = vpop.f32.mrb[2].mxu0 }
 0x21b   :  { %v4328_v57 = vadd.f32 %v3465_v52, %v262_v56  ;;  %v3702_v58 = vpop.f32.mrb[3].mxu0 }
 0x21d   :  { %354 = vrot.lane.b32.xlu1 %v4328_v57, %s4161_s30  ;;  %v4347_v4 = vmul.f32 0.25, %v4328_v57 }
 0x21e   :  { %v267_v59 = vpop.f32.mrb[4].mxu0 }
 0x21f   :  { %v4332_v60 = vadd.f32 %v3465_v52, %v267_v59  ;;  %v3705_v61 = vpop.f32.mrb[5].mxu0 }
 0x221   :  { %432 = vrot.lane.b32.xlu1 %v4332_v60, %s4161_s30  ;;  %v4356_v6 = vmul.f32 0.25, %v4332_v60 }
 0x28a   :  { %v276_v62 = vpop.permute.xlu0 %275 }
 0x28b   :  { %3707 = vmatpush3.xpose.msk.msra.mxu0 %vm277_vm2, %v276_v62 }
 0x28c   :  { %3726 = vmatprep.subr.mxu0 %v4160_v25 }
 0x28e   :  { %3709 = vmatmul.mubr.msk.f32.vlgmr.msra.gmra.mrb[6].mxu0 %vm277_vm2, %v4338_v63 }
 0x28f   :  { %v355_v3 = vpop.permute.xlu1 %354  ;;  %3728 = vmatprep.mubr.msk.f32.mxu0 %vm4159_vm1, %v4160_v25 }
 0x290   :  { %3712 = vmatpush3.xpose.msk.msra.mxu1 %vm277_vm2, %v355_v3 }
 0x291   :  { %3716 = vmatprep.subr.mxu1 %v4160_v25 }
 0x293   :  { %3714 = vmatmul.mubr.msk.f32.vlgmr.msra.gmra.mrb[0].mxu1 %vm277_vm2, %v4347_v4  ;;  %v433_v5 = vpop.permute.xlu1 %432 }
 0x294   :  { %3717 = vmatpush3.xpose.msk.msra.mxu1 %vm277_vm2, %v433_v5  ;;  %3718 = vmatprep.mubr.msk.f32.mxu1 %vm4159_vm1, %v4160_v25 }
 0x295   :  { %3721 = vmatprep.subr.mxu1 %v4160_v25 }
 0x297   :  { %3719 = vmatmul.mubr.msk.f32.vlgmr.msra.gmra.mrb[2].mxu1 %vm277_vm2, %v4356_v6 }
 0x298   :  { %3723 = vmatprep.mubr.msk.f32.mxu1 %vm4159_vm1, %v4160_v25 }
 0x361   :  { %v349_v30 = vpop.f32.mrb[6].mxu0 }
 0x362   :  { %v350_v31 = vadd.f32 %v349_v30, %v4377_v27  ;;  %v3710_v32 = vpop.f32.mrb[7].mxu0 }
 0x364   :  { %v510_v35 = vsel %vm509_vm4, %v350_v31, -inf }
 0x365   :  { %511 = vmax.xlane.f32.xlu1 %v510_v35 }
 0x366   :  { %v427_v36 = vpop.f32.mrb[0].mxu1 }
 0x367   :  { %v428_v37 = vadd.f32 %v427_v36, %v4381_v33  ;;  %v3715_v38 = vpop.f32.mrb[1].mxu1 }
 0x369   :  { %v513_v40 = vsel %vm509_vm4, %v428_v37, -inf }
 0x36a   :  { %514 = vmax.xlane.f32.xlu0 %v513_v40  ;;  %v505_v41 = vpop.f32.mrb[2].mxu1 }
 0x36b   :  { %v506_v42 = vadd.f32 %v505_v41, %v4386_v39  ;;  %v3720_v43 = vpop.f32.mrb[3].mxu1 }
 0x36d   :  { %v516_v44 = vsel %vm509_vm4, %v506_v42, -inf }
 0x36e   :  { %517 = vmax.xlane.f32.xlu0 %v516_v44 }
 0x376   :  { %619 = vrot.lane.b32.xlu1 %v4328_v57, %s4164_s20 }
 0x37a   :  { %695 = vrot.lane.b32.xlu1 %v4332_v60, %s4164_s20 }
 0x37e   :  { %773 = vrot.lane.b32.xlu1 %v4324_v54, %s4165_s21 }
 0x382   :  { %771 = vrot.lane.b32.xlu1 %v4338_v63, %s4166_s22 }
 0x384   :  { %543 = vrot.lane.b32.xlu0 %v4324_v54, %s4164_s20 }
 0x3f2   :  { %v512_v45 = vpop.xlane.xlu1 %511 }
 0x3f3   :  { %v519_v46 = vsub.f32 %v350_v31, %v512_v45 }
 0x3f5   :  { %v522_v47 = vmul.f32 1.442695, %v519_v46 }
 0x3f6   :  { %v620_v48 = vpop.permute.xlu1 %619 }
 0x3f7   :  { %4057 = vpow2.f32 %v522_v47  ;;  %v515_v49 = vpop.xlane.xlu0 %514  ;;  %3727 = vmatpush3.msra.mxu0 %v620_v48 }
 0x3f8   :  { %v520_v50 = vsub.f32 %v428_v37, %v515_v49  ;;  %3736 = vmatprep.subr.mxu0 %v4160_v25 }
 0x3fa   :  { %v524_v51 = vmul.f32 1.442695, %v520_v50  ;;  %v696_v5 = vpop.permute.xlu1 %695 }
 0x3fb   :  { %v518_v52 = vpop.xlane.xlu0 %517 }
 0x3fc   :  { %4059 = vpow2.f32 %v524_v51  ;;  %v521_v53 = vsub.f32 %v506_v42, %v518_v52 }
 0x3fe   :  { %v526_v55 = vmul.f32 1.442695, %v521_v53  ;;  %v774_v7 = vpop.permute.xlu1 %773 }
 0x3ff   :  { %v544_v56 = vpop.permute.xlu0 %543 }
 0x400   :  { %4061 = vpow2.f32 %v526_v55  ;;  %3722 = vmatpush3.msra.mxu1 %v544_v56 }
 0x401   :  { %v4058_v58 = vpop.eup %4057  ;;  %3731 = vmatprep.subr.mxu1 %v4160_v25 }
 0x402   :  { %v528_v59 = vsel %vm509_vm4, %v4058_v58, 0.0  ;;  %v772_v9 = vpop.permute.xlu1 %771 }
 0x403   :  { %529 = vadd.xlane.f32.xlu0 %v528_v59 }
 0x406   :  { %v4060_v61 = vpop.eup %4059 }
 0x407   :  { %v531_v62 = vsel %vm509_vm4, %v4060_v61, 0.0 }
 0x408   :  { %532 = vadd.xlane.f32.xlu1 %v531_v62 }
 0x40a   :  { %v4062_v63 = vpop.eup %4061 }
 0x40b   :  { %v534_v3 = vsel %vm509_vm4, %v4062_v63, 0.0 }
 0x40c   :  { %535 = vadd.xlane.f32.xlu0 %v534_v3 }
 0x419   :  { %849 = vrot.lane.b32.xlu1 %v4347_v4, %s4166_s22 }
 0x41d   :  { %927 = vrot.lane.b32.xlu1 %v4356_v6, %s4166_s22 }
 0x422   :  { %851 = vrot.lane.b32.xlu0 %v4328_v57, %s4165_s21 }
 0x426   :  { %929 = vrot.lane.b32.xlu0 %v4332_v60, %s4165_s21 }
 0x490   :  { %v530_v8 = vpop.xlane.xlu0 %529 }
 0x491   :  { %4063 = vrcp.f32 %v530_v8 }
 0x495   :  { %v533_v10 = vpop.xlane.xlu1 %532 }
 0x496   :  { %4065 = vrcp.f32 %v533_v10 }
 0x499   :  { %v536_v12 = vpop.xlane.xlu0 %535  ;;  %v850_v18 = vpop.permute.xlu1 %849 }
 0x49a   :  { %4067 = vrcp.f32 %v536_v12 }
 0x49b   :  { %v4064_v13 = vpop.eup %4063 }
 0x49c   :  { %v540_v4 = vmul.f32 %v4064_v13, %v4058_v58 }
 0x49d   :  { %v852_v15 = vpop.permute.xlu0 %851  ;;  %v928_v23 = vpop.permute.xlu1 %927 }
 0x49e   :  { %3724 = vmatmul.mubr.msk.f32.vlgmr.msra.gmra.mrb[4].mxu1 %vm509_vm4, %v540_v4 }
 0x49f   :  { %3732 = vmatpush3.msra.mxu1 %v696_v5  ;;  %3733 = vmatprep.mubr.msk.f32.mxu1 %vm4159_vm1, %v4160_v25 }
 0x4a0   :  { %v4066_v6 = vpop.eup %4065  ;;  %3741 = vmatprep.subr.mxu1 %v4160_v25 }
 0x4a1   :  { %v541_v14 = vmul.f32 %v4066_v6, %v4060_v61  ;;  %v930_v22 = vpop.permute.xlu0 %929  ;;  %v1281_v6 = vld [vmem:[%s4943_s13] sm:$0xff] }
 0x4a3   :  { %3729 = vmatmul.mubr.msk.f32.vlgmr.msra.gmra.mrb[8].mxu0 %vm509_vm4, %v541_v14  ;;  %v1282_v14 = vld [vmem:[%s4943_s13 + $0x8] sm:$0xff] }
 0x4a4   :  { %v4068_v16 = vpop.eup %4067  ;;  %3737 = vmatpush3.xpose.msk.msra.mxu0 %vm277_vm2, %v774_v7  ;;  %3738 = vmatprep.mubr.msk.f32.mxu0 %vm4159_vm1, %v4160_v25 }
 0x4a5   :  { %v542_v20 = vmul.f32 %v4068_v16, %v4062_v63  ;;  %3746 = vmatprep.subr.mxu0 %v4160_v25  ;;  %v3979_v16 = vpack.c.bf16 %v1282_v14, %v1281_v6 }
 0x4a7   :  { %3734 = vmatmul.mubr.msk.f32.vlgmr.msra.gmra.mrb[6].mxu1 %vm509_vm4, %v542_v20  ;;  %3739 = vmatmul.mubr.msk.f32.vlgmr.msra.gmra.mrb[10].mxu0 %vm277_vm2, %v772_v9 }
 0x4a8   :  { %3742 = vmatpush3.xpose.msk.msra.mxu1 %vm277_vm2, %v852_v15  ;;  %3747 = vmatpush3.xpose.msk.msra.mxu0 %vm277_vm2, %v930_v22  ;;  %v1283_v15 = vld [vmem:[%s4943_s13 + $0x10] sm:$0xff] }
 0x4a9   :  { %3743 = vmatprep.mubr.msk.f32.mxu1 %vm4159_vm1, %v4160_v25  ;;  %3748 = vmatprep.mubr.msk.f32.mxu0 %vm4159_vm1, %v4160_v25 }
 0x4aa   :  { %3756 = vmatprep.subr.mxu0 %v4160_v25  ;;  %3751 = vmatprep.subr.mxu1 %v4160_v25 }
 0x4ab   :  { %3744 = vmatmul.mubr.msk.f32.vlgmr.msra.gmra.mrb[8].mxu1 %vm277_vm2, %v850_v18  ;;  %3749 = vmatmul.mubr.msk.f32.vlgmr.msra.gmra.mrb[12].mxu0 %vm277_vm2, %v928_v23  ;;  %v1284_v18 = vld [vmem:[%s4943_s13 + $0x18] sm:$0xff] }
 0x4ac   :  { %3753 = vmatprep.mubr.msk.f32.mxu1 %vm4159_vm1, %v4160_v25  ;;  %3758 = vmatprep.mubr.msk.f32.mxu0 %vm4159_vm1, %v4160_v25  ;;  %v3982_v20 = vpack.c.bf16 %v1284_v18, %v1283_v15 }
 0x571   :  { %v4439_v24 = vpop.f32.mrb[4].mxu1 }
 0x572   :  { %v3725_v26 = vpop.f32.mrb[5].mxu1 }
 0x576   :  { %v4441_v28 = vpop.f32.mrb[8].mxu0 }
 0x577   :  { %v3730_v29 = vpop.f32.mrb[9].mxu0 }
 0x57a   :  { %v4443_v30 = vpop.f32.mrb[6].mxu1  ;;  %v845_v31 = vpop.f32.mrb[10].mxu0 }
 0x57b   :  { %v846_v32 = vadd.f32 %v845_v31, %v4377_v27  ;;  %v3735_v34 = vpop.f32.mrb[7].mxu1  ;;  %v3740_v35 = vpop.f32.mrb[11].mxu0 }
 0x57d   :  { %v1005_v36 = vsel %vm509_vm4, %v846_v32, -inf }
 0x57e   :  { %1006 = vmax.xlane.f32.xlu0 %v1005_v36  ;;  %v923_v37 = vpop.f32.mrb[8].mxu1  ;;  %v1001_v38 = vpop.f32.mrb[12].mxu0 }
 0x57f   :  { %v924_v40 = vadd.f32 %v923_v37, %v4381_v33  ;;  %v1002_v41 = vadd.f32 %v1001_v38, %v4386_v39  ;;  %v3745_v42 = vpop.f32.mrb[9].mxu1  ;;  %v3750_v43 = vpop.f32.mrb[13].mxu0 }
 0x581   :  { %v1008_v44 = vsel %vm509_vm4, %v924_v40, -inf  ;;  %v1011_v45 = vsel %vm509_vm4, %v1002_v41, -inf }
 0x582   :  { %1009 = vmax.xlane.f32.xlu1 %v1008_v44  ;;  %1012 = vmax.xlane.f32.xlu0 %v1011_v45 }
 0x593   :  { %1114 = vrot.lane.b32.xlu1 %v4328_v57, %s4167_s23 }
 0x60b   :  { %v1007_v46 = vpop.xlane.xlu0 %1006 }
 0x60c   :  { %v1014_v47 = vsub.f32 %v846_v32, %v1007_v46 }
 0x60e   :  { %v1017_v48 = vmul.f32 1.442695, %v1014_v47 }
 0x60f   :  { %v1010_v49 = vpop.xlane.xlu1 %1009  ;;  %v1013_v50 = vpop.xlane.xlu0 %1012 }
 0x610   :  { %4069 = vpow2.f32 %v1017_v48  ;;  %v1015_v51 = vsub.f32 %v924_v40, %v1010_v49  ;;  %v1016_v52 = vsub.f32 %v1002_v41, %v1013_v50 }
 0x612   :  { %v1019_v53 = vmul.f32 1.442695, %v1015_v51  ;;  %v1021_v55 = vmul.f32 1.442695, %v1016_v52 }
 0x613   :  { %v1115_v56 = vpop.permute.xlu1 %1114 }
 0x614   :  { %4071 = vpow2.f32 %v1019_v53  ;;  %3757 = vmatpush3.msra.mxu0 %v1115_v56 }
 0x615   :  { %4073 = vpow2.f32 %v1021_v55  ;;  %3978 = vmatprep.subr.bf16.mxu0 %v4158_v21 }
 0x61a   :  { %v4070_v58 = vpop.eup %4069 }
 0x61b   :  { %v1023_v59 = vsel %vm509_vm4, %v4070_v58, 0.0 }
 0x61c   :  { %1024 = vadd.xlane.f32.xlu0 %v1023_v59 }
 0x61e   :  { %v4072_v57 = vpop.eup %4071 }
 0x61f   :  { %v4074_v61 = vpop.eup %4073  ;;  %v1026_v62 = vsel %vm509_vm4, %v4072_v57, 0.0 }
 0x620   :  { %1027 = vadd.xlane.f32.xlu0 %v1026_v62  ;;  %v1029_v63 = vsel %vm509_vm4, %v4074_v61, 0.0 }
 0x621   :  { %1030 = vadd.xlane.f32.xlu1 %v1029_v63 }
 0x632   :  { %1190 = vrot.lane.b32.xlu1 %v4332_v60, %s4167_s23 }
 0x636   :  { %1038 = vrot.lane.b32.xlu0 %v4324_v54, %s4167_s23 }
 0x6a9   :  { %v1025_v3 = vpop.xlane.xlu0 %1024 }
 0x6aa   :  { %4075 = vrcp.f32 %v1025_v3 }
 0x6ad   :  { %v1028_v5 = vpop.xlane.xlu0 %1027 }
 0x6ae   :  { %v1031_v7 = vpop.xlane.xlu1 %1030  ;;  %4077 = vrcp.f32 %v1028_v5 }
 0x6af   :  { %4079 = vrcp.f32 %v1031_v7 }
 0x6b1   :  { %v1039_v8 = vpop.permute.xlu0 %1038 }
 0x6b2   :  { %3752 = vmatpush3.msra.mxu1 %v1039_v8  ;;  %v1191_v12 = vpop.permute.xlu1 %1190 }
 0x6b3   :  { %3761 = vmatprep.subr.mxu1 %v4160_v25 }
 0x6b4   :  { %v4076_v9 = vpop.eup %4075 }
 0x6b5   :  { %v1035_v10 = vmul.f32 %v4076_v9, %v4070_v58  ;;  %v1443_v9 = vld [vmem:[%s4945_s3] sm:$0xff] }
 0x6b7   :  { %3754 = vmatmul.mubr.msk.f32.vlgmr.msra.gmra.mrb[10].mxu1 %vm509_vm4, %v1035_v10  ;;  %v1444_v10 = vld [vmem:[%s4945_s3 + $0x8] sm:$0xff] }
 0x6b8   :  { %v4078_v13 = vpop.eup %4077  ;;  %3762 = vmatpush3.msra.mxu1 %v1191_v12  ;;  %3763 = vmatprep.mubr.msk.f32.mxu1 %vm4159_vm1, %v4160_v25  ;;  %v3985_v12 = vpack.c.bf16 %v1444_v10, %v1443_v9 }
 0x6b9   :  { %v4080_v54 = vpop.eup %4079  ;;  %v1036_v60 = vmul.f32 %v4078_v13, %v4072_v57  ;;  %3984 = vmatprep.subr.bf16.mxu1 %v4158_v21  ;;  %v1445_v13 = vld [vmem:[%s4945_s3 + $0x10] sm:$0xff] }
 0x6ba   :  { %v1037_v4 = vmul.f32 %v4080_v54, %v4074_v61  ;;  %v1446_v54 = vld [vmem:[%s4945_s3 + $0x18] sm:$0xff] }
 0x6bb   :  { %3759 = vmatmul.mubr.msk.f32.vlgmr.msra.gmra.mrb[14].mxu0 %vm509_vm4, %v1036_v60  ;;  %v3988_v60 = vpack.c.bf16 %v1446_v54, %v1445_v13 }
 0x6bc   :  { %3764 = vmatmul.mubr.msk.f32.vlgmr.msra.gmra.mrb[12].mxu1 %vm509_vm4, %v1037_v4  ;;  %3774 = vmatprep.mubr.msk.f32.mxu0 %vm4159_vm1, %v4160_v25 }
 0x6bd   :  { %3791 = vmatprep.mubr.msk.f32.mxu1 %vm4159_vm1, %v4160_v25  ;;  %3980 = vmatpush3.bf16.msra.mxu0 %v3979_v16 }
 0x6be   :  { %3981 = vmatprep.subr.bf16.mxu0 %v4158_v21  ;;  %3986 = vmatpush3.bf16.msra.mxu1 %v3985_v12 }
 0x6bf   :  { %3987 = vmatprep.subr.bf16.mxu1 %v4158_v21 }
 0x6c1   :  { %3983 = vmatpush3.bf16.msra.mxu0 %v3982_v20 }
 0x6c2   :  { %3990 = vmatprep.subr.bf16.mxu0 %v4158_v21  ;;  %3989 = vmatpush3.bf16.msra.mxu1 %v3988_v60 }
 0x6c3   :  { %4002 = vmatprep.subr.bf16.mxu1 %v4158_v21 }
 0x78a   :  { %v1110_v22 = vpop.f32.mrb[10].mxu1 }
 0x78b   :  { %1269 = vrot.lane.b32.xlu1 %v1110_v22, %s4168_s16  ;;  %v3755_v23 = vpop.f32.mrb[11].mxu1 }
 0x78e   :  { %v1186_v26 = vpop.f32.mrb[14].mxu0 }
 0x78f   :  { %v1262_v29 = vpop.f32.mrb[12].mxu1  ;;  %1271 = vrot.lane.b32.xlu0 %v1186_v26, %s4168_s16  ;;  %v3760_v31 = vpop.f32.mrb[15].mxu0 }
 0x790   :  { %1273 = vrot.lane.b32.xlu1 %v1262_v29, %s4168_s16  ;;  %v3765_v32 = vpop.f32.mrb[13].mxu1  ;;  %v3491_v29 = vld [vmem:[%s4946_s11] ss:$0 sm:$0xff] }
 0x791   :  { %v3492_v32 = vld [vmem:[%s4947_s10] ss:$0 sm:$0xff] }
 0x7fd   :  { %v1270_v34 = vpop.permute.xlu1 %1269 }
 0x7fe   :  { %v1278_v35 = vsel %vm277_vm2, %v4439_v24, %v1270_v34  ;;  %v3487_v24 = vld [vmem:[%s4944_s12] ss:$0 sm:$0xff] }
 0x7ff   :  { %3775 = vmatmul.mubr.msk.f32.vlgmr.msra.gmra.mrb[16].mxu0 %vm112_vm0, %v1278_v35 }
 0x800   :  { %3777 = vmatprep.mubr.msk.f32.mxu0 %vm4159_vm1, %v4160_v25 }
 0x801   :  { %v1272_v36 = vpop.permute.xlu0 %1271 }
 0x802   :  { %v1279_v37 = vsel %vm277_vm2, %v4441_v28, %v1272_v36  ;;  %v1274_v38 = vpop.permute.xlu1 %1273 }
 0x803   :  { %3778 = vmatmul.mubr.msk.f32.gmra.mrb[18].mxu0 %vm112_vm0, %v1279_v37  ;;  %v1280_v40 = vsel %vm277_vm2, %v4443_v30, %v1274_v38 }
 0x804   :  { %3780 = vmatprep.mubr.msk.f32.mxu0 %vm4159_vm1, %v4160_v25 }
 0x807   :  { %3781 = vmatmul.mubr.msk.f32.gmra.mrb[20].mxu0 %vm112_vm0, %v1280_v40 }
 0x808   :  { %3816 = vmatprep.mubr.msk.f32.mxu0 %vm4159_vm1, %v4160_v25 }
 0x8d2   :  { %v1367_v41 = vpop.f32.mrb[16].mxu0 }
 0x8d3   :  { %v1368_v28 = vadd.f32 %v3487_v24, %v1367_v41  ;;  %v3776_v42 = vpop.f32.mrb[17].mxu0 }
 0x8d5   :  { %v4508_v43 = vadd.f32 %v1368_v28, %v4262_v0 }
 0x8d6   :  { %v1372_v44 = vpop.f32.mrb[18].mxu0 }
 0x8d7   :  { %v1373_v45 = vadd.f32 %v3487_v24, %v1372_v44  ;;  %v3779_v46 = vpop.f32.mrb[19].mxu0  ;;  %v1386_v30 = vsel %vm112_vm0, %v4508_v43, 0.0  ;;  %v1567_v44 = vld [vmem:[%s4948_s5] sm:$0xff] }
 0x8d8   :  { %1387 = vadd.xlane.f32.xlu0 %v1386_v30  ;;  %v1569_v30 = vld [vmem:[%s4948_s5 + $0x10] sm:$0xff] }
 0x8d9   :  { %v4513_v47 = vadd.f32 %v1373_v45, %v4272_v2  ;;  %v1568_v45 = vld [vmem:[%s4948_s5 + $0x8] sm:$0xff] }
 0x8da   :  { %v1377_v48 = vpop.f32.mrb[20].mxu0  ;;  %v3991_v46 = vpack.c.bf16 %v1568_v45, %v1567_v44 }
 0x8db   :  { %v1378_v49 = vadd.f32 %v3487_v24, %v1377_v48  ;;  %v3782_v50 = vpop.f32.mrb[21].mxu0  ;;  %v1389_v51 = vsel %vm112_vm0, %v4513_v47, 0.0  ;;  %v1570_v48 = vld [vmem:[%s4948_s5 + $0x18] sm:$0xff] }
 0x8dc   :  { %1390 = vadd.xlane.f32.xlu1 %v1389_v51  ;;  %3992 = vmatpush3.bf16.msra.mxu0 %v3991_v46  ;;  %v1571_v50 = vld [vmem:[%s4948_s5 + $0x20] sm:$0xff]  ;;  %v1572_v51 = vld [vmem:[%s4948_s5 + $0x28] sm:$0xff] }
 0x8dd   :  { %v4518_v0 = vadd.f32 %v1378_v49, %v4267_v1  ;;  %3993 = vmatprep.subr.bf16.mxu0 %v4158_v21  ;;  %v3994_v49 = vpack.c.bf16 %v1570_v48, %v1569_v30 }
 0x8df   :  { %v1392_v52 = vsel %vm112_vm0, %v4518_v0, 0.0 }
 0x8e0   :  { %1393 = vadd.xlane.f32.xlu0 %v1392_v52  ;;  %3995 = vmatpush3.bf16.msra.mxu0 %v3994_v49  ;;  %v3997_v52 = vpack.c.bf16 %v1572_v51, %v1571_v50 }
 0x8e1   :  { %3996 = vmatprep.subr.bf16.mxu0 %v4158_v21 }
 0x8e4   :  { %3998 = vmatpush3.bf16.msra.mxu0 %v3997_v52 }
 0x8e5   :  { %3999 = vmatprep.subr.bf16.mxu0 %v4158_v21 }
 0x965   :  { %v1388_v53 = vpop.xlane.xlu0 %1387 }
 0x966   :  { %v1395_v55 = vmul.f32 0.03125, %v1388_v53  ;;  %v1573_v53 = vld [vmem:[%s4948_s5 + $0x30] sm:$0xff] }
 0x968   :  { %v1398_v56 = vsub.f32 %v4508_v43, %v1395_v55  ;;  %v1574_v55 = vld [vmem:[%s4948_s5 + $0x38] sm:$0xff] }
 0x969   :  { %v1391_v2 = vpop.xlane.xlu1 %1390 }
 0x96a   :  { %v1396_v58 = vmul.f32 0.03125, %v1391_v2  ;;  %v1401_v59 = vmul.f32 %v1398_v56, %v1398_v56  ;;  %v3493_v2 = vld [vmem:[%s4949_s2] ss:$0 sm:$0xff] }
 0x96c   :  { %v1399_v57 = vsub.f32 %v4513_v47, %v1396_v58  ;;  %v1404_v61 = vsel %vm112_vm0, %v1401_v59, 0.0 }
 0x96d   :  { %1405 = vadd.xlane.f32.xlu0 %v1404_v61  ;;  %v1394_v62 = vpop.xlane.xlu0 %1393 }
 0x96e   :  { %v1397_v63 = vmul.f32 0.03125, %v1394_v62  ;;  %v1402_v1 = vmul.f32 %v1399_v57, %v1399_v57 }
 0x970   :  { %v1400_v3 = vsub.f32 %v4518_v0, %v1397_v63  ;;  %v1407_v5 = vsel %vm112_vm0, %v1402_v1, 0.0 }
 0x971   :  { %1408 = vadd.xlane.f32.xlu0 %v1407_v5 }
 0x972   :  { %v1403_v7 = vmul.f32 %v1400_v3, %v1400_v3 }
 0x974   :  { %v1410_v8 = vsel %vm112_vm0, %v1403_v7, 0.0 }
 0x975   :  { %1411 = vadd.xlane.f32.xlu1 %v1410_v8 }
 0x9fa   :  { %v1406_v4 = vpop.xlane.xlu0 %1405 }
 0x9fb   :  { %v1413_v6 = vmul.f32 0.03125, %v1406_v4 }
 0x9fd   :  { %v1416_v14 = vadd.f32 1e-05, %v1413_v6 }
 0x9fe   :  { %v1409_v15 = vpop.xlane.xlu0 %1408 }
 0x9ff   :  { %4081 = vrsqrt.f32 %v1416_v14  ;;  %v1414_v16 = vmul.f32 0.03125, %v1409_v15 }
 0xa01   :  { %v1417_v18 = vadd.f32 1e-05, %v1414_v16 }
 0xa02   :  { %v1412_v20 = vpop.xlane.xlu1 %1411 }
 0xa03   :  { %4083 = vrsqrt.f32 %v1417_v18  ;;  %v1415_v22 = vmul.f32 0.03125, %v1412_v20 }
 0xa05   :  { %v1418_v23 = vadd.f32 1e-05, %v1415_v22 }
 0xa07   :  { %4085 = vrsqrt.f32 %v1418_v23 }
 0xa09   :  { %v4082_v26 = vpop.eup %4081 }
 0xa0a   :  { %v1422_v31 = vmul.f32 %v4082_v26, %v1398_v56  ;;  %v4000_v56 = vpack.c.bf16 %v1574_v55, %v1573_v53 }
 0xa0c   :  { %v1431_v34 = vmul.f32 %v3491_v29, %v1422_v31  ;;  %4001 = vmatpush3.bf16.msra.mxu0 %v4000_v56 }
 0xa0d   :  { %v4084_v35 = vpop.eup %4083  ;;  %3847 = vmatprep.subr.mxu0 %v4160_v25 }
 0xa0e   :  { %v1440_v36 = vadd.f32 %v3492_v32, %v1431_v34  ;;  %v1423_v37 = vmul.f32 %v4084_v35, %v1399_v57  ;;  %v3497_v34 = vld [vmem:[%s4950_s4] ss:$0 sm:$0xff] }
 0xa10   :  { %3792 = vmatmul.mubr.msk.f32.vlgmr.msra.gmra.mrb[14].mxu1 %vm112_vm0, %v1440_v36  ;;  %v1432_v38 = vmul.f32 %v3491_v29, %v1423_v37 }
 0xa11   :  { %v4086_v40 = vpop.eup %4085  ;;  %3794 = vmatprep.mubr.msk.f32.mxu1 %vm4159_vm1, %v4160_v25 }
 0xa12   :  { %v1441_v24 = vadd.f32 %v3492_v32, %v1432_v38  ;;  %v1424_v41 = vmul.f32 %v4086_v40, %v1400_v3 }
 0xa14   :  { %3795 = vmatmul.mubr.msk.f32.gmra.mrb[16].mxu1 %vm112_vm0, %v1441_v24  ;;  %v1433_v28 = vmul.f32 %v3491_v29, %v1424_v41 }
 0xa15   :  { %3797 = vmatprep.mubr.msk.f32.mxu1 %vm4159_vm1, %v4160_v25 }
 0xa16   :  { %v1442_v42 = vadd.f32 %v3492_v32, %v1433_v28 }
 0xa18   :  { %3798 = vmatmul.mubr.msk.f32.gmra.mrb[18].mxu1 %vm112_vm0, %v1442_v42 }
 0xa19   :  { %3833 = vmatprep.mubr.msk.f32.mxu1 %vm4159_vm1, %v4160_v25 }
 0xae3   :  { %v1529_v58 = vpop.f32.mrb[14].mxu1 }
 0xae4   :  { %v1530_v59 = vadd.f32 %v3493_v2, %v1529_v58  ;;  %v3793_v57 = vpop.f32.mrb[15].mxu1 }
 0xae6   :  { %v1543_v61 = vmul.f32 1.702, %v1530_v59 }
 0xae7   :  { %v1534_v62 = vpop.f32.mrb[16].mxu1 }
 0xae8   :  { %v1546_v63 = vsub.f32 0.0, %v1543_v61  ;;  %v1535_v1 = vadd.f32 %v3493_v2, %v1534_v62  ;;  %v3796_v3 = vpop.f32.mrb[17].mxu1 }
 0xaea   :  { %v1549_v5 = vmul.f32 1.442695, %v1546_v63  ;;  %v1544_v7 = vmul.f32 1.702, %v1535_v1  ;;  %v3505_v63 = vld [vmem:[%s4960_s19 + $0x20] sm:$0xff] }
 0xaeb   :  { %v1539_v8 = vpop.f32.mrb[18].mxu1 }
 0xaec   :  { %4087 = vpow2.f32 %v1549_v5  ;;  %v1547_v9 = vsub.f32 0.0, %v1544_v7  ;;  %v1540_v10 = vadd.f32 %v3493_v2, %v1539_v8  ;;  %v3799_v12 = vpop.f32.mrb[19].mxu1  ;;  %v3507_v5 = vld [vmem:[%s4960_s19 + $0x30] sm:$0xff]  ;;  %v3508_v7 = vld [vmem:[%s4960_s19 + $0x38] sm:$0xff] }
 0xaed   :  { %v4006_v8 = vpack.c.bf16 %v3508_v7, %v3507_v5 }
 0xaee   :  { %v1551_v13 = vmul.f32 1.442695, %v1547_v9  ;;  %v1545_v54 = vmul.f32 1.702, %v1540_v10 }
 0xaf0   :  { %4089 = vpow2.f32 %v1551_v13  ;;  %v1548_v60 = vsub.f32 0.0, %v1545_v54 }
 0xaf2   :  { %v1553_v4 = vmul.f32 1.442695, %v1548_v60 }
 0xaf4   :  { %4091 = vpow2.f32 %v1553_v4 }
 0xaf6   :  { %v4088_v6 = vpop.eup %4087 }
 0xaf7   :  { %v1555_v14 = vadd.f32 1.0, %v4088_v6 }
 0xaf9   :  { %4093 = vrcp.f32 %v1555_v14 }
 0xafa   :  { %v4090_v15 = vpop.eup %4089 }
 0xafb   :  { %v1556_v16 = vadd.f32 1.0, %v4090_v15 }
 0xafd   :  { %4095 = vrcp.f32 %v1556_v16  ;;  %v3503_v16 = vld [vmem:[%s4939_s9 + $0x1] ss:$0 sm:$0xff] }
 0xafe   :  { %v4092_v18 = vpop.eup %4091 }
 0xaff   :  { %v1557_v20 = vadd.f32 1.0, %v4092_v18 }
 0xb01   :  { %4097 = vrcp.f32 %v1557_v20  ;;  %v3504_v20 = vld [vmem:[%s4940_s8 + $0x1] ss:$0 sm:$0xff] }
 0xb03   :  { %v4094_v22 = vpop.eup %4093 }
 0xb04   :  { %v1564_v23 = vmul.f32 %v4094_v22, %v1530_v59 }
 0xb06   :  { %3817 = vmatmul.mubr.msk.f32.vlgmr.msra.gmra.mrb[22].mxu0 %vm1582_vm5, %v1564_v23 }
 0xb07   :  { %v4096_v26 = vpop.eup %4095  ;;  %3819 = vmatprep.mubr.msk.f32.mxu0 %vm4159_vm1, %v4160_v25 }
 0xb08   :  { %v1565_v29 = vmul.f32 %v4096_v26, %v1535_v1  ;;  %v3506_v1 = vld [vmem:[%s4960_s19 + $0x28] sm:$0xff] }
 0xb09   :  { %v4003_v3 = vpack.c.bf16 %v3506_v1, %v3505_v63 }
 0xb0a   :  { %3820 = vmatmul.mubr.msk.f32.gmra.mrb[24].mxu0 %vm1582_vm5, %v1565_v29 }
 0xb0b   :  { %v4098_v31 = vpop.eup %4097  ;;  %3822 = vmatprep.mubr.msk.f32.mxu0 %vm4159_vm1, %v4160_v25  ;;  %4004 = vmatpush3.bf16.msra.mxu1 %v4003_v3 }
 0xb0c   :  { %v1566_v32 = vmul.f32 %v4098_v31, %v1540_v10  ;;  %4005 = vmatprep.subr.bf16.mxu1 %v4158_v21 }
 0xb0e   :  { %3823 = vmatmul.mubr.msk.f32.gmra.mrb[26].mxu0 %vm1582_vm5, %v1566_v32 }
 0xb0f   :  { %3849 = vmatprep.mubr.msk.f32.mxu0 %vm4159_vm1, %v4160_v25  ;;  %4007 = vmatpush3.bf16.msra.mxu1 %v4006_v8 }
 0xb10   :  { %3842 = vmatprep.subr.mxu1 %v4160_v25 }
 0xbd9   :  { %v1658_v35 = vpop.f32.mrb[22].mxu0 }
 0xbda   :  { %v1659_v36 = vadd.f32 %v3497_v34, %v1658_v35  ;;  %v3818_v37 = vpop.f32.mrb[23].mxu0 }
 0xbdc   :  { %v4601_v38 = vadd.f32 %v1659_v36, %v4508_v43 }
 0xbdd   :  { %v1663_v40 = vpop.f32.mrb[24].mxu0 }
 0xbde   :  { %v1664_v24 = vadd.f32 %v3497_v34, %v1663_v40  ;;  %v3821_v41 = vpop.f32.mrb[25].mxu0  ;;  %v1679_v28 = vsel %vm112_vm0, %v4601_v38, 0.0  ;;  %v3510_v40 = vld [vmem:[%s4941_s15 + $0x1] ss:$0 sm:$0xff] }
 0xbdf   :  { %1680 = vadd.xlane.f32.xlu0 %v1679_v28 }
 0xbe0   :  { %v4606_v42 = vadd.f32 %v1664_v24, %v4513_v47 }
 0xbe1   :  { %v1668_v44 = vpop.f32.mrb[26].mxu0 }
 0xbe2   :  { %v1669_v45 = vadd.f32 %v3497_v34, %v1668_v44  ;;  %v3824_v46 = vpop.f32.mrb[27].mxu0  ;;  %v1682_v30 = vsel %vm112_vm0, %v4606_v42, 0.0 }
 0xbe3   :  { %1683 = vadd.xlane.f32.xlu1 %v1682_v30 }
 0xbe4   :  { %v4611_v43 = vadd.f32 %v1669_v45, %v4518_v0 }
 0xbe6   :  { %v1685_v48 = vsel %vm112_vm0, %v4611_v43, 0.0 }
 0xbe7   :  { %1686 = vadd.xlane.f32.xlu0 %v1685_v48 }
 0xc6c   :  { %v1681_v49 = vpop.xlane.xlu0 %1680 }
 0xc6d   :  { %v1688_v50 = vmul.f32 0.03125, %v1681_v49 }
 0xc6f   :  { %v1691_v51 = vsub.f32 %v4601_v38, %v1688_v50 }
 0xc70   :  { %v1684_v47 = vpop.xlane.xlu1 %1683 }
 0xc71   :  { %v1689_v52 = vmul.f32 0.03125, %v1684_v47  ;;  %v1694_v53 = vmul.f32 %v1691_v51, %v1691_v51 }
 0xc73   :  { %v1692_v55 = vsub.f32 %v4606_v42, %v1689_v52  ;;  %v1697_v56 = vsel %vm112_vm0, %v1694_v53, 0.0 }
 0xc74   :  { %1698 = vadd.xlane.f32.xlu1 %v1697_v56  ;;  %v1687_v2 = vpop.xlane.xlu0 %1686 }
 0xc75   :  { %v1690_v58 = vmul.f32 0.03125, %v1687_v2  ;;  %v1695_v0 = vmul.f32 %v1692_v55, %v1692_v55 }
 0xc77   :  { %v1693_v59 = vsub.f32 %v4611_v43, %v1690_v58  ;;  %v1700_v57 = vsel %vm112_vm0, %v1695_v0, 0.0 }
 0xc78   :  { %1701 = vadd.xlane.f32.xlu0 %v1700_v57 }
 0xc79   :  { %v1696_v61 = vmul.f32 %v1693_v59, %v1693_v59 }
 0xc7b   :  { %v1703_v62 = vsel %vm112_vm0, %v1696_v61, 0.0 }
 0xc7c   :  { %1704 = vadd.xlane.f32.xlu1 %v1703_v62 }
 0xd01   :  { %v1699_v9 = vpop.xlane.xlu1 %1698 }
 0xd02   :  { %v1706_v10 = vmul.f32 0.03125, %v1699_v9 }
 0xd04   :  { %v1709_v12 = vadd.f32 1e-05, %v1706_v10 }
 0xd05   :  { %v1702_v13 = vpop.xlane.xlu0 %1701 }
 0xd06   :  { %4099 = vrsqrt.f32 %v1709_v12  ;;  %v1707_v54 = vmul.f32 0.03125, %v1702_v13 }
 0xd08   :  { %v1710_v60 = vadd.f32 1e-05, %v1707_v54 }
 0xd09   :  { %v1705_v4 = vpop.xlane.xlu1 %1704 }
 0xd0a   :  { %4101 = vrsqrt.f32 %v1710_v60  ;;  %v1708_v6 = vmul.f32 0.03125, %v1705_v4 }
 0xd0c   :  { %v1711_v14 = vadd.f32 1e-05, %v1708_v6 }
 0xd0e   :  { %4103 = vrsqrt.f32 %v1711_v14 }
 0xd10   :  { %v4100_v15 = vpop.eup %4099 }
 0xd11   :  { %v1715_v18 = vmul.f32 %v4100_v15, %v1691_v51 }
 0xd13   :  { %v1724_v22 = vmul.f32 %v3503_v16, %v1715_v18 }
 0xd14   :  { %v4102_v23 = vpop.eup %4101 }
 0xd15   :  { %v1733_v26 = vadd.f32 %v3504_v20, %v1724_v22  ;;  %v1716_v29 = vmul.f32 %v4102_v23, %v1692_v55 }
 0xd17   :  { %3834 = vmatmul.mubr.msk.f32.vlgmr.msra.gmra.mrb[20].mxu1 %vm112_vm0, %v1733_v26  ;;  %v1725_v31 = vmul.f32 %v3503_v16, %v1716_v29 }
 0xd18   :  { %v4104_v32 = vpop.eup %4103  ;;  %3836 = vmatprep.mubr.msk.f32.mxu1 %vm4159_vm1, %v4160_v25 }
 0xd19   :  { %v1734_v34 = vadd.f32 %v3504_v20, %v1725_v31  ;;  %v1717_v35 = vmul.f32 %v4104_v32, %v1693_v59 }
 0xd1b   :  { %3837 = vmatmul.mubr.msk.f32.gmra.mrb[22].mxu1 %vm112_vm0, %v1734_v34  ;;  %v1726_v36 = vmul.f32 %v3503_v16, %v1717_v35 }
 0xd1c   :  { %3839 = vmatprep.mubr.msk.f32.mxu1 %vm4159_vm1, %v4160_v25 }
 0xd1d   :  { %v1735_v37 = vadd.f32 %v3504_v20, %v1726_v36 }
 0xd1f   :  { %3840 = vmatmul.mubr.msk.f32.gmra.mrb[24].mxu1 %vm112_vm0, %v1735_v37 }
 0xd20   :  { %3844 = vmatprep.mubr.msk.f32.mxu1 %vm4159_vm1, %v4160_v25 }
 0xdea   :  { %v1824_v24 = vpop.f32.mrb[20].mxu1 }
 0xdeb   :  { %v4653_v41 = vadd.f32 %v3510_v40, %v1824_v24  ;;  %v3835_v28 = vpop.f32.mrb[21].mxu1 }
 0xded   :  { %1842 = vrot.lane.b32.xlu0 %v4653_v41, %s4161_s30  ;;  %v1838_v51 = vmul.f32 0.25, %v4653_v41 }
 0xdee   :  { %v1829_v44 = vpop.f32.mrb[22].mxu1 }
 0xdef   :  { %v4657_v45 = vadd.f32 %v3510_v40, %v1829_v44  ;;  %v3838_v46 = vpop.f32.mrb[23].mxu1 }
 0xdf1   :  { %1920 = vrot.lane.b32.xlu1 %v4657_v45, %s4161_s30  ;;  %v1839_v52 = vmul.f32 0.25, %v4657_v45 }
 0xdf2   :  { %v1834_v30 = vpop.f32.mrb[24].mxu1 }
 0xdf3   :  { %v4661_v48 = vadd.f32 %v3510_v40, %v1834_v30  ;;  %v3841_v49 = vpop.f32.mrb[25].mxu1 }
 0xdf5   :  { %1998 = vrot.lane.b32.xlu1 %v4661_v48, %s4161_s30  ;;  %v1840_v55 = vmul.f32 0.25, %v4661_v48 }
 0xe5f   :  { %v1843_v50 = vpop.permute.xlu0 %1842 }
 0xe60   :  { %3843 = vmatpush3.xpose.msk.msra.mxu1 %vm277_vm2, %v1843_v50 }
 0xe61   :  { %3852 = vmatprep.subr.mxu1 %v4160_v25 }
 0xe63   :  { %v1921_v47 = vpop.permute.xlu1 %1920  ;;  %3845 = vmatmul.mubr.msk.f32.vlgmr.msra.gmra.mrb[26].mxu1 %vm277_vm2, %v1838_v51 }
 0xe64   :  { %3848 = vmatpush3.xpose.msk.msra.mxu0 %vm277_vm2, %v1921_v47  ;;  %3854 = vmatprep.mubr.msk.f32.mxu1 %vm4159_vm1, %v4160_v25 }
 0xe65   :  { %3857 = vmatprep.subr.mxu0 %v4160_v25 }
 0xe67   :  { %3850 = vmatmul.mubr.msk.f32.vlgmr.msra.gmra.mrb[28].mxu0 %vm277_vm2, %v1839_v52  ;;  %v1999_v53 = vpop.permute.xlu1 %1998 }
 0xe68   :  { %3853 = vmatpush3.xpose.msk.msra.mxu1 %vm277_vm2, %v1999_v53  ;;  %3859 = vmatprep.mubr.msk.f32.mxu0 %vm4159_vm1, %v4160_v25 }
 0xe69   :  { %3862 = vmatprep.subr.mxu1 %v4160_v25 }
 0xe6b   :  { %3855 = vmatmul.mubr.msk.f32.vlgmr.msra.gmra.mrb[28].mxu1 %vm277_vm2, %v1840_v55 }
 0xe6c   :  { %3864 = vmatprep.mubr.msk.f32.mxu1 %vm4159_vm1, %v4160_v25 }
 0xf36   :  { %v1915_v56 = vpop.f32.mrb[26].mxu1 }
 0xf37   :  { %v1916_v2 = vadd.f32 %v1915_v56, %v4377_v27  ;;  %v3846_v58 = vpop.f32.mrb[27].mxu1 }
 0xf39   :  { %v2075_v0 = vsel %vm509_vm4, %v1916_v2, -inf }
 0xf3a   :  { %v1993_v59 = vpop.f32.mrb[28].mxu0  ;;  %2076 = vmax.xlane.f32.xlu1 %v2075_v0 }
 0xf3b   :  { %v1994_v57 = vadd.f32 %v1993_v59, %v4381_v33  ;;  %v3851_v61 = vpop.f32.mrb[29].mxu0 }
 0xf3d   :  { %v2078_v62 = vsel %vm509_vm4, %v1994_v57, -inf }
 0xf3e   :  { %2079 = vmax.xlane.f32.xlu0 %v2078_v62  ;;  %v2071_v63 = vpop.f32.mrb[28].mxu1 }
 0xf3f   :  { %v2072_v1 = vadd.f32 %v2071_v63, %v4386_v39  ;;  %v3856_v3 = vpop.f32.mrb[29].mxu1 }
 0xf41   :  { %v2081_v5 = vsel %vm509_vm4, %v2072_v1, -inf }
 0xf42   :  { %2082 = vmax.xlane.f32.xlu0 %v2081_v5 }
 0xf4b   :  { %2184 = vrot.lane.b32.xlu1 %v4657_v45, %s4164_s20 }
 0xf4f   :  { %2260 = vrot.lane.b32.xlu1 %v4661_v48, %s4164_s20 }
 0xf53   :  { %2338 = vrot.lane.b32.xlu1 %v4653_v41, %s4165_s21 }
 0xf57   :  { %2336 = vrot.lane.b32.xlu1 %v1838_v51, %s4166_s22 }
 0xf58   :  { %2108 = vrot.lane.b32.xlu0 %v4653_v41, %s4164_s20 }
 0xfc7   :  { %v2077_v7 = vpop.xlane.xlu1 %2076 }
 0xfc8   :  { %v2084_v8 = vsub.f32 %v1916_v2, %v2077_v7 }
 0xfca   :  { %v2087_v9 = vmul.f32 1.442695, %v2084_v8 }
 0xfcb   :  { %v2185_v10 = vpop.permute.xlu1 %2184  ;;  %v2080_v12 = vpop.xlane.xlu0 %2079 }
 0xfcc   :  { %4105 = vpow2.f32 %v2087_v9  ;;  %v2085_v13 = vsub.f32 %v1994_v57, %v2080_v12  ;;  %3863 = vmatpush3.msra.mxu1 %v2185_v10 }
 0xfcd   :  { %3872 = vmatprep.subr.mxu1 %v4160_v25 }
 0xfce   :  { %v2089_v54 = vmul.f32 1.442695, %v2085_v13 }
 0xfcf   :  { %v2083_v60 = vpop.xlane.xlu0 %2082  ;;  %v2261_v26 = vpop.permute.xlu1 %2260 }
 0xfd0   :  { %4107 = vpow2.f32 %v2089_v54  ;;  %v2086_v4 = vsub.f32 %v2072_v1, %v2083_v60 }
 0xfd2   :  { %v2091_v6 = vmul.f32 1.442695, %v2086_v4 }
 0xfd3   :  { %v2109_v14 = vpop.permute.xlu0 %2108  ;;  %v2339_v29 = vpop.permute.xlu1 %2338 }
 0xfd4   :  { %4109 = vpow2.f32 %v2091_v6  ;;  %3858 = vmatpush3.msra.mxu0 %v2109_v14 }
 0xfd5   :  { %3867 = vmatprep.subr.mxu0 %v4160_v25 }
 0xfd6   :  { %v4106_v15 = vpop.eup %4105 }
 0xfd7   :  { %v2093_v16 = vsel %vm509_vm4, %v4106_v15, 0.0  ;;  %v2337_v31 = vpop.permute.xlu1 %2336 }
 0xfd8   :  { %2094 = vadd.xlane.f32.xlu0 %v2093_v16 }
 0xfda   :  { %v4108_v18 = vpop.eup %4107 }
 0xfdb   :  { %v2096_v20 = vsel %vm509_vm4, %v4108_v18, 0.0 }
 0xfdc   :  { %2097 = vadd.xlane.f32.xlu1 %v2096_v20 }
 0xfde   :  { %v4110_v22 = vpop.eup %4109 }
 0xfdf   :  { %v2099_v23 = vsel %vm509_vm4, %v4110_v22, 0.0 }
 0xfe0   :  { %2100 = vadd.xlane.f32.xlu0 %v2099_v23 }
 0xfed   :  { %2414 = vrot.lane.b32.xlu1 %v1839_v52, %s4166_s22 }
 0xff1   :  { %2492 = vrot.lane.b32.xlu1 %v1840_v55, %s4166_s22 }
 0xff6   :  { %2416 = vrot.lane.b32.xlu0 %v4657_v45, %s4165_s21 }
 0xffa   :  { %2494 = vrot.lane.b32.xlu0 %v4661_v48, %s4165_s21 }
0x1065   :  { %v2095_v32 = vpop.xlane.xlu0 %2094 }
0x1066   :  { %4111 = vrcp.f32 %v2095_v32 }
0x1069   :  { %v2098_v34 = vpop.xlane.xlu1 %2097 }
0x106a   :  { %4113 = vrcp.f32 %v2098_v34 }
0x106d   :  { %v2101_v35 = vpop.xlane.xlu0 %2100  ;;  %v2415_v46 = vpop.permute.xlu1 %2414 }
0x106e   :  { %4115 = vrcp.f32 %v2101_v35  ;;  %v3532_v35 = vld [vmem:[%s4943_s13 + $0x20] sm:$0xff] }
0x1070   :  { %v4112_v36 = vpop.eup %4111 }
0x1071   :  { %v2105_v37 = vmul.f32 %v4112_v36, %v4106_v15  ;;  %v2417_v28 = vpop.permute.xlu0 %2416  ;;  %v2493_v50 = vpop.permute.xlu1 %2492  ;;  %v3533_v36 = vld [vmem:[%s4943_s13 + $0x28] sm:$0xff] }
0x1073   :  { %3860 = vmatmul.mubr.msk.f32.vlgmr.msra.gmra.mrb[30].mxu0 %vm509_vm4, %v2105_v37  ;;  %v3534_v37 = vld [vmem:[%s4943_s13 + $0x30] sm:$0xff] }
0x1074   :  { %v4114_v40 = vpop.eup %4113  ;;  %3868 = vmatpush3.msra.mxu0 %v2261_v26  ;;  %3869 = vmatprep.mubr.msk.f32.mxu0 %vm4159_vm1, %v4160_v25 }
0x1075   :  { %v2106_v24 = vmul.f32 %v4114_v40, %v4108_v18  ;;  %3877 = vmatprep.subr.mxu0 %v4160_v25  ;;  %v2495_v49 = vpop.permute.xlu0 %2494  ;;  %v4009_v40 = vpack.c.bf16 %v3533_v36, %v3532_v35 }
0x1077   :  { %3865 = vmatmul.mubr.msk.f32.vlgmr.msra.gmra.mrb[30].mxu1 %vm509_vm4, %v2106_v24  ;;  %v3535_v24 = vld [vmem:[%s4943_s13 + $0x38] sm:$0xff] }
0x1078   :  { %v4116_v44 = vpop.eup %4115  ;;  %3873 = vmatpush3.xpose.msk.msra.mxu1 %vm277_vm2, %v2339_v29  ;;  %3874 = vmatprep.mubr.msk.f32.mxu1 %vm4159_vm1, %v4160_v25 }
0x1079   :  { %v2107_v30 = vmul.f32 %v4116_v44, %v4110_v22  ;;  %3882 = vmatprep.subr.mxu1 %v4160_v25 }
0x107b   :  { %3870 = vmatmul.mubr.msk.f32.vlgmr.msra.gmra.mrb[32].mxu0 %vm509_vm4, %v2107_v30  ;;  %3875 = vmatmul.mubr.msk.f32.vlgmr.msra.gmra.mrb[32].mxu1 %vm277_vm2, %v2337_v31 }
0x107c   :  { %3878 = vmatpush3.xpose.msk.msra.mxu0 %vm277_vm2, %v2417_v28  ;;  %3883 = vmatpush3.xpose.msk.msra.mxu1 %vm277_vm2, %v2495_v49  ;;  %v4012_v28 = vpack.c.bf16 %v3535_v24, %v3534_v37 }
0x107d   :  { %3879 = vmatprep.mubr.msk.f32.mxu0 %vm4159_vm1, %v4160_v25  ;;  %3884 = vmatprep.mubr.msk.f32.mxu1 %vm4159_vm1, %v4160_v25 }
0x107e   :  { %3892 = vmatprep.subr.mxu1 %v4160_v25  ;;  %3887 = vmatprep.subr.mxu0 %v4160_v25 }
0x107f   :  { %3880 = vmatmul.mubr.msk.f32.vlgmr.msra.gmra.mrb[34].mxu0 %vm277_vm2, %v2415_v46  ;;  %3885 = vmatmul.mubr.msk.f32.vlgmr.msra.gmra.mrb[34].mxu1 %vm277_vm2, %v2493_v50 }
0x1080   :  { %3889 = vmatprep.mubr.msk.f32.mxu0 %vm4159_vm1, %v4160_v25  ;;  %3894 = vmatprep.mubr.msk.f32.mxu1 %vm4159_vm1, %v4160_v25 }
0x1146   :  { %v4734_v51 = vpop.f32.mrb[30].mxu0 }
0x1147   :  { %v3861_v47 = vpop.f32.mrb[31].mxu0 }
0x114a   :  { %v4736_v52 = vpop.f32.mrb[30].mxu1 }
0x114b   :  { %v3866_v53 = vpop.f32.mrb[31].mxu1 }
0x114e   :  { %v4738_v55 = vpop.f32.mrb[32].mxu0  ;;  %v2410_v56 = vpop.f32.mrb[32].mxu1 }
0x114f   :  { %v2411_v2 = vadd.f32 %v2410_v56, %v4377_v27  ;;  %v3871_v58 = vpop.f32.mrb[33].mxu0  ;;  %v3876_v0 = vpop.f32.mrb[33].mxu1 }
0x1151   :  { %v2570_v59 = vsel %vm509_vm4, %v2411_v2, -inf }
0x1152   :  { %2571 = vmax.xlane.f32.xlu0 %v2570_v59  ;;  %v2488_v57 = vpop.f32.mrb[34].mxu0  ;;  %v2566_v61 = vpop.f32.mrb[34].mxu1 }
0x1153   :  { %v2489_v62 = vadd.f32 %v2488_v57, %v4381_v33  ;;  %v2567_v63 = vadd.f32 %v2566_v61, %v4386_v39  ;;  %v3881_v1 = vpop.f32.mrb[35].mxu0  ;;  %v3886_v3 = vpop.f32.mrb[35].mxu1 }
0x1155   :  { %v2573_v5 = vsel %vm509_vm4, %v2489_v62, -inf  ;;  %v2576_v7 = vsel %vm509_vm4, %v2567_v63, -inf }
0x1156   :  { %2574 = vmax.xlane.f32.xlu1 %v2573_v5  ;;  %2577 = vmax.xlane.f32.xlu0 %v2576_v7 }
0x1167   :  { %2679 = vrot.lane.b32.xlu1 %v4657_v45, %s4167_s23 }
0x11df   :  { %v2572_v27 = vpop.xlane.xlu0 %2571 }
0x11e0   :  { %v2579_v8 = vsub.f32 %v2411_v2, %v2572_v27 }
0x11e2   :  { %v2582_v9 = vmul.f32 1.442695, %v2579_v8 }
0x11e3   :  { %v2575_v10 = vpop.xlane.xlu1 %2574  ;;  %v2578_v12 = vpop.xlane.xlu0 %2577 }
0x11e4   :  { %4117 = vpow2.f32 %v2582_v9  ;;  %v2580_v33 = vsub.f32 %v2489_v62, %v2575_v10  ;;  %v2581_v13 = vsub.f32 %v2567_v63, %v2578_v12 }
0x11e6   :  { %v2584_v39 = vmul.f32 1.442695, %v2580_v33  ;;  %v2586_v54 = vmul.f32 1.442695, %v2581_v13 }
0x11e7   :  { %v2680_v60 = vpop.permute.xlu1 %2679 }
0x11e8   :  { %4119 = vpow2.f32 %v2584_v39  ;;  %3893 = vmatpush3.msra.mxu1 %v2680_v60 }
0x11e9   :  { %4121 = vpow2.f32 %v2586_v54  ;;  %4008 = vmatprep.subr.bf16.mxu1 %v4158_v21 }
0x11ee   :  { %v4118_v4 = vpop.eup %4117 }
0x11ef   :  { %v2588_v6 = vsel %vm509_vm4, %v4118_v4, 0.0 }
0x11f0   :  { %2589 = vadd.xlane.f32.xlu0 %v2588_v6 }
0x11f2   :  { %v4120_v45 = vpop.eup %4119 }
0x11f3   :  { %v4122_v14 = vpop.eup %4121  ;;  %v2591_v15 = vsel %vm509_vm4, %v4120_v45, 0.0 }
0x11f4   :  { %2592 = vadd.xlane.f32.xlu0 %v2591_v15  ;;  %v2594_v16 = vsel %vm509_vm4, %v4122_v14, 0.0 }
0x11f5   :  { %2595 = vadd.xlane.f32.xlu1 %v2594_v16 }
0x1206   :  { %2755 = vrot.lane.b32.xlu1 %v4661_v48, %s4167_s23 }
0x120a   :  { %2603 = vrot.lane.b32.xlu0 %v4653_v41, %s4167_s23 }
0x127d   :  { %v2590_v18 = vpop.xlane.xlu0 %2589 }
0x127e   :  { %4123 = vrcp.f32 %v2590_v18 }
0x1281   :  { %v2593_v20 = vpop.xlane.xlu0 %2592 }
0x1282   :  { %v2596_v22 = vpop.xlane.xlu1 %2595  ;;  %4125 = vrcp.f32 %v2593_v20  ;;  %v3545_v20 = vld [vmem:[%s4945_s3 + $0x20] sm:$0xff] }
0x1283   :  { %4127 = vrcp.f32 %v2596_v22  ;;  %v3546_v22 = vld [vmem:[%s4945_s3 + $0x28] sm:$0xff] }
0x1285   :  { %v2604_v23 = vpop.permute.xlu0 %2603 }
0x1286   :  { %3888 = vmatpush3.msra.mxu0 %v2604_v23  ;;  %v2756_v31 = vpop.permute.xlu1 %2755  ;;  %v4015_v23 = vpack.c.bf16 %v3546_v22, %v3545_v20 }
0x1287   :  { %3897 = vmatprep.subr.mxu0 %v4160_v25 }
0x1288   :  { %v4124_v26 = vpop.eup %4123 }
0x1289   :  { %v2600_v29 = vmul.f32 %v4124_v26, %v4118_v4  ;;  %v3547_v26 = vld [vmem:[%s4945_s3 + $0x30] sm:$0xff] }
0x128b   :  { %3890 = vmatmul.mubr.msk.f32.vlgmr.msra.gmra.mrb[36].mxu0 %vm509_vm4, %v2600_v29  ;;  %v3548_v29 = vld [vmem:[%s4945_s3 + $0x38] sm:$0xff] }
0x128c   :  { %v4126_v32 = vpop.eup %4125  ;;  %3898 = vmatpush3.msra.mxu0 %v2756_v31  ;;  %3899 = vmatprep.mubr.msk.f32.mxu0 %vm4159_vm1, %v4160_v25  ;;  %v4018_v31 = vpack.c.bf16 %v3548_v29, %v3547_v26 }
0x128d   :  { %v4128_v41 = vpop.eup %4127  ;;  %v2601_v48 = vmul.f32 %v4126_v32, %v4120_v45  ;;  %4014 = vmatprep.subr.bf16.mxu0 %v4158_v21 }
0x128e   :  { %v2602_v34 = vmul.f32 %v4128_v41, %v4122_v14 }
0x128f   :  { %3895 = vmatmul.mubr.msk.f32.vlgmr.msra.gmra.mrb[36].mxu1 %vm509_vm4, %v2601_v48 }
0x1290   :  { %3900 = vmatmul.mubr.msk.f32.vlgmr.msra.gmra.mrb[38].mxu0 %vm509_vm4, %v2602_v34  ;;  %3910 = vmatprep.mubr.msk.f32.mxu1 %vm4159_vm1, %v4160_v25 }
0x1291   :  { %3927 = vmatprep.mubr.msk.f32.mxu0 %vm4159_vm1, %v4160_v25  ;;  %4010 = vmatpush3.bf16.msra.mxu1 %v4009_v40 }
0x1292   :  { %4011 = vmatprep.subr.bf16.mxu1 %v4158_v21  ;;  %4016 = vmatpush3.bf16.msra.mxu0 %v4015_v23 }
0x1293   :  { %4017 = vmatprep.subr.bf16.mxu0 %v4158_v21 }
0x1295   :  { %4013 = vmatpush3.bf16.msra.mxu1 %v4012_v28 }
0x1296   :  { %4020 = vmatprep.subr.bf16.mxu1 %v4158_v21  ;;  %4019 = vmatpush3.bf16.msra.mxu0 %v4018_v31 }
0x1297   :  { %4032 = vmatprep.subr.bf16.mxu0 %v4158_v21 }
0x135e   :  { %v2675_v44 = vpop.f32.mrb[36].mxu0 }
0x135f   :  { %2834 = vrot.lane.b32.xlu1 %v2675_v44, %s4168_s16  ;;  %v3891_v46 = vpop.f32.mrb[37].mxu0  ;;  %v3543_v44 = vld [vmem:[%s4946_s11 + $0x1] ss:$0 sm:$0xff] }
0x1362   :  { %v2751_v30 = vpop.f32.mrb[36].mxu1 }
0x1363   :  { %v2827_v49 = vpop.f32.mrb[38].mxu0  ;;  %2836 = vrot.lane.b32.xlu0 %v2751_v30, %s4168_s16  ;;  %v3896_v50 = vpop.f32.mrb[37].mxu1  ;;  %v3544_v30 = vld [vmem:[%s4947_s10 + $0x1] ss:$0 sm:$0xff] }
0x1364   :  { %2838 = vrot.lane.b32.xlu1 %v2827_v49, %s4168_s16  ;;  %v3901_v47 = vpop.f32.mrb[39].mxu0 }
0x13d1   :  { %v2835_v53 = vpop.permute.xlu1 %2834 }
0x13d2   :  { %v2843_v56 = vsel %vm277_vm2, %v4734_v51, %v2835_v53  ;;  %v3537_v51 = vld [vmem:[%s4944_s12 + $0x1] ss:$0 sm:$0xff] }
0x13d3   :  { %3911 = vmatmul.mubr.msk.f32.vlgmr.msra.gmra.mrb[38].mxu1 %vm112_vm0, %v2843_v56 }
0x13d4   :  { %3913 = vmatprep.mubr.msk.f32.mxu1 %vm4159_vm1, %v4160_v25 }
0x13d5   :  { %v2837_v2 = vpop.permute.xlu0 %2836 }
0x13d6   :  { %v2844_v58 = vsel %vm277_vm2, %v4736_v52, %v2837_v2  ;;  %v2839_v0 = vpop.permute.xlu1 %2838 }
0x13d7   :  { %3914 = vmatmul.mubr.msk.f32.gmra.mrb[40].mxu1 %vm112_vm0, %v2844_v58  ;;  %v2845_v59 = vsel %vm277_vm2, %v4738_v55, %v2839_v0 }
0x13d8   :  { %3916 = vmatprep.mubr.msk.f32.mxu1 %vm4159_vm1, %v4160_v25 }
0x13db   :  { %3917 = vmatmul.mubr.msk.f32.gmra.mrb[42].mxu1 %vm112_vm0, %v2845_v59 }
0x13dc   :  { %3952 = vmatprep.mubr.msk.f32.mxu1 %vm4159_vm1, %v4160_v25 }
0x14a6   :  { %v2934_v57 = vpop.f32.mrb[38].mxu1 }
0x14a7   :  { %v2935_v52 = vadd.f32 %v3537_v51, %v2934_v57  ;;  %v3912_v61 = vpop.f32.mrb[39].mxu1  ;;  %v3554_v57 = vld [vmem:[%s4948_s5 + $0x40] sm:$0xff] }
0x14a9   :  { %v4803_v62 = vadd.f32 %v2935_v52, %v4601_v38  ;;  %v3555_v52 = vld [vmem:[%s4948_s5 + $0x48] sm:$0xff] }
0x14aa   :  { %v2939_v63 = vpop.f32.mrb[40].mxu1  ;;  %v4021_v61 = vpack.c.bf16 %v3555_v52, %v3554_v57 }
0x14ab   :  { %v2940_v1 = vadd.f32 %v3537_v51, %v2939_v63  ;;  %v3915_v3 = vpop.f32.mrb[41].mxu1  ;;  %v2955_v55 = vsel %vm112_vm0, %v4803_v62, 0.0  ;;  %v3556_v63 = vld [vmem:[%s4948_s5 + $0x50] sm:$0xff] }
0x14ac   :  { %2956 = vadd.xlane.f32.xlu0 %v2955_v55  ;;  %4022 = vmatpush3.bf16.msra.mxu1 %v4021_v61  ;;  %v3558_v55 = vld [vmem:[%s4948_s5 + $0x60] sm:$0xff] }
0x14ad   :  { %v4808_v5 = vadd.f32 %v2940_v1, %v4606_v42  ;;  %4023 = vmatprep.subr.bf16.mxu1 %v4158_v21  ;;  %v3557_v1 = vld [vmem:[%s4948_s5 + $0x58] sm:$0xff] }
0x14ae   :  { %v2944_v7 = vpop.f32.mrb[42].mxu1  ;;  %v4024_v3 = vpack.c.bf16 %v3557_v1, %v3556_v63 }
0x14af   :  { %v2945_v27 = vadd.f32 %v3537_v51, %v2944_v7  ;;  %v3918_v8 = vpop.f32.mrb[43].mxu1  ;;  %v2958_v9 = vsel %vm112_vm0, %v4808_v5, 0.0  ;;  %v3559_v7 = vld [vmem:[%s4948_s5 + $0x68] sm:$0xff] }
0x14b0   :  { %2959 = vadd.xlane.f32.xlu1 %v2958_v9  ;;  %4025 = vmatpush3.bf16.msra.mxu1 %v4024_v3  ;;  %v3560_v8 = vld [vmem:[%s4948_s5 + $0x70] sm:$0xff]  ;;  %v3561_v9 = vld [vmem:[%s4948_s5 + $0x78] sm:$0xff] }
0x14b1   :  { %v4813_v38 = vadd.f32 %v2945_v27, %v4611_v43  ;;  %4026 = vmatprep.subr.bf16.mxu1 %v4158_v21  ;;  %v4027_v27 = vpack.c.bf16 %v3559_v7, %v3558_v55 }
0x14b3   :  { %v2961_v10 = vsel %vm112_vm0, %v4813_v38, 0.0 }
0x14b4   :  { %2962 = vadd.xlane.f32.xlu0 %v2961_v10  ;;  %4028 = vmatpush3.bf16.msra.mxu1 %v4027_v27  ;;  %v4030_v10 = vpack.c.bf16 %v3561_v9, %v3560_v8 }
0x14b5   :  { %4029 = vmatprep.subr.bf16.mxu1 %v4158_v21 }
0x14b8   :  { %4031 = vmatpush3.bf16.msra.mxu1 %v4030_v10 }
0x1539   :  { %v2957_v12 = vpop.xlane.xlu0 %2956 }
0x153a   :  { %v2964_v33 = vmul.f32 0.03125, %v2957_v12  ;;  %v3550_v12 = vld [vmem:[%s4949_s2 + $0x1] ss:$0 sm:$0xff] }
0x153c   :  { %v2967_v13 = vsub.f32 %v4803_v62, %v2964_v33 }
0x153d   :  { %v2960_v42 = vpop.xlane.xlu1 %2959 }
0x153e   :  { %v2965_v39 = vmul.f32 0.03125, %v2960_v42  ;;  %v2970_v54 = vmul.f32 %v2967_v13, %v2967_v13 }
0x1540   :  { %v2968_v60 = vsub.f32 %v4808_v5, %v2965_v39  ;;  %v2973_v4 = vsel %vm112_vm0, %v2970_v54, 0.0 }
0x1541   :  { %2974 = vadd.xlane.f32.xlu0 %v2973_v4  ;;  %v2963_v6 = vpop.xlane.xlu0 %2962 }
0x1542   :  { %v2966_v45 = vmul.f32 0.03125, %v2963_v6  ;;  %v2971_v43 = vmul.f32 %v2968_v60, %v2968_v60 }
0x1544   :  { %v2969_v14 = vsub.f32 %v4813_v38, %v2966_v45  ;;  %v2976_v15 = vsel %vm112_vm0, %v2971_v43, 0.0 }
0x1545   :  { %2977 = vadd.xlane.f32.xlu0 %v2976_v15 }
0x1546   :  { %v2972_v16 = vmul.f32 %v2969_v14, %v2969_v14 }
0x1548   :  { %v2979_v18 = vsel %vm112_vm0, %v2972_v16, 0.0 }
0x1549   :  { %2980 = vadd.xlane.f32.xlu1 %v2979_v18 }
0x15ce   :  { %v2975_v32 = vpop.xlane.xlu0 %2974 }
0x15cf   :  { %v2982_v41 = vmul.f32 0.03125, %v2975_v32 }
0x15d1   :  { %v2985_v48 = vadd.f32 1e-05, %v2982_v41 }
0x15d2   :  { %v2978_v34 = vpop.xlane.xlu0 %2977 }
0x15d3   :  { %4129 = vrsqrt.f32 %v2985_v48  ;;  %v2983_v35 = vmul.f32 0.03125, %v2978_v34 }
0x15d5   :  { %v2986_v36 = vadd.f32 1e-05, %v2983_v35 }
0x15d6   :  { %v2981_v37 = vpop.xlane.xlu1 %2980 }
0x15d7   :  { %4131 = vrsqrt.f32 %v2986_v36  ;;  %v2984_v40 = vmul.f32 0.03125, %v2981_v37 }
0x15d9   :  { %v2987_v24 = vadd.f32 1e-05, %v2984_v40 }
0x15db   :  { %4133 = vrsqrt.f32 %v2987_v24 }
0x15dd   :  { %v4130_v28 = vpop.eup %4129 }
0x15de   :  { %v2991_v46 = vmul.f32 %v4130_v28, %v2967_v13 }
0x15e0   :  { %v3000_v49 = vmul.f32 %v3543_v44, %v2991_v46 }
0x15e1   :  { %v4132_v50 = vpop.eup %4131 }
0x15e2   :  { %v3009_v47 = vadd.f32 %v3544_v30, %v3000_v49  ;;  %v2992_v53 = vmul.f32 %v4132_v50, %v2968_v60 }
0x15e4   :  { %3928 = vmatmul.mubr.msk.f32.vlgmr.msra.gmra.mrb[40].mxu0 %vm112_vm0, %v3009_v47  ;;  %v3001_v56 = vmul.f32 %v3543_v44, %v2992_v53 }
0x15e5   :  { %v4134_v2 = vpop.eup %4133  ;;  %3930 = vmatprep.mubr.msk.f32.mxu0 %vm4159_vm1, %v4160_v25 }
0x15e6   :  { %v3010_v58 = vadd.f32 %v3544_v30, %v3001_v56  ;;  %v2993_v0 = vmul.f32 %v4134_v2, %v2969_v14 }
0x15e8   :  { %3931 = vmatmul.mubr.msk.f32.gmra.mrb[42].mxu0 %vm112_vm0, %v3010_v58  ;;  %v3002_v59 = vmul.f32 %v3543_v44, %v2993_v0  ;;  %v3563_v44 = vld [vmem:[%s4950_s4 + $0x1] ss:$0 sm:$0xff] }
0x15e9   :  { %3933 = vmatprep.mubr.msk.f32.mxu0 %vm4159_vm1, %v4160_v25 }
0x15ea   :  { %v3011_v51 = vadd.f32 %v3544_v30, %v3002_v59 }
0x15ec   :  { %3934 = vmatmul.mubr.msk.f32.gmra.mrb[44].mxu0 %vm112_vm0, %v3011_v51 }
0x15ed   :  { %3969 = vmatprep.mubr.msk.f32.mxu0 %vm4159_vm1, %v4160_v25 }
0x16b7   :  { %v3100_v33 = vpop.f32.mrb[40].mxu0 }
0x16b8   :  { %v3101_v13 = vadd.f32 %v3550_v12, %v3100_v33  ;;  %v3929_v42 = vpop.f32.mrb[41].mxu0 }
0x16ba   :  { %v3114_v39 = vmul.f32 1.702, %v3101_v13 }
0x16bb   :  { %v3105_v54 = vpop.f32.mrb[42].mxu0 }
0x16bc   :  { %v3117_v60 = vsub.f32 0.0, %v3114_v39  ;;  %v3106_v4 = vadd.f32 %v3550_v12, %v3105_v54  ;;  %v3932_v6 = vpop.f32.mrb[43].mxu0 }
0x16be   :  { %v3120_v45 = vmul.f32 1.442695, %v3117_v60  ;;  %v3115_v43 = vmul.f32 1.702, %v3106_v4 }
0x16bf   :  { %v3110_v14 = vpop.f32.mrb[44].mxu0 }
0x16c0   :  { %4135 = vpow2.f32 %v3120_v45  ;;  %v3118_v15 = vsub.f32 0.0, %v3115_v43  ;;  %v3111_v16 = vadd.f32 %v3550_v12, %v3110_v14  ;;  %v3935_v18 = vpop.f32.mrb[45].mxu0  ;;  %v3331_v14 = vsub.s32 2, %v4366_v11 }
0x16c2   :  { %v3122_v20 = vmul.f32 1.442695, %v3118_v15  ;;  %v3116_v22 = vmul.f32 1.702, %v3111_v16 }
0x16c4   :  { %4137 = vpow2.f32 %v3122_v20  ;;  %v3119_v23 = vsub.f32 0.0, %v3116_v22  ;;  %v3360_v20 = vld [vmem:[%s4951_s14] sm:$0xff] }
0x16c6   :  { %v3124_v26 = vmul.f32 1.442695, %v3119_v23 }
0x16c8   :  { %4139 = vpow2.f32 %v3124_v26 }
0x16ca   :  { %v4136_v29 = vpop.eup %4135 }
0x16cb   :  { %v3126_v31 = vadd.f32 1.0, %v4136_v29 }
0x16cd   :  { %4141 = vrcp.f32 %v3126_v31 }
0x16ce   :  { %v4138_v32 = vpop.eup %4137 }
0x16cf   :  { %v3127_v41 = vadd.f32 1.0, %v4138_v32 }
0x16d1   :  { %4143 = vrcp.f32 %v3127_v41 }
0x16d2   :  { %v4140_v48 = vpop.eup %4139 }
0x16d3   :  { %v3128_v34 = vadd.f32 1.0, %v4140_v48 }
0x16d5   :  { %4145 = vrcp.f32 %v3128_v34 }
0x16d7   :  { %v4142_v35 = vpop.eup %4141 }
0x16d8   :  { %v3135_v36 = vmul.f32 %v4142_v35, %v3101_v13 }
0x16da   :  { %3953 = vmatmul.mubr.msk.f32.vlgmr.msra.gmra.mrb[44].mxu1 %vm1582_vm5, %v3135_v36  ;;  %v3567_v36 = vld [vmem:[%s4952_s7] ss:$0 sm:$0xff] }
0x16db   :  { %v4144_v37 = vpop.eup %4143  ;;  %3955 = vmatprep.mubr.msk.f32.mxu1 %vm4159_vm1, %v4160_v25 }
0x16dc   :  { %v3136_v40 = vmul.f32 %v4144_v37, %v3106_v4 }
0x16de   :  { %3956 = vmatmul.mubr.msk.f32.gmra.mrb[46].mxu1 %vm1582_vm5, %v3136_v40  ;;  %v3568_v40 = vld [vmem:[%s4953_s6] ss:$0 sm:$0xff] }
0x16df   :  { %v4146_v24 = vpop.eup %4145  ;;  %3958 = vmatprep.mubr.msk.f32.mxu1 %vm4159_vm1, %v4160_v25 }
0x16e0   :  { %v3137_v28 = vmul.f32 %v4146_v24, %v3111_v16  ;;  %v3324_v16 = vsub.s32 1, %v4366_v11  ;;  %v3363_v11 = vld [vmem:[%s4951_s14 + $0x18] sm:$0xff] }
0x16e2   :  { %3959 = vmatmul.mubr.msk.f32.gmra.mrb[48].mxu1 %vm1582_vm5, %v3137_v28 }
0x17ad   :  { %v3230_v46 = vpop.f32.mrb[44].mxu1 }
0x17ae   :  { %v3231_v30 = vadd.f32 %v3563_v44, %v3230_v46  ;;  %v3954_v49 = vpop.f32.mrb[45].mxu1 }
0x17b0   :  { %v3244_v50 = vadd.f32 %v3231_v30, %v4803_v62  ;;  %v4157_v62 = vld [vmem:[%s4942_s1] sm:$0x7] }
0x17b1   :  { %v3235_v47 = vpop.f32.mrb[46].mxu1  ;;  %v3307_v61 = vsel %vm3306_vm6, %v4157_v62, 0.0 }
0x17b2   :  { %v3236_v53 = vadd.f32 %v3563_v44, %v3235_v47  ;;  %v3957_v56 = vpop.f32.mrb[47].mxu1  ;;  %v3249_v2 = vsel %vm112_vm0, %v3244_v50, 0.0 }
0x17b3   :  { %3250 = vadd.xlane.f32.xlu0 %v3249_v2 }
0x17b4   :  { %v3245_v58 = vadd.f32 %v3236_v53, %v4808_v5 }
0x17b5   :  { %v3240_v0 = vpop.f32.mrb[48].mxu1 }
0x17b6   :  { %v3241_v59 = vadd.f32 %v3563_v44, %v3240_v0  ;;  %v3960_v51 = vpop.f32.mrb[49].mxu1  ;;  %v3252_v57 = vsel %vm112_vm0, %v3245_v58, 0.0 }
0x17b7   :  { %3253 = vadd.xlane.f32.xlu1 %v3252_v57 }
0x17b8   :  { %v3246_v52 = vadd.f32 %v3241_v59, %v4813_v38 }
0x17ba   :  { %v3255_v63 = vsel %vm112_vm0, %v3246_v52, 0.0 }
0x17bb   :  { %3256 = vadd.xlane.f32.xlu0 %v3255_v63  ;;  %3308 = vadd.xlane.f32.xlu1 %v3307_v61 }
0x1840   :  { %v3251_v1 = vpop.xlane.xlu0 %3250 }
0x1841   :  { %v3258_v5 = vmul.f32 0.03125, %v3251_v1 }
0x1843   :  { %v3261_v3 = vsub.f32 %v3244_v50, %v3258_v5 }
0x1844   :  { %v3254_v55 = vpop.xlane.xlu1 %3253 }
0x1845   :  { %v3259_v7 = vmul.f32 0.03125, %v3254_v55  ;;  %v3264_v27 = vmul.f32 %v3261_v3, %v3261_v3 }
0x1847   :  { %v3262_v8 = vsub.f32 %v3245_v58, %v3259_v7  ;;  %v3267_v9 = vsel %vm112_vm0, %v3264_v27, 0.0 }
0x1848   :  { %3268 = vadd.xlane.f32.xlu0 %v3267_v9  ;;  %v3257_v38 = vpop.xlane.xlu0 %3256  ;;  %v3309_v10 = vpop.xlane.xlu1 %3308 }
0x1849   :  { %v3260_v12 = vmul.f32 0.03125, %v3257_v38  ;;  %v3265_v33 = vmul.f32 %v3262_v8, %v3262_v8  ;;  %v3569_v13 = vadd.f32 -1.0, %v3309_v10 }
0x184b   :  { %v3263_v42 = vsub.f32 %v3246_v52, %v3260_v12  ;;  %v3270_v39 = vsel %vm112_vm0, %v3265_v33, 0.0  ;;  %v4038_v54 = vtrunc.f32 %v3569_v13 }
0x184c   :  { %3271 = vadd.xlane.f32.xlu1 %v3270_v39 }
0x184d   :  { %v3266_v60 = vmul.f32 %v3263_v42, %v3263_v42  ;;  %v4039_v6 = vcvt.f32.s32 %v4038_v54 }
0x184f   :  { %v3273_v4 = vsel %vm112_vm0, %v3266_v60, 0.0  ;;  %vm3312_vm7 = vcmp.eq.s32.totalorder %v4369_v17, %v4039_v6  ;;  %v3361_v17 = vld [vmem:[%s4951_s14 + $0x8] sm:$0xff] }
0x1850   :  { %3274 = vadd.xlane.f32.xlu0 %v3273_v4  ;;  %v3570_v45 = vsel %vm3312_vm7, 1.0, %v4160_v25  ;;  %v4033_v25 = vpack.c.bf16 %v3361_v17, %v3360_v20 }
0x1851   :  { %v3318_v43 = vrot.slane %v3570_v45, %v4372_v19  ;;  %v3332_v15 = vrot.slane %v3570_v45, %v3331_v14  ;;  %v3325_v18 = vrot.slane %v3570_v45, %v3324_v16  ;;  %v3362_v19 = vld [vmem:[%s4951_s14 + $0x10] sm:$0xff] }
0x1852   :  { %4034 = vmatpush3.bf16.msra.mxu0 %v4033_v25  ;;  %v4036_v22 = vpack.c.bf16 %v3363_v11, %v3362_v19 }
0x1853   :  { %4035 = vmatprep.subr.bf16.mxu0 %v4158_v21 }
0x1856   :  { %4037 = vmatpush3.bf16.msra.mxu0 %v4036_v22 }
0x185d   :  { %3320 = vbcast.lane.b32.xlu1 %v3318_v43, 256 }
0x1861   :  { %3334 = vbcast.lane.b32.xlu1 %v3332_v15, 256 }
0x1866   :  { %3327 = vbcast.lane.b32.xlu0 %v3325_v18, 256 }
0x18d5   :  { %v3269_v23 = vpop.xlane.xlu0 %3268 }
0x18d6   :  { %v3276_v26 = vmul.f32 0.03125, %v3269_v23 }
0x18d8   :  { %v3279_v29 = vadd.f32 1e-05, %v3276_v26 }
0x18d9   :  { %v3272_v31 = vpop.xlane.xlu1 %3271 }
0x18da   :  { %4147 = vrsqrt.f32 %v3279_v29  ;;  %v3277_v32 = vmul.f32 0.03125, %v3272_v31 }
0x18dc   :  { %v3280_v41 = vadd.f32 1e-05, %v3277_v32 }
0x18dd   :  { %v3275_v48 = vpop.xlane.xlu0 %3274  ;;  %v3321_v44 = vpop.permute.xlu1 %3320 }
0x18de   :  { %4149 = vrsqrt.f32 %v3280_v41  ;;  %v3278_v21 = vmul.f32 0.03125, %v3275_v48 }
0x18e0   :  { %v3281_v34 = vadd.f32 1e-05, %v3278_v21 }
0x18e1   :  { %v3328_v53 = vpop.permute.xlu0 %3327  ;;  %v3335_v63 = vpop.permute.xlu1 %3334 }
0x18e2   :  { %4151 = vrsqrt.f32 %v3281_v34 }
0x18e4   :  { %v4148_v35 = vpop.eup %4147 }
0x18e5   :  { %v3285_v37 = vmul.f32 %v4148_v35, %v3261_v3 }
0x18e7   :  { %v3294_v24 = vmul.f32 %v3567_v36, %v3285_v37 }
0x18e8   :  { %v4150_v28 = vpop.eup %4149 }
0x18e9   :  { %v3303_v46 = vadd.f32 %v3568_v40, %v3294_v24  ;;  %v3286_v30 = vmul.f32 %v4150_v28, %v3262_v8 }
0x18eb   :  { %v3336_v49 = vmul.f32 %v3321_v44, %v3303_v46  ;;  %v3295_v50 = vmul.f32 %v3567_v36, %v3286_v30 }
0x18ec   :  { %v4152_v47 = vpop.eup %4151 }
0x18ed   :  { %v3339_v56 = vsel %vm112_vm0, %v3336_v49, 0.0  ;;  %v3304_v2 = vadd.f32 %v3568_v40, %v3295_v50  ;;  %v3287_v58 = vmul.f32 %v4152_v47, %v3263_v42 }
0x18ee   :  { %v3340_v0 = vrot.slane %v3339_v56, 4 }
0x18ef   :  { %v3337_v59 = vmul.f32 %v3328_v53, %v3304_v2  ;;  %v3296_v51 = vmul.f32 %v3567_v36, %v3287_v58 }
0x18f0   :  { %v3341_v57 = vadd.f32 %v3340_v0, %v3339_v56 }
0x18f1   :  { %v3346_v52 = vsel %vm112_vm0, %v3337_v59, 0.0  ;;  %v3305_v62 = vadd.f32 %v3568_v40, %v3296_v51 }
0x18f2   :  { %v3347_v61 = vrot.slane %v3346_v52, 4  ;;  %v3342_v1 = vrot.slane %v3341_v57, 2 }
0x18f3   :  { %v3338_v5 = vmul.f32 %v3335_v63, %v3305_v62 }
0x18f4   :  { %v3348_v3 = vadd.f32 %v3347_v61, %v3346_v52  ;;  %v3343_v8 = vadd.f32 %v3342_v1, %v3341_v57 }
0x18f5   :  { %v3353_v55 = vsel %vm112_vm0, %v3338_v5, 0.0 }
0x18f6   :  { %v3349_v7 = vrot.slane %v3348_v3, 2  ;;  %v3354_v27 = vrot.slane %v3353_v55, 4  ;;  %v3344_v33 = vrot.slane %v3343_v8, 1 }
0x18f8   :  { %v3350_v9 = vadd.f32 %v3349_v7, %v3348_v3  ;;  %v3355_v38 = vadd.f32 %v3354_v27, %v3353_v55  ;;  %v3345_v54 = vadd.f32 %v3344_v33, %v3343_v8 }
0x18fa   :  { %v3351_v10 = vrot.slane %v3350_v9, 1  ;;  %v3356_v12 = vrot.slane %v3355_v38, 2 }
0x18fc   :  { %v3357_v13 = vadd.f32 %v3356_v12, %v3355_v38  ;;  %v3352_v42 = vadd.f32 %v3351_v10, %v3350_v9 }
0x18fe   :  { %v3358_v39 = vrot.slane %v3357_v13, 1  ;;  %v3368_v4 = vsel %vm3367_vm8, %v3352_v42, %v3345_v54 }
0x1900   :  { %v3359_v60 = vadd.f32 %v3358_v39, %v3357_v13 }
0x1902   :  { %v3370_v6 = vsel %vm3369_vm9, %v3359_v60, %v3368_v4 }
0x1903   :  { %3970 = vmatmul.mubr.msk.f32.vlgmr.msra.gmra.mrb[46].mxu0 %vm112_vm0, %v3370_v6 }
0x19d6   :  { %v3439_v45 = vpop.f32.mrb[46].mxu0 }
0x19d7   :  { %v3443_v43 = vmul.f32 %v3439_v45, %v3439_v45  ;;  %v3971_v14 = vpop.f32.mrb[47].mxu0 }
0x19d9   :  { %v3445_v15 = vsel %vm3444_vm10, %v3443_v43, 0.0 }
0x19da   :  { %3446 = vadd.xlane.f32.xlu1 %v3445_v15 }
0x1a67   :  { %v3447_v16 = vpop.xlane.xlu1 %3446 }
0x1a68   :  { %4153 = vrsqrt.f32 %v3447_v16  ;;  %vm3450_vm11 = vcmp.eq.f32.partialorder %v3447_v16, inf  ;;  %v3453_v17 = vand.u32 2147483648, %v3447_v16  ;;  %vm3452_vm12 = vcmp.eq.f32.partialorder %v3447_v16, 0.0 }
0x1a72   :  { %v4154_v18 = vpop.eup %4153 }
0x1a73   :  { %v3449_v20 = vmul.f32 %v4154_v18, %v3447_v16 }
0x1a75   :  { %v3451_v25 = vsel %vm3450_vm11, %v3447_v16, %v3449_v20 }
0x1a76   :  { %v3454_v19 = vsel %vm3452_vm12, %v3453_v17, %v3451_v25 }
0x1a77   :  { %v3455_v11 = vadd.f32 1e-06, %v3454_v19 }
0x1a79   :  { %4155 = vrcp.f32 %v3455_v11 }
0x1a83   :  { %v4156_v22 = vpop.eup %4155 }
0x1a84   :  { %v3457_v23 = vmul.f32 %v4156_v22, %v3439_v45 }
0x1a86   :  { %3458 = vst.msk [vmem:[%s4954_s17] sm:$0x7] %vm3444_vm10, %v3457_v23 }

// kernel: owlvit_forward.3
= control target key start
LH: loop header
LB: loop body
LE: loop exit
PB: predicated region body
PF: predicated region fallthrough
CT: control target
= control target key end

     0   :  { %s5141_s6 = smov 1   ;;  %s5142_s10 = smov 2   ;;  %s6000_s0 = inlined_call_operand.smem [shape: u32[31], index: -1, kind: input, shape index: {}] }
   0x1   :  { %s5194_s5 = sld [smem:[%s6000_s0]]   ;;  %s5143_s14 = smov 3  }
   0x2   :  { %s5199_s9 = sld [smem:[%s6000_s0 + %s5141_s6]]   ;;  %s5144_s18 = smov 4  }
   0x3   :  { %s5204_s13 = sld [smem:[%s6000_s0 + %s5142_s10]]   ;;  %s5145_s22 = smov 5  }
   0x4   :  { %s5209_s17 = sld [smem:[%s6000_s0 + %s5143_s14]]   ;;  %s5146_s26 = smov 6  }
   0x5   :  { %s5214_s21 = sld [smem:[%s6000_s0 + %s5144_s18]]   ;;  %s5147_s30 = smov 7  }
   0x6   :  { %s5219_s25 = sld [smem:[%s6000_s0 + %s5145_s22]]   ;;  %s5148_s4 = smov 8  }
   0x7   :  { %s5224_s29 = sld [smem:[%s6000_s0 + %s5146_s26]]   ;;  %s5149_s10 = smov 9  }
   0x8   :  { %6008 = sst [smem:[#allocation8_spill]] %s5199_s9  ;;  %s5150_s15 = smov 10  }
   0x9   :  { %6009 = sst [smem:[#allocation9_spill]] %s5204_s13  ;;  %s5151_s20 = smov 11  }
   0xa   :  { %6010 = sst [smem:[#allocation10_spill]] %s5209_s17  ;;  %s5152_s26 = smov 12  }
   0xb   :  { %6011 = sst [smem:[#allocation11_spill]] %s5214_s21  ;;  %s5153_s1 = smov 13  }
   0xc   :  { %6012 = sst [smem:[#allocation12_spill]] %s5219_s25  ;;  %s5154_s7 = smov 14  }
   0xd   :  { %6013 = sst [smem:[#allocation13_spill]] %s5224_s29  ;;  %s5156_s22 = smov 16  }
   0xe   :  { %s5229_s3 = sld [smem:[%s6000_s0 + %s5147_s30]]   ;;  %s5157_s28 = smov 17  }
   0xf   :  { %s5234_s8 = sld [smem:[%s6000_s0 + %s5148_s4]]  }
  0x10   :  { %s5239_s14 = sld [smem:[%s6000_s0 + %s5149_s10]]  }
  0x11   :  { %s5244_s19 = sld [smem:[%s6000_s0 + %s5150_s15]]   ;;  %s5155_s15 = smov 15  }
  0x12   :  { %s5249_s24 = sld [smem:[%s6000_s0 + %s5151_s20]]  }
  0x13   :  { %s5254_s30 = sld [smem:[%s6000_s0 + %s5152_s26]]  }
  0x14   :  { %s5259_s6 = sld [smem:[%s6000_s0 + %s5153_s1]]  }
  0x15   :  { %s5264_s12 = sld [smem:[%s6000_s0 + %s5154_s7]]   ;;  %s5158_s7 = smov 18  }
  0x16   :  { %s5269_s20 = sld [smem:[%s6000_s0 + %s5155_s15]]   ;;  %s5159_s15 = smov 19  }
  0x17   :  { %6014 = sst [smem:[#allocation14_spill]] %s5244_s19 }
  0x18   :  { %s5274_s27 = sld [smem:[%s6000_s0 + %s5156_s22]]   ;;  %s5160_s22 = smov 20  }
  0x19   :  { %6015 = sst [smem:[#allocation15_spill]] %s5254_s30 }
  0x1a   :  { %6016 = sst [smem:[#allocation16_spill]] %s5259_s6 }
  0x1b   :  { %s5279_s4 = sld [smem:[%s6000_s0 + %s5157_s28]]   ;;  %s5161_s28 = smov 21  }
  0x1c   :  { %s5284_s29 = sld [smem:[%s6000_s0 + %s5158_s7]]   ;;  %s5162_s7 = smov 22  }
  0x1d   :  { %s5289_s21 = sld [smem:[%s6000_s0 + %s5159_s15]]   ;;  %s5163_s15 = smov 23  }
  0x1e   :  { %s5294_s13 = sld [smem:[%s6000_s0 + %s5160_s22]]   ;;  %s5164_s22 = smov 24  }
  0x1f   :  { %s5299_s25 = sld [smem:[%s6000_s0 + %s5161_s28]]   ;;  %s5165_s28 = smov 25  }
  0x20   :  { %s5304_s9 = sld [smem:[%s6000_s0 + %s5162_s7]]   ;;  %s5166_s7 = smov 26  }
  0x21   :  { %s5309_s30 = sld [smem:[%s6000_s0 + %s5163_s15]]   ;;  %s5167_s15 = smov 27  }
  0x22   :  { %6017 = sst [smem:[#allocation17_spill]] %s5284_s29 }
  0x23   :  { %6018 = sst [smem:[#allocation18_spill]] %s5289_s21 }
  0x24   :  { %s5314_s17 = sld [smem:[%s6000_s0 + %s5164_s22]]   ;;  %s5168_s22 = smov 28  }
  0x25   :  { %s5319_s29 = sld [smem:[%s6000_s0 + %s5165_s28]]   ;;  %s5169_s28 = smov 29  }
  0x26   :  { %s5324_s21 = sld [smem:[%s6000_s0 + %s5166_s7]]   ;;  %s5170_s7 = smov 30  }
  0x27   :  { %s5329_s6 = sld [smem:[%s6000_s0 + %s5167_s15]]  }
  0x28   :  { %s5344_s19 = sld [smem:[%s6000_s0 + %s5170_s7]]  }
  0x2a   :  { %6019 = sst [smem:[#allocation19_spill]] %s5314_s17 }
  0x2b   :  { %6020 = sst [smem:[#allocation20_spill]] %s5319_s29 }
  0x2c   :  { %s5334_s17 = sld [smem:[%s6000_s0 + %s5168_s22]]  }
  0x2d   :  { %s5339_s29 = sld [smem:[%s6000_s0 + %s5169_s28]]  }
  0x2e   :  { %66 = vsyncpa [#allocation3], 0 }
  0x2f   :  { %67 = vsyncpa [#allocation5], 0  ;;  %s5346_s15 = smov 0  }
  0x30 LB: > { %s5352_s16 = sadd.s32 4294967295, %s5139_s15   ;;  %p4067_p0 = scmp.ge.s32.totalorder %s5139_s15, 1  ;;  %s5139_s15 = sphi %s5346_s15, %s73_s15  }
  0x31   : > { %p739_p1 = scmp.lt.s32.totalorder %s5139_s15, 3  ;;  %p6006_p2 = scmp.eq.s32.totalorder %s5352_s16, 0 }
  0x32   : > { %s5171_s18 = smov [#allocation2]   ;;  %s5172_s23 = smov [#allocation4]  }
  0x33   : > { %p5357_p3 = pnand %p4067_p0, %p739_p1  ;;  %s827_s22 = sshll.u32 %s5171_s18, 4  ;;  %s828_s22 = int_to_ptr.vmem [resolvable:$true] %s827_s22 }
  0x34   : > { %s838_s26 = sshll.u32 %s5172_s23, 4  ;;  %s5069_s1 = scalar_lea.hbm %s5324_s21, 16  ;;  %s5369_s26 = int_to_ptr.vmem [resolvable:$true] %s838_s26 }
  0x35   : > { %s6021_s0 = scalar_select %p5357_p3, 1, 0 }
  0x36   : > { %p4811_p4 = pneg %p5357_p3  ;;  %p5070_p6 = scmp.ne.s32.totalorder %s5324_s21, %s5069_s1 }
  0x37   : > { %p5076_p10 = scmp.lt.u32.totalorder %s5069_s1, %s5324_s21 }
  0x38   : > { %p5365_p5 = pnand %p6006_p2, %p4811_p4 }
  0x3a   : > { %p5071_p7 = pneg %p5365_p5 }
  0x3c   : > { %p5072_p8 = pnand %p5071_p7, %p5070_p6 }
  0x3e   : > { %p5073_p9 = pneg %p5072_p8 }
  0x40   : > { %p5078_p11 = pnand %p5076_p10, %p5073_p9 }
  0x42   : > { %5081 = shalt.err (!%p5078_p11)
}
  0x43   : > { %s5082_s2 = scalar_lea.vmem %s828_s22, 16  ;;  %s5089_s7 = scalar_lea.vmem %s828_s22, 32 }
  0x44   : > { %p5083_p12 = scmp.ne.s32.totalorder %s828_s22, %s5082_s2  ;;  %p5090_p1 = scmp.lt.s32.totalorder %s828_s22, %s828_s22 }
  0x45   : > { %p5091_p4 = scmp.lt.s32.totalorder %s5089_s7, %s5082_s2 }
  0x46   : > { %p5085_p13 = pnand %p5083_p12, %p5071_p7 }
  0x47   : > { %p5092_p2 = por %p5091_p4, %p5090_p1 }
  0x48   : > { %p5086_p0 = pneg %p5085_p13 }
  0x4a   : > { %p5093_p3 = pnand %p5092_p2, %p5086_p0 }
  0x4c   : > { %5096 = shalt.err (!%p5093_p3)
}
  0x4d   : > { %4814 = dma.hbm_to_vmem [thread:$0]  (!%p5365_p5), %s5324_s21, 16, %s828_s22, [#allocation3]  }
  0x4e   : > { %s5097_s10 = scalar_lea.hbm %s5329_s6, 16 }
  0x4f   : > { %p5098_p6 = scmp.ne.s32.totalorder %s5329_s6, %s5097_s10  ;;  %p5104_p10 = scmp.lt.u32.totalorder %s5097_s10, %s5329_s6 }
  0x51   : > { %p5100_p8 = pnand %p5098_p6, %p5071_p7 }
  0x53   : > { %p5101_p9 = pneg %p5100_p8 }
  0x55   : > { %p5106_p11 = pnand %p5104_p10, %p5101_p9 }
  0x57   : > { %5109 = shalt.err (!%p5106_p11)
}
  0x58   : > { %s5110_s11 = scalar_lea.vmem %s5369_s26, 16  ;;  %s5117_s18 = scalar_lea.vmem %s5369_s26, 32 }
  0x59   : > { %p5111_p2 = scmp.ne.s32.totalorder %s5369_s26, %s5110_s11  ;;  %p5118_p13 = scmp.lt.s32.totalorder %s5369_s26, %s5369_s26 }
  0x5a   : > { %p5119_p0 = scmp.lt.s32.totalorder %s5117_s18, %s5110_s11 }
  0x5b   : > { %p5113_p3 = pnand %p5111_p2, %p5071_p7 }
  0x5c   : > { %p5120_p1 = por %p5119_p0, %p5118_p13 }
  0x5d   : > { %p5114_p12 = pneg %p5113_p3 }
  0x5f   : > { %p5121_p4 = pnand %p5120_p1, %p5114_p12 }
  0x61   : > { %5124 = shalt.err (!%p5121_p4)
}
  0x62   : > { %4817 = dma.hbm_to_vmem [thread:$0]  (!%p5365_p5), %s5329_s6, 16, %s5369_s26, [#allocation5]  }
  0x63   : > { %p6023_p6 = scmp.ne.s32.totalorder %s6021_s0, 0 }
  0x64   : > { %p6024_p8 = scmp.eq.s32.totalorder (!%p6023_p6), %s5352_s16, 0 }
  0x65   : > { %865 = sbr.rel (%p6023_p6) target bundleno = 8161 (0x1fe1), region = 140 }
  0x6c   : > { %5130 = dma.done.wait (%p6024_p8), [#allocation3], 16   ;;  %p6025_p7 = pmov %p6024_p8 }
  0x6e   : > { %5132 = vsyncadd (%p6025_p7), [#allocation3], 4294967280  ;;  %p6026_p9 = pmov %p6025_p7 }
  0x6f   : > { %p6027_p10 = pmov %p6025_p7 }
  0x70   : > { %5134 = dma.done.wait (%p6026_p9), [#allocation5], 16  }
  0x71   : > { %5136 = vsyncadd (%p6027_p10), [#allocation5], 4294967280  ;;  %v5173_v0 = vmov 0.0|0.0   ;;  %p947_p5 = scmp.lt.s32.totalorder %s5352_s16, 1  ;;  %v961_v1 = vld [vmem:[%s5304_s9] sm:$0xff]  ;;  %v962_v2 = vld [vmem:[%s5304_s9 + $0x8] sm:$0xff] }
  0x72   : > { %4655 = vmatprep.subr.bf16.mxu0 %v5173_v0  ;;  %4691 = vmatprep.subr.bf16.mxu1 %v5173_v0  ;;  %v963_v3 = vld [vmem:[%s5304_s9 + $0x10] sm:$0xff]  ;;  %v4656_v4 = vpack.c.bf16 %v962_v2, %v961_v1  ;;  %v964_v5 = vld [vmem:[%s5304_s9 + $0x18] sm:$0xff]  ;;  %v965_v7 = vld [vmem:[%s5304_s9 + $0x20] sm:$0xff]  ;;  %vm988_vm0 = vcmask 523264   ;;  %vm1072_vm1 = vcmask 1040384   ;;  %vm1082_vm2 = vcmask 261120  }
  0x73   : > { %s6044_s16 = smov (!%p947_p5, %s5352_s16), 1  ;;  %v4659_v6 = vpack.c.bf16 %v964_v5, %v963_v3  ;;  %v966_v8 = vld [vmem:[%s5304_s9 + $0x28] sm:$0xff]  ;;  %v967_v10 = vld [vmem:[%s5304_s9 + $0x30] sm:$0xff]  ;;  %v968_v11 = vld [vmem:[%s5304_s9 + $0x38] sm:$0xff]  ;;  %vm1089_vm3 = vcmask 253952   ;;  %vm5174_vm4 = vmmov 0  }
  0x74   : > { %s4210_s0 = sshll.u32 %s6044_s16, 5  ;;  %4657 = vmatpush1.bf16.msra.mxu0 %v4656_v4  ;;  %v4662_v9 = vpack.c.bf16 %v966_v8, %v965_v7  ;;  %v4665_v13 = vpack.c.bf16 %v968_v11, %v967_v10  ;;  %v969_v14 = vld [vmem:[%s5304_s9 + $0x40] sm:$0xff]  ;;  %v970_v15 = vld [vmem:[%s5304_s9 + $0x48] sm:$0xff]  ;;  %v971_v17 = vld [vmem:[%s5304_s9 + $0x50] sm:$0xff]  ;;  %s5176_s23 = smov 96   ;;  %vm1313_vm5 = vcmask 130048  }
  0x75   : > { %4658 = vmatprep.subr.bf16.mxu0 %v5173_v0  ;;  %s5428_s22 = scalar_lea.vmem %s5194_s5, %s4210_s0  ;;  %v4668_v16 = vpack.c.bf16 %v970_v15, %v969_v14  ;;  %v972_v18 = vld [vmem:[%s5304_s9 + $0x58] sm:$0xff]  ;;  %v973_v20 = vld [vmem:[%s5304_s9 + $0x60] sm:$0xff]  ;;  %v974_v21 = vld [vmem:[%s5304_s9 + $0x68] sm:$0xff]  ;;  %vm1409_vm7 = vcmask 138240   ;;  %vm1416_vm8 = vcmask 131072   ;;  %s5177_s26 = smov 64  }
  0x76   : > { %v958_v12 = vld [vmem:[%s5428_s22 + $0x8] sm:$0xff]  ;;  %v4671_v19 = vpack.c.bf16 %v972_v18, %v971_v17  ;;  %v4674_v22 = vpack.c.bf16 %v974_v21, %v973_v20  ;;  %v975_v23 = vld [vmem:[%s5304_s9 + $0x70] sm:$0xff]  ;;  %v976_v24 = vld [vmem:[%s5304_s9 + $0x78] sm:$0xff]  ;;  %s5178_s28 = smov 80   ;;  %s5179_s1 = smov 112   ;;  %vm3309_vm9 = vcmask 261121  }
  0x77   : > { %4078 = vmatprep.mubr.msk.f32.mxu0 %vm988_vm0, %v958_v12  ;;  %v4677_v25 = vpack.c.bf16 %v976_v24, %v975_v23  ;;  %v977_v26 = vld [vmem:[%s5304_s9 + $0x80] sm:$0xff]  ;;  %v978_v27 = vld [vmem:[%s5304_s9 + $0x88] sm:$0xff]  ;;  %v979_v29 = vld [vmem:[%s5304_s9 + $0x90] sm:$0xff]  ;;  %s5180_s2 = smov 48   ;;  %s5181_s7 = smov 16   ;;  %vm3381_vm10 = vcmask 1046528  }
  0x78   : > { %4660 = vmatpush1.bf16.msra.mxu0 %v4659_v6  ;;  %v4680_v28 = vpack.c.bf16 %v978_v27, %v977_v26  ;;  %v980_v30 = vld [vmem:[%s5304_s9 + $0x98] sm:$0xff]  ;;  %v981_v32 = vld [vmem:[%s5304_s9 + $0xa0] sm:$0xff]  ;;  %v982_v33 = vld [vmem:[%s5304_s9 + $0xa8] sm:$0xff]  ;;  %s6030_s10 = sld [smem:[#allocation14_spill]]  ;;  %s6031_s11 = sld [smem:[#allocation20_spill]] }
  0x79   : > { %4661 = vmatprep.subr.bf16.mxu0 %v5173_v0  ;;  %v4683_v31 = vpack.c.bf16 %v980_v30, %v979_v29  ;;  %v4686_v34 = vpack.c.bf16 %v982_v33, %v981_v32  ;;  %v983_v35 = vld [vmem:[%s5304_s9 + $0xb0] sm:$0xff]  ;;  %v984_v36 = vld [vmem:[%s5304_s9 + $0xb8] sm:$0xff]  ;;  %v957_v38 = vld [vmem:[%s5428_s22] sm:$0xff]  ;;  %s6032_s18 = sld [smem:[#allocation19_spill]]  ;;  %s6033_s0 = sld [smem:[#allocation16_spill]] }
  0x7a   : > { %v4689_v37 = vpack.c.bf16 %v984_v36, %v983_v35  ;;  %v960_v39 = vld [vmem:[%s5428_s22 + $0x18] sm:$0xff]  ;;  %v959_v40 = vld [vmem:[%s5428_s22 + $0x10] sm:$0xff]  ;;  %v986_v41 = vld [vmem:[%s5309_s30] sm:$0xff]  ;;  %s6034_s22 = sld [smem:[#allocation18_spill]] }
  0x7b   : > { %v987_v45 = vld [vmem:[%s5309_s30 + $0x8] sm:$0xff]  ;;  %v985_v46 = vld [vmem:[%s5229_s3] sm:$0x1]  ;;  %vm5526_vm6 = vmpackc.low %vm1313_vm5, %vm1313_vm5 }
  0x7c   : > { %4663 = vmatpush1.bf16.msra.mxu0 %v4662_v9  ;;  %v4081_v21 = vld [vmem:[#allocation2] ss:$0 sm:$0xff] }
  0x7d   : > { %4664 = vmatprep.subr.bf16.mxu0 %v5173_v0 }
  0x80   : > { %4666 = vmatpush1.bf16.msra.mxu0 %v4665_v13 }
  0x81   : > { %4667 = vmatprep.subr.bf16.mxu0 %v5173_v0 }
  0x84   : > { %4669 = vmatpush1.bf16.msra.mxu0 %v4668_v16 }
  0x85   : > { %4670 = vmatprep.subr.bf16.mxu0 %v5173_v0 }
  0x88   : > { %4672 = vmatpush1.bf16.msra.mxu0 %v4671_v19  ;;  %v4080_v19 = vld [vmem:[#allocation4] ss:$0 sm:$0xff] }
  0x89   : > { %4673 = vmatprep.subr.bf16.mxu0 %v5173_v0 }
  0x8c   : > { %4675 = vmatpush1.bf16.msra.mxu0 %v4674_v22 }
  0x8d   : > { %4676 = vmatprep.subr.bf16.mxu0 %v5173_v0 }
  0x90   : > { %4678 = vmatpush1.bf16.msra.mxu0 %v4677_v25 }
  0x91   : > { %4679 = vmatprep.subr.bf16.mxu0 %v5173_v0 }
  0x94   : > { %4681 = vmatpush1.bf16.msra.mxu0 %v4680_v28 }
  0x95   : > { %4682 = vmatprep.subr.bf16.mxu0 %v5173_v0 }
  0x98   : > { %4684 = vmatpush1.bf16.msra.mxu0 %v4683_v31 }
  0x99   : > { %4685 = vmatprep.subr.bf16.mxu0 %v5173_v0 }
  0x9c   : > { %4687 = vmatpush1.bf16.msra.mxu0 %v4686_v34 }
  0x9d   : > { %4688 = vmatprep.subr.bf16.mxu0 %v5173_v0 }
  0xa0   : > { %4690 = vmatpush1.bf16.msra.mxu0 %v4689_v37 }
  0xa1   : > { %4708 = vmatprep.subr.bf16.mxu0 %v5173_v0 }
  0xa3   : > { %1060 = vmatmul.mubr.f32.vlgmr.msra.gmra.mrb[0].mxu0 %v957_v38 }
  0xa4   : > { %4079 = vmatprep.mubr.msk.f32.mxu0 %vm988_vm0, %v960_v39 }
  0xa7   : > { %1065 = vmatmul.mubr.f32.gmra.mrb[2].mxu0 %v959_v40 }
 0x176   : > { %v1061_v42 = vpop.f32.mrb[0].mxu0 }
 0x177   : > { %v1062_v43 = vadd.f32 %v1061_v42, %v986_v41  ;;  %v1063_v44 = vpop.f32.mrb[1].mxu0 }
 0x179   : > { %v1073_v47 = vrot.slane %v1062_v43, 7 }
 0x17a   : > { %v1066_v48 = vpop.f32.mrb[2].mxu0 }
 0x17b   : > { %v1067_v49 = vadd.f32 %v1066_v48, %v987_v45  ;;  %v1068_v50 = vpop.f32.mrb[3].mxu0  ;;  %v1079_v51 = vsel %vm1072_vm1, %v985_v46, %v1073_v47 }
 0x17c   : > { %v1083_v52 = vsel %vm1082_vm2, %v1079_v51, 0.0  ;;  %v1201_v50 = vld [vmem:[%s5339_s29] sm:$0xff] }
 0x17d   : > { %v1074_v53 = vrot.slane %v1067_v49, 7  ;;  %1084 = vadd.xlane.f32.xlu0 %v1083_v52  ;;  %v1203_v52 = vld [vmem:[%s5339_s29 + $0x10] sm:$0xff] }
 0x17f   : > { %v1090_v54 = vsel %vm1089_vm3, %v1074_v53, 0.0  ;;  %v1075_v55 = vsel %vm1072_vm1, %v1073_v47, %v1074_v53 }
 0x180   : > { %1091 = vadd.xlane.f32.xlu1 %v1090_v54  ;;  %v1086_v56 = vsel %vm1082_vm2, %v1075_v55, 0.0  ;;  %v1204_v54 = vld [vmem:[%s5339_s29 + $0x18] sm:$0xff] }
 0x181   : > { %1087 = vadd.xlane.f32.xlu0 %v1086_v56  ;;  %v4695_v56 = vpack.c.bf16 %v1204_v54, %v1203_v52 }
 0x20a   : > { %v1085_v57 = vpop.xlane.xlu0 %1084 }
 0x20b   : > { %v1094_v58 = vmul.f32 0.03125, %v1085_v57 }
 0x20d   : > { %v1097_v59 = vsub.f32 %v1079_v51, %v1094_v58  ;;  %v1092_v60 = vpop.xlane.xlu1 %1091  ;;  %v1202_v51 = vld [vmem:[%s5339_s29 + $0x8] sm:$0xff] }
 0x20e   : > { %v1096_v61 = vmul.f32 0.03125, %v1092_v60  ;;  %v1088_v62 = vpop.xlane.xlu0 %1087 }
 0x20f   : > { %v1095_v63 = vmul.f32 0.03125, %v1088_v62  ;;  %v1100_v1 = vmul.f32 %v1097_v59, %v1097_v59 }
 0x210   : > { %v1099_v2 = vsub.f32 %v1074_v53, %v1096_v61  ;;  %v4692_v53 = vpack.c.bf16 %v1202_v51, %v1201_v50 }
 0x211   : > { %v1098_v3 = vsub.f32 %v1075_v55, %v1095_v63  ;;  %v1103_v4 = vsel %vm1082_vm2, %v1100_v1, 0.0  ;;  %v5175_v55 = vmov 0.0  }
 0x212   : > { %1104 = vadd.xlane.f32.xlu1 %v1103_v4  ;;  %v1102_v5 = vmul.f32 %v1099_v2, %v1099_v2  ;;  %4353 = vmatprep.mubr.msk.f32.mxu1 %vm5174_vm4, %v5175_v55  ;;  %v4082_v4 = vld [vmem:[%s5269_s20] ss:$0 sm:$0xff] }
 0x213   : > { %v1101_v6 = vmul.f32 %v1098_v3, %v1098_v3  ;;  %4413 = vmatprep.mubr.msk.f32.mxu0 %vm5174_vm4, %v5175_v55  ;;  %4693 = vmatpush3.bf16.msra.mxu1 %v4692_v53 }
 0x214   : > { %v1109_v7 = vsel %vm1089_vm3, %v1102_v5, 0.0  ;;  %4694 = vmatprep.subr.bf16.mxu1 %v5173_v0 }
 0x215   : > { %v1106_v8 = vsel %vm1082_vm2, %v1101_v6, 0.0  ;;  %v4083_v6 = vld [vmem:[%s5264_s12] ss:$0 sm:$0xff] }
 0x216   : > { %1110 = vadd.xlane.f32.xlu1 %v1109_v7  ;;  %1107 = vadd.xlane.f32.xlu0 %v1106_v8 }
 0x217   : > { %4696 = vmatpush3.bf16.msra.mxu1 %v4695_v56 }
 0x218   : > { %4697 = vmatprep.subr.bf16.mxu1 %v5173_v0 }
 0x29f   : > { %v1105_v9 = vpop.xlane.xlu1 %1104 }
 0x2a0   : > { %v1112_v10 = vmul.f32 0.03125, %v1105_v9 }
 0x2a2   : > { %v1115_v11 = vadd.f32 1e-05, %v1112_v10 }
 0x2a3   : > { %v1111_v12 = vpop.xlane.xlu1 %1110  ;;  %v1108_v13 = vpop.xlane.xlu0 %1107 }
 0x2a4   : > { %4919 = vrsqrt.f32 %v1115_v11  ;;  %v1114_v14 = vmul.f32 0.03125, %v1111_v12  ;;  %v1113_v15 = vmul.f32 0.03125, %v1108_v13 }
 0x2a6   : > { %v1117_v16 = vadd.f32 1e-05, %v1114_v14  ;;  %v1116_v17 = vadd.f32 1e-05, %v1113_v15 }
 0x2a8   : > { %4921 = vrsqrt.f32 %v1117_v16 }
 0x2a9   : > { %4923 = vrsqrt.f32 %v1116_v17 }
 0x2ae   : > { %v4920_v18 = vpop.eup %4919 }
 0x2af   : > { %v1121_v20 = vmul.f32 %v4920_v18, %v1097_v59 }
 0x2b1   : > { %v1130_v22 = vmul.f32 %v4080_v19, %v1121_v20 }
 0x2b2   : > { %v4922_v23 = vpop.eup %4921 }
 0x2b3   : > { %v4924_v24 = vpop.eup %4923  ;;  %v5476_v25 = vadd.f32 %v4081_v21, %v1130_v22  ;;  %v1123_v26 = vmul.f32 %v4922_v23, %v1099_v2 }
 0x2b4   : > { %v1122_v27 = vmul.f32 %v4924_v24, %v1098_v3 }
 0x2b5   : > { %v1144_v28 = vsel %vm1082_vm2, %v5476_v25, 0.0  ;;  %v1132_v29 = vmul.f32 %v4080_v19, %v1123_v26 }
 0x2b6   : > { %1145 = vadd.xlane.f32.xlu0 %v1144_v28  ;;  %v1131_v30 = vmul.f32 %v4080_v19, %v1122_v27  ;;  %v4084_v19 = vld [vmem:[%s5334_s17] ss:$0 sm:$0xff] }
 0x2b7   : > { %v5480_v31 = vadd.f32 %v4081_v21, %v1132_v29 }
 0x2b8   : > { %v5482_v32 = vadd.f32 %v4081_v21, %v1131_v30 }
 0x2b9   : > { %v1150_v33 = vsel %vm1089_vm3, %v5480_v31, 0.0 }
 0x2ba   : > { %1151 = vadd.xlane.f32.xlu0 %v1150_v33  ;;  %v1147_v34 = vsel %vm1082_vm2, %v5482_v32, 0.0 }
 0x2bb   : > { %1148 = vadd.xlane.f32.xlu1 %v1147_v34 }
 0x343   : > { %v1146_v35 = vpop.xlane.xlu0 %1145 }
 0x344   : > { %v1153_v36 = vmul.f32 0.03125, %v1146_v35 }
 0x346   : > { %v1156_v37 = vsub.f32 %v5476_v25, %v1153_v36 }
 0x347   : > { %v1152_v38 = vpop.xlane.xlu0 %1151 }
 0x348   : > { %v1149_v39 = vpop.xlane.xlu1 %1148  ;;  %v1155_v40 = vmul.f32 0.03125, %v1152_v38  ;;  %v1159_v41 = vmul.f32 %v1156_v37, %v1156_v37 }
 0x349   : > { %v1154_v42 = vmul.f32 0.03125, %v1149_v39 }
 0x34a   : > { %v1158_v43 = vsub.f32 %v5480_v31, %v1155_v40  ;;  %v1162_v44 = vsel %vm1082_vm2, %v1159_v41, 0.0 }
 0x34b   : > { %v1157_v45 = vsub.f32 %v5482_v32, %v1154_v42  ;;  %1163 = vadd.xlane.f32.xlu1 %v1162_v44 }
 0x34c   : > { %v1161_v46 = vmul.f32 %v1158_v43, %v1158_v43 }
 0x34d   : > { %v1160_v47 = vmul.f32 %v1157_v45, %v1157_v45 }
 0x34e   : > { %v1168_v48 = vsel %vm1089_vm3, %v1161_v46, 0.0 }
 0x34f   : > { %v1165_v49 = vsel %vm1082_vm2, %v1160_v47, 0.0  ;;  %1169 = vadd.xlane.f32.xlu1 %v1168_v48 }
 0x350   : > { %1166 = vadd.xlane.f32.xlu0 %v1165_v49 }
 0x3d8   : > { %v1164_v57 = vpop.xlane.xlu1 %1163 }
 0x3d9   : > { %v1171_v58 = vmul.f32 0.03125, %v1164_v57 }
 0x3db   : > { %v1174_v59 = vadd.f32 1e-05, %v1171_v58 }
 0x3dc   : > { %v1170_v60 = vpop.xlane.xlu1 %1169 }
 0x3dd   : > { %4925 = vrsqrt.f32 %v1174_v59  ;;  %v1173_v61 = vmul.f32 0.03125, %v1170_v60  ;;  %v1167_v62 = vpop.xlane.xlu0 %1166 }
 0x3de   : > { %v1172_v63 = vmul.f32 0.03125, %v1167_v62 }
 0x3df   : > { %v1176_v1 = vadd.f32 1e-05, %v1173_v61 }
 0x3e0   : > { %v1175_v2 = vadd.f32 1e-05, %v1172_v63 }
 0x3e1   : > { %4927 = vrsqrt.f32 %v1176_v1 }
 0x3e2   : > { %4929 = vrsqrt.f32 %v1175_v2 }
 0x3e7   : > { %v4926_v3 = vpop.eup %4925 }
 0x3e8   : > { %v1180_v5 = vmul.f32 %v4926_v3, %v1156_v37 }
 0x3ea   : > { %v1189_v7 = vmul.f32 %v4082_v4, %v1180_v5 }
 0x3eb   : > { %v4928_v8 = vpop.eup %4927 }
 0x3ec   : > { %v4930_v9 = vpop.eup %4929  ;;  %v1198_v10 = vadd.f32 %v4083_v6, %v1189_v7  ;;  %v1182_v12 = vmul.f32 %v4928_v8, %v1158_v43 }
 0x3ed   : > { %v1181_v11 = vmul.f32 %v4930_v9, %v1157_v45 }
 0x3ee   : > { %4354 = vmatmul.mubr.msk.f32.vlgmr.msra.gmra.mrb[0].mxu1 %vm1082_vm2, %v1198_v10  ;;  %v1191_v15 = vmul.f32 %v4082_v4, %v1182_v12 }
 0x3ef   : > { %4356 = vmatprep.mubr.msk.f32.mxu1 %vm5174_vm4, %v5175_v55  ;;  %v1190_v13 = vmul.f32 %v4082_v4, %v1181_v11 }
 0x3f0   : > { %v1200_v16 = vadd.f32 %v4083_v6, %v1191_v15 }
 0x3f1   : > { %v1199_v14 = vadd.f32 %v4083_v6, %v1190_v13 }
 0x3f3   : > { %4357 = vmatmul.mubr.msk.f32.gmra.mrb[2].mxu1 %vm1082_vm2, %v1199_v14 }
 0x3f4   : > { %4359 = vmatprep.mubr.msk.f32.mxu1 %vm5174_vm4, %v5175_v55 }
 0x3f7   : > { %4360 = vmatmul.mubr.msk.f32.gmra.mrb[4].mxu1 %vm1082_vm2, %v1200_v16 }
 0x3f8   : > { %4368 = vmatprep.mubr.msk.f32.mxu1 %vm5174_vm4, %v5175_v55 }
 0x4c1   : > { %v1287_v17 = vpop.f32.mrb[0].mxu1 }
 0x4c2   : > { %v4355_v18 = vpop.f32.mrb[1].mxu1  ;;  %v1288_v21 = vadd.f32 %v4084_v19, %v1287_v17 }
 0x4c4   : > { %v1301_v37 = vmul.f32 0.25, %v1288_v21 }
 0x4c6   : > { %v1292_v20 = vpop.f32.mrb[2].mxu1 }
 0x4c7   : > { %v1293_v22 = vadd.f32 %v4084_v19, %v1292_v20  ;;  %v4358_v23 = vpop.f32.mrb[3].mxu1 }
 0x4c9   : > { %v5516_v24 = vpack.i.bf16 %v1293_v22, %v1288_v21  ;;  %v1302_v38 = vmul.f32 0.25, %v1293_v22 }
 0x4ca   : > { %v1297_v26 = vpop.f32.mrb[4].mxu1 }
 0x4cb   : > { %v5518_v27 = vadd.f32 %v4084_v19, %v1297_v26  ;;  %4876 = vrot.lane.b32.xlu0 %v5516_v24, %s5176_s23  ;;  %v4361_v28 = vpop.f32.mrb[5].mxu1 }
 0x4cd   : > { %1311 = vrot.lane.b32.xlu1 %v5518_v27, %s5176_s23  ;;  %v1303_v39 = vmul.f32 0.25, %v5518_v27 }
 0x53d   : > { %v4877_v29 = vpop.permute.xlu0 %4876 }
 0x53e   : > { %v4879_v30 = vunpack.i.h.bf16 %v4877_v29  ;;  %v4878_v33 = vunpack.i.l.bf16 %v4877_v29 }
 0x53f   : > { %v1312_v36 = vpop.permute.xlu1 %1311 }
 0x540   : > { %v4698_v35 = vpack.c.bf16 %v4879_v30, %v4878_v33 }
 0x542   : > { %4700 = vmatpush3.bf16.xpose.msk.msra.mxu1 %vm5526_vm6, %v4698_v35 }
 0x543   : > { %4366 = vmatprep.subr.mxu1 %v5175_v55 }
 0x54a   : > { %4367 = vmatpush3.xpose.msk.msra.mxu1 %vm1313_vm5, %v1312_v36 }
 0x54b   : > { %4701 = vmatprep.subr.bf16.mxu1 %v5173_v0 }
 0x54d   : > { %4369 = vmatmul.mubr.msk.f32.vlgmr.msra.gmra.mrb[6].mxu1 %vm1313_vm5, %v1301_v37 }
 0x54e   : > { %4371 = vmatprep.mubr.msk.f32.mxu1 %vm5174_vm4, %v5175_v55 }
 0x551   : > { %4372 = vmatmul.mubr.msk.f32.gmra.mrb[8].mxu1 %vm1313_vm5, %v1302_v38 }
 0x552   : > { %4374 = vmatprep.mubr.msk.f32.mxu1 %vm5174_vm4, %v5175_v55 }
 0x555   : > { %4375 = vmatmul.mubr.msk.f32.gmra.mrb[10].mxu1 %vm1313_vm5, %v1303_v39 }
 0x556   : > { %4383 = vmatprep.mubr.msk.f32.mxu1 %vm5174_vm4, %v5175_v55 }
 0x620   : > { %v1395_v40 = vpop.f32.mrb[6].mxu1 }
 0x621   : > { %v4370_v41 = vpop.f32.mrb[7].mxu1  ;;  %v1410_v42 = vsel %vm1409_vm7, %v1395_v40, -inf }
 0x622   : > { %1411 = vmax.xlane.f32.xlu1 %v1410_v42 }
 0x624   : > { %v1400_v43 = vpop.f32.mrb[8].mxu1 }
 0x625   : > { %v4373_v44 = vpop.f32.mrb[9].mxu1  ;;  %v1413_v45 = vsel %vm1409_vm7, %v1400_v43, -inf }
 0x626   : > { %1414 = vmax.xlane.f32.xlu0 %v1413_v45 }
 0x628   : > { %v1405_v46 = vpop.f32.mrb[10].mxu1 }
 0x629   : > { %v4376_v47 = vpop.f32.mrb[11].mxu1  ;;  %v1417_v48 = vsel %vm1416_vm8, %v1405_v46, -inf }
 0x62a   : > { %1418 = vmax.xlane.f32.xlu0 %v1417_v48 }
 0x6af   : > { %v1412_v49 = vpop.xlane.xlu1 %1411 }
 0x6b0   : > { %v1420_v50 = vsub.f32 %v1395_v40, %v1412_v49 }
 0x6b2   : > { %v1423_v51 = vmul.f32 1.442695, %v1420_v50 }
 0x6b3   : > { %v1415_v52 = vpop.xlane.xlu0 %1414 }
 0x6b4   : > { %4931 = vpow2.f32 %v1423_v51  ;;  %v1421_v53 = vsub.f32 %v1400_v43, %v1415_v52 }
 0x6b6   : > { %v1425_v54 = vmul.f32 1.442695, %v1421_v53 }
 0x6b7   : > { %v1419_v60 = vpop.xlane.xlu0 %1418 }
 0x6b8   : > { %4933 = vpow2.f32 %v1425_v54  ;;  %v1422_v61 = vsub.f32 %v1405_v46, %v1419_v60 }
 0x6ba   : > { %v1427_v62 = vmul.f32 1.442695, %v1422_v61 }
 0x6bc   : > { %4935 = vpow2.f32 %v1427_v62 }
 0x6be   : > { %v4932_v56 = vpop.eup %4931 }
 0x6bf   : > { %v1429_v57 = vsel %vm1409_vm7, %v4932_v56, 0.0 }
 0x6c0   : > { %1430 = vadd.xlane.f32.xlu1 %v1429_v57 }
 0x6c2   : > { %v4934_v58 = vpop.eup %4933 }
 0x6c3   : > { %v1432_v59 = vsel %vm1409_vm7, %v4934_v58, 0.0 }
 0x6c4   : > { %1433 = vadd.xlane.f32.xlu0 %v1432_v59 }
 0x6c6   : > { %v4936_v63 = vpop.eup %4935 }
 0x6c7   : > { %v1435_v1 = vsel %vm1416_vm8, %v4936_v63, 0.0 }
 0x6d1   : > { %1448 = vrot.lane.b32.xlu1 %v5518_v27, %s5177_s26 }
 0x6d5   : > { %4886 = vrot.lane.b32.xlu1 %v5516_v24, %s5178_s28 }
 0x6d9   : > { %1553 = vrot.lane.b32.xlu1 %v5518_v27, %s5178_s28 }
 0x6da   : > { %4881 = vrot.lane.b32.xlu0 %v5516_v24, %s5177_s26 }
 0x6de   : > { %1543 = vrot.lane.b32.xlu0 %v1301_v37, %s5179_s1 }
 0x6e2   : > { %1547 = vrot.lane.b32.xlu0 %v1303_v39, %s5179_s1 }
 0x6fd   : > { %1436 = vadd.xlane.f32.xlu1 %v1435_v1 }
 0x70e   : > { %1545 = vrot.lane.b32.xlu1 %v1302_v38, %s5179_s1 }
 0x74d   : > { %v1431_v2 = vpop.xlane.xlu1 %1430 }
 0x74e   : > { %4937 = vrcp.f32 %v1431_v2 }
 0x751   : > { %v1434_v3 = vpop.xlane.xlu0 %1433  ;;  %v1449_v5 = vpop.permute.xlu1 %1448 }
 0x752   : > { %4939 = vrcp.f32 %v1434_v3 }
 0x755   : > { %v4882_v4 = vpop.permute.xlu0 %4881  ;;  %v4887_v10 = vpop.permute.xlu1 %4886 }
 0x756   : > { %v4884_v6 = vunpack.i.h.bf16 %v4882_v4  ;;  %v4883_v7 = vunpack.i.l.bf16 %v4882_v4  ;;  %v4889_v13 = vunpack.i.h.bf16 %v4887_v10  ;;  %v4888_v14 = vunpack.i.l.bf16 %v4887_v10  ;;  %v1794_v10 = vld [vmem:[%s5299_s25] sm:$0xff] }
 0x758   : > { %v4702_v8 = vpack.c.bf16 %v4884_v6, %v4883_v7  ;;  %v4938_v9 = vpop.eup %4937  ;;  %v4705_v16 = vpack.c.bf16 %v4889_v13, %v4888_v14  ;;  %v1797_v14 = vld [vmem:[%s5299_s25 + $0x18] sm:$0xff] }
 0x759   : > { %v1441_v11 = vmul.f32 %v4938_v9, %v4932_v56  ;;  %v1554_v17 = vpop.permute.xlu1 %1553  ;;  %v1544_v21 = vpop.permute.xlu0 %1543 }
 0x75a   : > { %4703 = vmatpush3.bf16.msra.mxu1 %v4702_v8 }
 0x75b   : > { %4381 = vmatprep.subr.mxu1 %v5175_v55 }
 0x75c   : > { %v4940_v12 = vpop.eup %4939 }
 0x75d   : > { %v1442_v15 = vmul.f32 %v4940_v12, %v4934_v58  ;;  %v1548_v23 = vpop.permute.xlu0 %1547  ;;  %v1796_v12 = vld [vmem:[%s5299_s25 + $0x10] sm:$0xff] }
 0x75e   : > { %4382 = vmatpush3.msk.msra.mxu1 %vm1072_vm1, %v1449_v5 }
 0x75f   : > { %4384 = vmatmul.mubr.msk.f32.vlgmr.msra.gmra.mrb[12].mxu1 %vm1409_vm7, %v1441_v11  ;;  %4704 = vmatprep.subr.bf16.mxu1 %v5173_v0  ;;  %v1795_v11 = vld [vmem:[%s5299_s25 + $0x8] sm:$0xff] }
 0x760   : > { %4386 = vmatprep.mubr.msk.f32.mxu1 %vm5174_vm4, %v5175_v55  ;;  %v4712_v13 = vpack.c.bf16 %v1795_v11, %v1794_v10 }
 0x763   : > { %4387 = vmatmul.mubr.msk.f32.gmra.mrb[14].mxu1 %vm1409_vm7, %v1442_v15  ;;  %v4715_v15 = vpack.c.bf16 %v1797_v14, %v1796_v12  ;;  %v4112_v14 = vld [vmem:[%s5279_s4] ss:$0 sm:$0xff] }
 0x764   : > { %4389 = vmatprep.mubr.msk.f32.mxu1 %vm5174_vm4, %v5175_v55 }
 0x765   : > { %4707 = vmatpush3.bf16.xpose.msk.msra.mxu1 %vm5526_vm6, %v4705_v16 }
 0x766   : > { %4396 = vmatprep.subr.mxu1 %v5175_v55 }
 0x76d   : > { %4397 = vmatpush3.xpose.msk.msra.mxu1 %vm1313_vm5, %v1554_v17 }
 0x76e   : > { %4711 = vmatprep.subr.bf16.mxu1 %v5173_v0 }
 0x78a   : > { %v1437_v18 = vpop.xlane.xlu1 %1436 }
 0x78b   : > { %4941 = vrcp.f32 %v1437_v18 }
 0x78e   : > { %v1546_v22 = vpop.permute.xlu1 %1545 }
 0x795   : > { %v4942_v19 = vpop.eup %4941 }
 0x796   : > { %v1443_v20 = vmul.f32 %v4942_v19, %v4936_v63 }
 0x798   : > { %4390 = vmatmul.mubr.msk.f32.gmra.mrb[16].mxu1 %vm1409_vm7, %v1443_v20 }
 0x799   : > { %4398 = vmatprep.mubr.msk.f32.mxu1 %vm5174_vm4, %v5175_v55 }
 0x79c   : > { %4399 = vmatmul.mubr.msk.f32.vlgmr.msra.gmra.mrb[18].mxu1 %vm1313_vm5, %v1544_v21 }
 0x79d   : > { %4401 = vmatprep.mubr.msk.f32.mxu1 %vm5174_vm4, %v5175_v55  ;;  %4713 = vmatpush3.bf16.msra.mxu1 %v4712_v13 }
 0x79e   : > { %4714 = vmatprep.subr.bf16.mxu1 %v5173_v0 }
 0x7a0   : > { %4402 = vmatmul.mubr.msk.f32.gmra.mrb[20].mxu1 %vm1313_vm5, %v1546_v22 }
 0x7a1   : > { %4404 = vmatprep.mubr.msk.f32.mxu1 %vm5174_vm4, %v5175_v55  ;;  %4716 = vmatpush3.bf16.msra.mxu1 %v4715_v15 }
 0x7a2   : > { %4723 = vmatprep.subr.bf16.mxu1 %v5173_v0 }
 0x7a4   : > { %4405 = vmatmul.mubr.msk.f32.gmra.mrb[22].mxu1 %vm1313_vm5, %v1548_v23 }
 0x7a5   : > { %4430 = vmatprep.mubr.msk.f32.mxu1 %vm5174_vm4, %v5175_v55 }
 0x832   : > { %v5588_v26 = vpop.f32.mrb[12].mxu1 }
 0x833   : > { %v4385_v28 = vpop.f32.mrb[13].mxu1 }
 0x836   : > { %v5590_v29 = vpop.f32.mrb[14].mxu1 }
 0x837   : > { %v4388_v30 = vpop.f32.mrb[15].mxu1 }
 0x86b   : > { %v5592_v33 = vpop.f32.mrb[16].mxu1 }
 0x86c   : > { %v4391_v35 = vpop.f32.mrb[17].mxu1 }
 0x86f   : > { %v1633_v36 = vpop.f32.mrb[18].mxu1 }
 0x870   : > { %v4400_v37 = vpop.f32.mrb[19].mxu1  ;;  %v1647_v38 = vsel %vm1409_vm7, %v1633_v36, -inf }
 0x871   : > { %1648 = vmax.xlane.f32.xlu1 %v1647_v38 }
 0x873   : > { %v1638_v39 = vpop.f32.mrb[20].mxu1 }
 0x874   : > { %v4403_v40 = vpop.f32.mrb[21].mxu1  ;;  %v1650_v41 = vsel %vm1409_vm7, %v1638_v39, -inf }
 0x875   : > { %1651 = vmax.xlane.f32.xlu0 %v1650_v41 }
 0x877   : > { %v1643_v42 = vpop.f32.mrb[22].mxu1 }
 0x878   : > { %v4406_v43 = vpop.f32.mrb[23].mxu1  ;;  %v1653_v44 = vsel %vm1416_vm8, %v1643_v42, -inf }
 0x879   : > { %1654 = vmax.xlane.f32.xlu0 %v1653_v44 }
 0x8fe   : > { %v1649_v45 = vpop.xlane.xlu1 %1648 }
 0x8ff   : > { %v1656_v46 = vsub.f32 %v1633_v36, %v1649_v45 }
 0x901   : > { %v1659_v47 = vmul.f32 1.442695, %v1656_v46 }
 0x902   : > { %v1652_v48 = vpop.xlane.xlu0 %1651 }
 0x903   : > { %4943 = vpow2.f32 %v1659_v47  ;;  %v1657_v49 = vsub.f32 %v1638_v39, %v1652_v48 }
 0x905   : > { %v1661_v50 = vmul.f32 1.442695, %v1657_v49 }
 0x906   : > { %v1655_v51 = vpop.xlane.xlu0 %1654 }
 0x907   : > { %4945 = vpow2.f32 %v1661_v50  ;;  %v1658_v52 = vsub.f32 %v1643_v42, %v1655_v51 }
 0x909   : > { %v1663_v53 = vmul.f32 1.442695, %v1658_v52 }
 0x90b   : > { %4947 = vpow2.f32 %v1663_v53 }
 0x90d   : > { %v4944_v54 = vpop.eup %4943 }
 0x90e   : > { %v1665_v56 = vsel %vm1409_vm7, %v4944_v54, 0.0 }
 0x90f   : > { %1666 = vadd.xlane.f32.xlu0 %v1665_v56 }
 0x911   : > { %v4946_v57 = vpop.eup %4945 }
 0x912   : > { %v1668_v58 = vsel %vm1409_vm7, %v4946_v57, 0.0 }
 0x913   : > { %1669 = vadd.xlane.f32.xlu1 %v1668_v58 }
 0x915   : > { %v4948_v59 = vpop.eup %4947 }
 0x916   : > { %v1671_v60 = vsel %vm1416_vm8, %v4948_v59, 0.0 }
 0x917   : > { %1672 = vadd.xlane.f32.xlu0 %v1671_v60 }
 0x924   : > { %4891 = vrot.lane.b32.xlu1 %v5516_v24, %s5180_s2 }
 0x92d   : > { %1684 = vrot.lane.b32.xlu0 %v5518_v27, %s5180_s2 }
 0x99c   : > { %v1667_v61 = vpop.xlane.xlu0 %1666 }
 0x99d   : > { %4949 = vrcp.f32 %v1667_v61 }
 0x9a0   : > { %v1670_v62 = vpop.xlane.xlu1 %1669 }
 0x9a1   : > { %4951 = vrcp.f32 %v1670_v62 }
 0x9a4   : > { %v4892_v63 = vpop.permute.xlu1 %4891  ;;  %v1673_v1 = vpop.xlane.xlu0 %1672 }
 0x9a5   : > { %v4894_v2 = vunpack.i.h.bf16 %v4892_v63  ;;  %v4893_v3 = vunpack.i.l.bf16 %v4892_v63  ;;  %4953 = vrcp.f32 %v1673_v1  ;;  %v1956_v63 = vld [vmem:[%s5239_s14] sm:$0xff]  ;;  %v1957_v1 = vld [vmem:[%s5239_s14 + $0x8] sm:$0xff] }
 0x9a7   : > { %v4709_v4 = vpack.c.bf16 %v4894_v2, %v4893_v3  ;;  %v4950_v5 = vpop.eup %4949  ;;  %v4718_v2 = vpack.c.bf16 %v1957_v1, %v1956_v63  ;;  %v1958_v3 = vld [vmem:[%s5239_s14 + $0x10] sm:$0xff] }
 0x9a8   : > { %v1677_v24 = vmul.f32 %v4950_v5, %v4944_v54  ;;  %v1685_v6 = vpop.permute.xlu0 %1684 }
 0x9a9   : > { %4710 = vmatpush3.bf16.msra.mxu0 %v4709_v4  ;;  %v1959_v4 = vld [vmem:[%s5239_s14 + $0x18] sm:$0xff] }
 0x9aa   : > { %4411 = vmatprep.subr.mxu0 %v5175_v55  ;;  %v4721_v5 = vpack.c.bf16 %v1959_v4, %v1958_v3 }
 0x9ab   : > { %v4952_v27 = vpop.eup %4951 }
 0x9ac   : > { %v1678_v7 = vmul.f32 %v4952_v27, %v4946_v57 }
 0x9ad   : > { %4412 = vmatpush3.msk.msra.mxu0 %vm1072_vm1, %v1685_v6 }
 0x9ae   : > { %4414 = vmatmul.mubr.msk.f32.vlgmr.msra.gmra.mrb[4].mxu0 %vm1409_vm7, %v1677_v24  ;;  %4717 = vmatprep.subr.bf16.mxu0 %v5173_v0 }
 0x9af   : > { %4416 = vmatprep.mubr.msk.f32.mxu0 %vm5174_vm4, %v5175_v55  ;;  %v4954_v8 = vpop.eup %4953  ;;  %4719 = vmatpush3.bf16.msra.mxu0 %v4718_v2 }
 0x9b0   : > { %v1679_v9 = vmul.f32 %v4954_v8, %v4948_v59  ;;  %4720 = vmatprep.subr.bf16.mxu0 %v5173_v0 }
 0x9b2   : > { %4417 = vmatmul.mubr.msk.f32.gmra.mrb[6].mxu0 %vm1409_vm7, %v1678_v7 }
 0x9b3   : > { %4419 = vmatprep.mubr.msk.f32.mxu0 %vm5174_vm4, %v5175_v55  ;;  %4722 = vmatpush3.bf16.msra.mxu0 %v4721_v5 }
 0x9b4   : > { %4735 = vmatprep.subr.bf16.mxu0 %v5173_v0 }
 0x9b6   : > { %4420 = vmatmul.mubr.msk.f32.gmra.mrb[8].mxu0 %vm1409_vm7, %v1679_v9 }
 0x9b7   : > { %4447 = vmatprep.mubr.msk.f32.mxu0 %vm5174_vm4, %v5175_v55 }
 0xa81   : > { %v1765_v16 = vpop.f32.mrb[4].mxu0 }
 0xa82   : > { %1782 = vrot.lane.b32.xlu1 %v1765_v16, %s5181_s7  ;;  %v4415_v17 = vpop.f32.mrb[5].mxu0  ;;  %v4113_v16 = vld [vmem:[%s5274_s27] ss:$0 sm:$0xff] }
 0xa85   : > { %v1770_v18 = vpop.f32.mrb[6].mxu0 }
 0xa86   : > { %1784 = vrot.lane.b32.xlu1 %v1770_v18, %s5181_s7  ;;  %v4418_v19 = vpop.f32.mrb[7].mxu0 }
 0xa89   : > { %v1775_v20 = vpop.f32.mrb[8].mxu0 }
 0xa8a   : > { %1786 = vrot.lane.b32.xlu1 %v1775_v20, %s5181_s7  ;;  %v4421_v21 = vpop.f32.mrb[9].mxu0 }
 0xaf4   : > { %v1783_v22 = vpop.permute.xlu1 %1782 }
 0xaf5   : > { %v1791_v23 = vsel %vm1313_vm5, %v5588_v26, %v1783_v22  ;;  %v4108_v26 = vld [vmem:[%s5294_s13] ss:$0 sm:$0xff] }
 0xaf6   : > { %4431 = vmatmul.mubr.msk.f32.vlgmr.msra.gmra.mrb[24].mxu1 %vm1082_vm2, %v1791_v23 }
 0xaf7   : > { %4433 = vmatprep.mubr.msk.f32.mxu1 %vm5174_vm4, %v5175_v55 }
 0xaf8   : > { %v1785_v28 = vpop.permute.xlu1 %1784 }
 0xaf9   : > { %v1792_v30 = vsel %vm1313_vm5, %v5590_v29, %v1785_v28 }
 0xafa   : > { %4434 = vmatmul.mubr.msk.f32.gmra.mrb[26].mxu1 %vm1082_vm2, %v1792_v30 }
 0xafb   : > { %4436 = vmatprep.mubr.msk.f32.mxu1 %vm5174_vm4, %v5175_v55 }
 0xafc   : > { %v1787_v35 = vpop.permute.xlu1 %1786 }
 0xafd   : > { %v1793_v36 = vsel %vm1313_vm5, %v5592_v33, %v1787_v35 }
 0xafe   : > { %4437 = vmatmul.mubr.msk.f32.gmra.mrb[28].mxu1 %vm1082_vm2, %v1793_v36  ;;  %v2080_v36 = vld [vmem:[%s5249_s24] sm:$0xff] }
 0xaff   : > { %4472 = vmatprep.mubr.msk.f32.mxu1 %vm5174_vm4, %v5175_v55 }
 0xbc9   : > { %v1880_v37 = vpop.f32.mrb[24].mxu1 }
 0xbca   : > { %v1881_v38 = vadd.f32 %v4108_v26, %v1880_v37  ;;  %v4432_v39 = vpop.f32.mrb[25].mxu1 }
 0xbcb   : > { %v2083_v39 = vld [vmem:[%s5249_s24 + $0x18] sm:$0xff] }
 0xbcc   : > { %v5642_v29 = vadd.f32 %v1881_v38, %v5476_v25  ;;  %v2082_v38 = vld [vmem:[%s5249_s24 + $0x10] sm:$0xff] }
 0xbcd   : > { %v1885_v40 = vpop.f32.mrb[26].mxu1 }
 0xbce   : > { %v1886_v41 = vadd.f32 %v4108_v26, %v1885_v40  ;;  %v4435_v42 = vpop.f32.mrb[27].mxu1  ;;  %v1899_v43 = vsel %vm1082_vm2, %v5642_v29, 0.0  ;;  %v4727_v40 = vpack.c.bf16 %v2083_v39, %v2082_v38 }
 0xbcf   : > { %1900 = vadd.xlane.f32.xlu0 %v1899_v43  ;;  %v2085_v42 = vld [vmem:[%s5249_s24 + $0x28] sm:$0xff] }
 0xbd0   : > { %v5647_v33 = vadd.f32 %v1886_v41, %v5482_v32  ;;  %v2084_v41 = vld [vmem:[%s5249_s24 + $0x20] sm:$0xff] }
 0xbd1   : > { %v1890_v44 = vpop.f32.mrb[28].mxu1  ;;  %v4730_v43 = vpack.c.bf16 %v2085_v42, %v2084_v41 }
 0xbd2   : > { %v1891_v45 = vadd.f32 %v4108_v26, %v1890_v44  ;;  %v4438_v46 = vpop.f32.mrb[29].mxu1  ;;  %v1902_v47 = vsel %vm1082_vm2, %v5647_v33, 0.0  ;;  %v2081_v26 = vld [vmem:[%s5249_s24 + $0x8] sm:$0xff]  ;;  %v2086_v44 = vld [vmem:[%s5249_s24 + $0x30] sm:$0xff] }
 0xbd3   : > { %1903 = vadd.xlane.f32.xlu1 %v1902_v47  ;;  %v4724_v37 = vpack.c.bf16 %v2081_v26, %v2080_v36  ;;  %v4114_v47 = vld [vmem:[%s5234_s8] ss:$0 sm:$0xff] }
 0xbd4   : > { %v5652_v25 = vadd.f32 %v1891_v45, %v5480_v31  ;;  %v2087_v45 = vld [vmem:[%s5249_s24 + $0x38] sm:$0xff] }
 0xbd5   : > { %4725 = vmatpush3.bf16.msra.mxu1 %v4724_v37  ;;  %v4733_v46 = vpack.c.bf16 %v2087_v45, %v2086_v44 }
 0xbd6   : > { %v1905_v48 = vsel %vm1089_vm3, %v5652_v25, 0.0  ;;  %4726 = vmatprep.subr.bf16.mxu1 %v5173_v0 }
 0xbd7   : > { %1906 = vadd.xlane.f32.xlu0 %v1905_v48 }
 0xbd9   : > { %4728 = vmatpush3.bf16.msra.mxu1 %v4727_v40 }
 0xbda   : > { %4729 = vmatprep.subr.bf16.mxu1 %v5173_v0 }
 0xbdd   : > { %4731 = vmatpush3.bf16.msra.mxu1 %v4730_v43 }
 0xbde   : > { %4732 = vmatprep.subr.bf16.mxu1 %v5173_v0 }
 0xbe1   : > { %4734 = vmatpush3.bf16.msra.mxu1 %v4733_v46 }
 0xbe2   : > { %4741 = vmatprep.subr.bf16.mxu1 %v5173_v0 }
 0xc5c   : > { %v1901_v49 = vpop.xlane.xlu0 %1900 }
 0xc5d   : > { %v1908_v50 = vmul.f32 0.03125, %v1901_v49 }
 0xc5f   : > { %v1911_v51 = vsub.f32 %v5642_v29, %v1908_v50 }
 0xc60   : > { %v1904_v32 = vpop.xlane.xlu1 %1903 }
 0xc61   : > { %v1909_v52 = vmul.f32 0.03125, %v1904_v32  ;;  %v1914_v53 = vmul.f32 %v1911_v51, %v1911_v51 }
 0xc63   : > { %v1912_v54 = vsub.f32 %v5647_v33, %v1909_v52  ;;  %v1917_v56 = vsel %vm1082_vm2, %v1914_v53, 0.0 }
 0xc64   : > { %1918 = vadd.xlane.f32.xlu0 %v1917_v56  ;;  %v1907_v31 = vpop.xlane.xlu0 %1906 }
 0xc65   : > { %v1910_v57 = vmul.f32 0.03125, %v1907_v31  ;;  %v1915_v58 = vmul.f32 %v1912_v54, %v1912_v54 }
 0xc67   : > { %v1913_v59 = vsub.f32 %v5652_v25, %v1910_v57  ;;  %v1920_v60 = vsel %vm1082_vm2, %v1915_v58, 0.0 }
 0xc68   : > { %1921 = vadd.xlane.f32.xlu0 %v1920_v60 }
 0xc69   : > { %v1916_v61 = vmul.f32 %v1913_v59, %v1913_v59 }
 0xc6b   : > { %v1923_v62 = vsel %vm1089_vm3, %v1916_v61, 0.0 }
 0xc6c   : > { %1924 = vadd.xlane.f32.xlu1 %v1923_v62 }
 0xcf1   : > { %v1919_v24 = vpop.xlane.xlu0 %1918 }
 0xcf2   : > { %v1926_v6 = vmul.f32 0.03125, %v1919_v24 }
 0xcf4   : > { %v1929_v27 = vadd.f32 1e-05, %v1926_v6 }
 0xcf5   : > { %v1922_v7 = vpop.xlane.xlu0 %1921 }
 0xcf6   : > { %4955 = vrsqrt.f32 %v1929_v27  ;;  %v1927_v8 = vmul.f32 0.03125, %v1922_v7 }
 0xcf8   : > { %v1930_v9 = vadd.f32 1e-05, %v1927_v8 }
 0xcf9   : > { %v1925_v10 = vpop.xlane.xlu1 %1924 }
 0xcfa   : > { %4957 = vrsqrt.f32 %v1930_v9  ;;  %v1928_v11 = vmul.f32 0.03125, %v1925_v10 }
 0xcfc   : > { %v1931_v12 = vadd.f32 1e-05, %v1928_v11 }
 0xcfe   : > { %4959 = vrsqrt.f32 %v1931_v12  ;;  %v4118_v12 = vld [vmem:[%s6030_s10] ss:$0 sm:$0xff] }
 0xd00   : > { %v4956_v13 = vpop.eup %4955 }
 0xd01   : > { %v1935_v15 = vmul.f32 %v4956_v13, %v1911_v51 }
 0xd03   : > { %v1944_v17 = vmul.f32 %v4112_v14, %v1935_v15 }
 0xd04   : > { %v4958_v18 = vpop.eup %4957 }
 0xd05   : > { %v1953_v19 = vadd.f32 %v4113_v16, %v1944_v17  ;;  %v1936_v20 = vmul.f32 %v4958_v18, %v1912_v54 }
 0xd07   : > { %4448 = vmatmul.mubr.msk.f32.vlgmr.msra.gmra.mrb[10].mxu0 %vm1082_vm2, %v1953_v19  ;;  %v1945_v21 = vmul.f32 %v4112_v14, %v1936_v20 }
 0xd08   : > { %v4960_v22 = vpop.eup %4959  ;;  %4450 = vmatprep.mubr.msk.f32.mxu0 %vm5174_vm4, %v5175_v55 }
 0xd09   : > { %v1954_v23 = vadd.f32 %v4113_v16, %v1945_v21  ;;  %v1937_v28 = vmul.f32 %v4960_v22, %v1913_v59 }
 0xd0b   : > { %4451 = vmatmul.mubr.msk.f32.gmra.mrb[12].mxu0 %vm1082_vm2, %v1954_v23  ;;  %v1946_v30 = vmul.f32 %v4112_v14, %v1937_v28 }
 0xd0c   : > { %4453 = vmatprep.mubr.msk.f32.mxu0 %vm5174_vm4, %v5175_v55 }
 0xd0d   : > { %v1955_v35 = vadd.f32 %v4113_v16, %v1946_v30 }
 0xd0f   : > { %4454 = vmatmul.mubr.msk.f32.gmra.mrb[14].mxu0 %vm1082_vm2, %v1955_v35 }
 0xd10   : > { %4489 = vmatprep.mubr.msk.f32.mxu0 %vm5174_vm4, %v5175_v55 }
 0xdda   : > { %v2042_v48 = vpop.f32.mrb[10].mxu0 }
 0xddb   : > { %v2043_v49 = vadd.f32 %v4114_v47, %v2042_v48  ;;  %v4449_v50 = vpop.f32.mrb[11].mxu0  ;;  %v4126_v48 = vld [vmem:[%s5339_s29 + $0x20] sm:$0xff] }
 0xddd   : > { %v2056_v51 = vmul.f32 1.702, %v2043_v49 }
 0xdde   : > { %v2047_v32 = vpop.f32.mrb[12].mxu0 }
 0xddf   : > { %v2059_v52 = vsub.f32 0.0, %v2056_v51  ;;  %v2048_v53 = vadd.f32 %v4114_v47, %v2047_v32  ;;  %v4452_v54 = vpop.f32.mrb[13].mxu0  ;;  %v4128_v51 = vld [vmem:[%s5339_s29 + $0x30] sm:$0xff]  ;;  %v4129_v32 = vld [vmem:[%s5339_s29 + $0x38] sm:$0xff] }
 0xde1   : > { %v2062_v56 = vmul.f32 1.442695, %v2059_v52  ;;  %v2057_v31 = vmul.f32 1.702, %v2048_v53  ;;  %v4739_v52 = vpack.c.bf16 %v4129_v32, %v4128_v51 }
 0xde2   : > { %v2052_v57 = vpop.f32.mrb[14].mxu0 }
 0xde3   : > { %4961 = vpow2.f32 %v2062_v56  ;;  %v2060_v58 = vsub.f32 0.0, %v2057_v31  ;;  %v2053_v59 = vadd.f32 %v4114_v47, %v2052_v57  ;;  %v4455_v60 = vpop.f32.mrb[15].mxu0 }
 0xde5   : > { %v2064_v61 = vmul.f32 1.442695, %v2060_v58  ;;  %v2058_v62 = vmul.f32 1.702, %v2053_v59 }
 0xde7   : > { %4963 = vpow2.f32 %v2064_v61  ;;  %v2061_v63 = vsub.f32 0.0, %v2058_v62 }
 0xde9   : > { %v2066_v1 = vmul.f32 1.442695, %v2061_v63  ;;  %v4124_v63 = vld [vmem:[%s5269_s20 + $0x1] ss:$0 sm:$0xff] }
 0xdeb   : > { %4965 = vpow2.f32 %v2066_v1 }
 0xded   : > { %v4962_v2 = vpop.eup %4961 }
 0xdee   : > { %v2068_v3 = vadd.f32 1.0, %v4962_v2  ;;  %v4125_v2 = vld [vmem:[%s5264_s12 + $0x1] ss:$0 sm:$0xff] }
 0xdf0   : > { %4967 = vrcp.f32 %v2068_v3 }
 0xdf1   : > { %v4964_v4 = vpop.eup %4963 }
 0xdf2   : > { %v2069_v5 = vadd.f32 1.0, %v4964_v4 }
 0xdf4   : > { %4969 = vrcp.f32 %v2069_v5 }
 0xdf5   : > { %v4966_v24 = vpop.eup %4965 }
 0xdf6   : > { %v2070_v6 = vadd.f32 1.0, %v4966_v24 }
 0xdf8   : > { %4971 = vrcp.f32 %v2070_v6 }
 0xdfa   : > { %v4968_v27 = vpop.eup %4967 }
 0xdfb   : > { %v2077_v7 = vmul.f32 %v4968_v27, %v2043_v49  ;;  %v4127_v49 = vld [vmem:[%s5339_s29 + $0x28] sm:$0xff] }
 0xdfc   : > { %v4736_v50 = vpack.c.bf16 %v4127_v49, %v4126_v48 }
 0xdfd   : > { %4473 = vmatmul.mubr.msk.f32.vlgmr.msra.gmra.mrb[30].mxu1 %vm988_vm0, %v2077_v7 }
 0xdfe   : > { %v4970_v8 = vpop.eup %4969  ;;  %4475 = vmatprep.mubr.msk.f32.mxu1 %vm5174_vm4, %v5175_v55  ;;  %4737 = vmatpush3.bf16.msra.mxu0 %v4736_v50 }
 0xdff   : > { %v2078_v9 = vmul.f32 %v4970_v8, %v2048_v53  ;;  %4738 = vmatprep.subr.bf16.mxu0 %v5173_v0 }
 0xe01   : > { %4476 = vmatmul.mubr.msk.f32.gmra.mrb[32].mxu1 %vm988_vm0, %v2078_v9 }
 0xe02   : > { %v4972_v10 = vpop.eup %4971  ;;  %4478 = vmatprep.mubr.msk.f32.mxu1 %vm5174_vm4, %v5175_v55  ;;  %4740 = vmatpush3.bf16.msra.mxu0 %v4739_v52 }
 0xe03   : > { %v2079_v11 = vmul.f32 %v4972_v10, %v2053_v59  ;;  %4745 = vmatprep.subr.bf16.mxu0 %v5173_v0 }
 0xe05   : > { %4479 = vmatmul.mubr.msk.f32.gmra.mrb[34].mxu1 %vm988_vm0, %v2079_v11 }
 0xe06   : > { %4504 = vmatprep.mubr.msk.f32.mxu1 %vm5174_vm4, %v5175_v55 }
 0xed0   : > { %v2170_v13 = vpop.f32.mrb[30].mxu1 }
 0xed1   : > { %v2171_v14 = vadd.f32 %v4118_v12, %v2170_v13  ;;  %v4474_v15 = vpop.f32.mrb[31].mxu1  ;;  %v4131_v13 = vld [vmem:[%s5334_s17 + $0x1] ss:$0 sm:$0xff] }
 0xed3   : > { %v5703_v16 = vadd.f32 %v2171_v14, %v5642_v29 }
 0xed4   : > { %v2175_v17 = vpop.f32.mrb[32].mxu1 }
 0xed5   : > { %v2176_v18 = vadd.f32 %v4118_v12, %v2175_v17  ;;  %v4477_v19 = vpop.f32.mrb[33].mxu1  ;;  %v2191_v20 = vsel %vm1082_vm2, %v5703_v16, 0.0 }
 0xed6   : > { %2192 = vadd.xlane.f32.xlu0 %v2191_v20 }
 0xed7   : > { %v5708_v21 = vadd.f32 %v2176_v18, %v5647_v33 }
 0xed8   : > { %v2180_v22 = vpop.f32.mrb[34].mxu1 }
 0xed9   : > { %v2181_v23 = vadd.f32 %v4118_v12, %v2180_v22  ;;  %v4480_v28 = vpop.f32.mrb[35].mxu1  ;;  %v2194_v30 = vsel %vm1082_vm2, %v5708_v21, 0.0 }
 0xeda   : > { %2195 = vadd.xlane.f32.xlu1 %v2194_v30 }
 0xedb   : > { %v5713_v29 = vadd.f32 %v2181_v23, %v5652_v25 }
 0xedd   : > { %v2197_v35 = vsel %vm1089_vm3, %v5713_v29, 0.0 }
 0xede   : > { %2198 = vadd.xlane.f32.xlu0 %v2197_v35 }
 0xf63   : > { %v2193_v36 = vpop.xlane.xlu0 %2192 }
 0xf64   : > { %v2200_v26 = vmul.f32 0.03125, %v2193_v36 }
 0xf66   : > { %v2203_v37 = vsub.f32 %v5703_v16, %v2200_v26 }
 0xf67   : > { %v2196_v33 = vpop.xlane.xlu1 %2195 }
 0xf68   : > { %v2201_v38 = vmul.f32 0.03125, %v2196_v33  ;;  %v2206_v39 = vmul.f32 %v2203_v37, %v2203_v37 }
 0xf6a   : > { %v2204_v40 = vsub.f32 %v5708_v21, %v2201_v38  ;;  %v2209_v41 = vsel %vm1082_vm2, %v2206_v39, 0.0 }
 0xf6b   : > { %2210 = vadd.xlane.f32.xlu1 %v2209_v41  ;;  %v2199_v25 = vpop.xlane.xlu0 %2198 }
 0xf6c   : > { %v2202_v42 = vmul.f32 0.03125, %v2199_v25  ;;  %v2207_v43 = vmul.f32 %v2204_v40, %v2204_v40 }
 0xf6e   : > { %v2205_v44 = vsub.f32 %v5713_v29, %v2202_v42  ;;  %v2212_v45 = vsel %vm1082_vm2, %v2207_v43, 0.0 }
 0xf6f   : > { %2213 = vadd.xlane.f32.xlu0 %v2212_v45 }
 0xf70   : > { %v2208_v46 = vmul.f32 %v2205_v44, %v2205_v44 }
 0xf72   : > { %v2215_v47 = vsel %vm1089_vm3, %v2208_v46, 0.0 }
 0xf73   : > { %2216 = vadd.xlane.f32.xlu1 %v2215_v47 }
 0xff8   : > { %v2211_v53 = vpop.xlane.xlu1 %2210 }
 0xff9   : > { %v2218_v54 = vmul.f32 0.03125, %v2211_v53 }
 0xffb   : > { %v2221_v56 = vadd.f32 1e-05, %v2218_v54 }
 0xffc   : > { %v2214_v31 = vpop.xlane.xlu0 %2213 }
 0xffd   : > { %4973 = vrsqrt.f32 %v2221_v56  ;;  %v2219_v57 = vmul.f32 0.03125, %v2214_v31 }
 0xfff   : > { %v2222_v58 = vadd.f32 1e-05, %v2219_v57 }
0x1000   : > { %v2217_v59 = vpop.xlane.xlu1 %2216 }
0x1001   : > { %4975 = vrsqrt.f32 %v2222_v58  ;;  %v2220_v60 = vmul.f32 0.03125, %v2217_v59 }
0x1003   : > { %v2223_v61 = vadd.f32 1e-05, %v2220_v60 }
0x1005   : > { %4977 = vrsqrt.f32 %v2223_v61 }
0x1007   : > { %v4974_v62 = vpop.eup %4973 }
0x1008   : > { %v2227_v1 = vmul.f32 %v4974_v62, %v2203_v37 }
0x100a   : > { %v2236_v3 = vmul.f32 %v4124_v63, %v2227_v1 }
0x100b   : > { %v4976_v4 = vpop.eup %4975 }
0x100c   : > { %v2245_v5 = vadd.f32 %v4125_v2, %v2236_v3  ;;  %v2228_v24 = vmul.f32 %v4976_v4, %v2204_v40 }
0x100e   : > { %4490 = vmatmul.mubr.msk.f32.vlgmr.msra.gmra.mrb[16].mxu0 %vm1082_vm2, %v2245_v5  ;;  %v2237_v6 = vmul.f32 %v4124_v63, %v2228_v24 }
0x100f   : > { %v4978_v27 = vpop.eup %4977  ;;  %4492 = vmatprep.mubr.msk.f32.mxu0 %vm5174_vm4, %v5175_v55 }
0x1010   : > { %v2246_v7 = vadd.f32 %v4125_v2, %v2237_v6  ;;  %v2229_v8 = vmul.f32 %v4978_v27, %v2205_v44 }
0x1012   : > { %4493 = vmatmul.mubr.msk.f32.gmra.mrb[18].mxu0 %vm1082_vm2, %v2246_v7  ;;  %v2238_v9 = vmul.f32 %v4124_v63, %v2229_v8 }
0x1013   : > { %4495 = vmatprep.mubr.msk.f32.mxu0 %vm5174_vm4, %v5175_v55 }
0x1014   : > { %v2247_v10 = vadd.f32 %v4125_v2, %v2238_v9 }
0x1016   : > { %4496 = vmatmul.mubr.msk.f32.gmra.mrb[20].mxu0 %vm1082_vm2, %v2247_v10 }
0x1017   : > { %4519 = vmatprep.mubr.msk.f32.mxu0 %vm5174_vm4, %v5175_v55 }
0x10e1   : > { %v2336_v11 = vpop.f32.mrb[16].mxu0 }
0x10e2   : > { %v4491_v12 = vpop.f32.mrb[17].mxu0  ;;  %v2337_v15 = vadd.f32 %v4131_v13, %v2336_v11 }
0x10e4   : > { %v2350_v28 = vmul.f32 0.25, %v2337_v15 }
0x10e5   : > { %v2341_v14 = vpop.f32.mrb[18].mxu0 }
0x10e6   : > { %v2342_v17 = vadd.f32 %v4131_v13, %v2341_v14  ;;  %v4494_v18 = vpop.f32.mrb[19].mxu0 }
0x10e8   : > { %v5741_v19 = vpack.i.bf16 %v2342_v17, %v2337_v15  ;;  %v2351_v35 = vmul.f32 0.25, %v2342_v17 }
0x10e9   : > { %v2346_v20 = vpop.f32.mrb[20].mxu0 }
0x10ea   : > { %v5743_v22 = vadd.f32 %v4131_v13, %v2346_v20  ;;  %4896 = vrot.lane.b32.xlu0 %v5741_v19, %s5176_s23  ;;  %v4497_v23 = vpop.f32.mrb[21].mxu0 }
0x10ec   : > { %2360 = vrot.lane.b32.xlu1 %v5743_v22, %s5176_s23  ;;  %v2352_v30 = vmul.f32 0.25, %v5743_v22 }
0x10ee   : > { %2589 = vrot.lane.b32.xlu0 %v2350_v28, %s5179_s1 }
0x10f0   : > { %4901 = vrot.lane.b32.xlu1 %v5741_v19, %s5178_s28 }
0x10f2   : > { %2593 = vrot.lane.b32.xlu0 %v2352_v30, %s5179_s1 }
0x10f4   : > { %2599 = vrot.lane.b32.xlu1 %v5743_v22, %s5178_s28  ;;  %s6036_s28 = sld [smem:[#allocation10_spill]] }
0x10f8   : > { %2591 = vrot.lane.b32.xlu1 %v2351_v35, %s5179_s1  ;;  %s6037_s1 = sld [smem:[#allocation15_spill]] }
0x115c   : > { %v4897_v36 = vpop.permute.xlu0 %4896 }
0x115d   : > { %v4899_v26 = vunpack.i.h.bf16 %v4897_v36  ;;  %v4898_v37 = vunpack.i.l.bf16 %v4897_v36 }
0x115e   : > { %v2361_v33 = vpop.permute.xlu1 %2360 }
0x115f   : > { %v4742_v38 = vpack.c.bf16 %v4899_v26, %v4898_v37 }
0x1160   : > { %v2590_v34 = vpop.permute.xlu0 %2589 }
0x1161   : > { %4744 = vmatpush3.bf16.xpose.msk.msra.mxu1 %vm5526_vm6, %v4742_v38 }
0x1162   : > { %4502 = vmatprep.subr.mxu1 %v5175_v55  ;;  %v4902_v39 = vpop.permute.xlu1 %4901 }
0x1163   : > { %v4904_v40 = vunpack.i.h.bf16 %v4902_v39  ;;  %v4903_v41 = vunpack.i.l.bf16 %v4902_v39 }
0x1164   : > { %v2594_v44 = vpop.permute.xlu0 %2593 }
0x1165   : > { %v4749_v25 = vpack.c.bf16 %v4904_v40, %v4903_v41 }
0x1166   : > { %v2600_v42 = vpop.permute.xlu1 %2599 }
0x1169   : > { %4503 = vmatpush3.xpose.msk.msra.mxu1 %vm1313_vm5, %v2361_v33 }
0x116a   : > { %4748 = vmatprep.subr.bf16.mxu1 %v5173_v0  ;;  %v2592_v43 = vpop.permute.xlu1 %2591 }
0x116c   : > { %4505 = vmatmul.mubr.msk.f32.vlgmr.msra.gmra.mrb[36].mxu1 %vm1313_vm5, %v2350_v28 }
0x116d   : > { %4751 = vmatpush3.bf16.xpose.msk.msra.mxu1 %vm5526_vm6, %v4749_v25  ;;  %4507 = vmatprep.mubr.msk.f32.mxu1 %vm5174_vm4, %v5175_v55  ;;  %vm3932_vm6 = vcmask 15360  }
0x116e   : > { %4532 = vmatprep.subr.mxu1 %v5175_v55 }
0x1170   : > { %4508 = vmatmul.mubr.msk.f32.gmra.mrb[38].mxu1 %vm1313_vm5, %v2351_v35 }
0x1171   : > { %4510 = vmatprep.mubr.msk.f32.mxu1 %vm5174_vm4, %v5175_v55 }
0x1174   : > { %4511 = vmatmul.mubr.msk.f32.gmra.mrb[40].mxu1 %vm1313_vm5, %v2352_v30 }
0x1175   : > { %4533 = vmatpush3.xpose.msk.msra.mxu1 %vm1313_vm5, %v2600_v42  ;;  %4534 = vmatprep.mubr.msk.f32.mxu1 %vm5174_vm4, %v5175_v55 }
0x1176   : > { %4755 = vmatprep.subr.bf16.mxu1 %v5173_v0 }
0x1178   : > { %4535 = vmatmul.mubr.msk.f32.vlgmr.msra.gmra.mrb[42].mxu1 %vm1313_vm5, %v2590_v34 }
0x1179   : > { %4537 = vmatprep.mubr.msk.f32.mxu1 %vm5174_vm4, %v5175_v55 }
0x117c   : > { %4538 = vmatmul.mubr.msk.f32.gmra.mrb[44].mxu1 %vm1313_vm5, %v2592_v43 }
0x117d   : > { %4540 = vmatprep.mubr.msk.f32.mxu1 %vm5174_vm4, %v5175_v55 }
0x1180   : > { %4541 = vmatmul.mubr.msk.f32.gmra.mrb[46].mxu1 %vm1313_vm5, %v2594_v44 }
0x1181   : > { %4566 = vmatprep.mubr.msk.f32.mxu1 %vm5174_vm4, %v5175_v55 }
0x123f   : > { %v2443_v45 = vpop.f32.mrb[36].mxu1 }
0x1240   : > { %v4506_v46 = vpop.f32.mrb[37].mxu1  ;;  %v2457_v47 = vsel %vm1409_vm7, %v2443_v45, -inf }
0x1241   : > { %2458 = vmax.xlane.f32.xlu1 %v2457_v47 }
0x1243   : > { %v2448_v48 = vpop.f32.mrb[38].mxu1 }
0x1244   : > { %v4509_v49 = vpop.f32.mrb[39].mxu1  ;;  %v2460_v50 = vsel %vm1409_vm7, %v2448_v48, -inf }
0x1245   : > { %2461 = vmax.xlane.f32.xlu0 %v2460_v50 }
0x1247   : > { %v2453_v51 = vpop.f32.mrb[40].mxu1 }
0x1248   : > { %v4512_v32 = vpop.f32.mrb[41].mxu1  ;;  %v2463_v52 = vsel %vm1416_vm8, %v2453_v51, -inf }
0x1249   : > { %2464 = vmax.xlane.f32.xlu0 %v2463_v52 }
0x124b   : > { %v2679_v53 = vpop.f32.mrb[42].mxu1 }
0x124c   : > { %v4536_v54 = vpop.f32.mrb[43].mxu1  ;;  %v2693_v56 = vsel %vm1409_vm7, %v2679_v53, -inf }
0x124d   : > { %2694 = vmax.xlane.f32.xlu0 %v2693_v56 }
0x124f   : > { %v2684_v31 = vpop.f32.mrb[44].mxu1 }
0x1250   : > { %v4539_v57 = vpop.f32.mrb[45].mxu1  ;;  %v2696_v58 = vsel %vm1409_vm7, %v2684_v31, -inf }
0x1251   : > { %2697 = vmax.xlane.f32.xlu1 %v2696_v58 }
0x1253   : > { %v2689_v59 = vpop.f32.mrb[46].mxu1 }
0x1254   : > { %v4542_v60 = vpop.f32.mrb[47].mxu1  ;;  %v2699_v61 = vsel %vm1416_vm8, %v2689_v59, -inf }
0x1255   : > { %2700 = vmax.xlane.f32.xlu0 %v2699_v61  ;;  %v4155_v61 = vld [vmem:[%s5299_s25 + $0x20] sm:$0xff] }
0x1262   : > { %2494 = vrot.lane.b32.xlu1 %v5743_v22, %s5177_s26 }
0x126b   : > { %4906 = vrot.lane.b32.xlu0 %v5741_v19, %s5177_s26  ;;  %s6035_s26 = sld [smem:[#allocation17_spill]] }
0x12ce   : > { %v2459_v62 = vpop.xlane.xlu1 %2458 }
0x12cf   : > { %v2466_v63 = vsub.f32 %v2443_v45, %v2459_v62  ;;  %v4156_v62 = vld [vmem:[%s5299_s25 + $0x28] sm:$0xff] }
0x12d1   : > { %v2469_v1 = vmul.f32 1.442695, %v2466_v63  ;;  %v4157_v63 = vld [vmem:[%s5299_s25 + $0x30] sm:$0xff] }
0x12d2   : > { %v2462_v2 = vpop.xlane.xlu0 %2461 }
0x12d3   : > { %4979 = vpow2.f32 %v2469_v1  ;;  %v2467_v3 = vsub.f32 %v2448_v48, %v2462_v2  ;;  %v4756_v1 = vpack.c.bf16 %v4156_v62, %v4155_v61  ;;  %v4158_v2 = vld [vmem:[%s5299_s25 + $0x38] sm:$0xff] }
0x12d5   : > { %v2471_v4 = vmul.f32 1.442695, %v2467_v3  ;;  %4757 = vmatpush3.bf16.msra.mxu1 %v4756_v1  ;;  %v4759_v3 = vpack.c.bf16 %v4158_v2, %v4157_v63 }
0x12d6   : > { %v2465_v5 = vpop.xlane.xlu0 %2464  ;;  %4758 = vmatprep.subr.bf16.mxu1 %v5173_v0 }
0x12d7   : > { %4981 = vpow2.f32 %v2471_v4  ;;  %v2468_v24 = vsub.f32 %v2453_v51, %v2465_v5 }
0x12d9   : > { %v2473_v6 = vmul.f32 1.442695, %v2468_v24  ;;  %4760 = vmatpush3.bf16.msra.mxu1 %v4759_v3 }
0x12da   : > { %v2695_v27 = vpop.xlane.xlu0 %2694  ;;  %4767 = vmatprep.subr.bf16.mxu1 %v5173_v0 }
0x12db   : > { %4983 = vpow2.f32 %v2473_v6  ;;  %v2702_v7 = vsub.f32 %v2679_v53, %v2695_v27 }
0x12dd   : > { %v4980_v8 = vpop.eup %4979  ;;  %v2705_v9 = vmul.f32 1.442695, %v2702_v7 }
0x12de   : > { %v2698_v10 = vpop.xlane.xlu1 %2697  ;;  %v2475_v11 = vsel %vm1409_vm7, %v4980_v8, 0.0 }
0x12df   : > { %4985 = vpow2.f32 %v2705_v9  ;;  %v2703_v12 = vsub.f32 %v2684_v31, %v2698_v10  ;;  %2476 = vadd.xlane.f32.xlu1 %v2475_v11 }
0x12e1   : > { %v4982_v13 = vpop.eup %4981  ;;  %v2707_v14 = vmul.f32 1.442695, %v2703_v12 }
0x12e2   : > { %v2701_v15 = vpop.xlane.xlu0 %2700  ;;  %v2478_v17 = vsel %vm1409_vm7, %v4982_v13, 0.0  ;;  %v2495_v39 = vpop.permute.xlu1 %2494 }
0x12e3   : > { %4987 = vpow2.f32 %v2707_v14  ;;  %v2704_v18 = vsub.f32 %v2689_v59, %v2701_v15  ;;  %2479 = vadd.xlane.f32.xlu0 %v2478_v17 }
0x12e5   : > { %v4984_v20 = vpop.eup %4983  ;;  %v2709_v23 = vmul.f32 1.442695, %v2704_v18 }
0x12e6   : > { %v4907_v28 = vpop.permute.xlu0 %4906  ;;  %v2481_v30 = vsel %vm1416_vm8, %v4984_v20, 0.0 }
0x12e7   : > { %4989 = vpow2.f32 %v2709_v23  ;;  %v4909_v35 = vunpack.i.h.bf16 %v4907_v28  ;;  %v4908_v36 = vunpack.i.l.bf16 %v4907_v28  ;;  %2482 = vadd.xlane.f32.xlu1 %v2481_v30  ;;  %v4160_v28 = vld [vmem:[%s5294_s13 + $0x1] ss:$0 sm:$0xff] }
0x12e9   : > { %v4986_v26 = vpop.eup %4985  ;;  %v4746_v37 = vpack.c.bf16 %v4909_v35, %v4908_v36 }
0x12ea   : > { %v2711_v33 = vsel %vm1409_vm7, %v4986_v26, 0.0 }
0x12eb   : > { %2712 = vadd.xlane.f32.xlu0 %v2711_v33  ;;  %4747 = vmatpush3.bf16.msra.mxu0 %v4746_v37 }
0x12ec   : > { %4517 = vmatprep.subr.mxu0 %v5175_v55 }
0x12ed   : > { %v4988_v38 = vpop.eup %4987 }
0x12ee   : > { %v2714_v40 = vsel %vm1409_vm7, %v4988_v38, 0.0 }
0x12ef   : > { %2715 = vadd.xlane.f32.xlu1 %v2714_v40  ;;  %4518 = vmatpush3.msk.msra.mxu0 %vm1072_vm1, %v2495_v39 }
0x12f0   : > { %4752 = vmatprep.subr.bf16.mxu0 %v5173_v0 }
0x12f1   : > { %v4990_v41 = vpop.eup %4989 }
0x12f2   : > { %v2717_v25 = vsel %vm1416_vm8, %v4990_v41, 0.0  ;;  %vm3952_vm8 = vcmask 48128  }
0x12f3   : > { %2718 = vadd.xlane.f32.xlu1 %v2717_v25 }
0x1301   : > { %2730 = vrot.lane.b32.xlu0 %v5743_v22, %s5180_s2 }
0x1304   : > { %4911 = vrot.lane.b32.xlu1 %v5741_v19, %s5180_s2  ;;  %s6039_s2 = sld [smem:[#allocation12_spill]] }
0x136c   : > { %v2477_v42 = vpop.xlane.xlu1 %2476 }
0x136d   : > { %4991 = vrcp.f32 %v2477_v42 }
0x1370   : > { %v2480_v34 = vpop.xlane.xlu0 %2479 }
0x1371   : > { %4993 = vrcp.f32 %v2480_v34 }
0x1374   : > { %v2483_v43 = vpop.xlane.xlu1 %2482 }
0x1375   : > { %4995 = vrcp.f32 %v2483_v43 }
0x1377   : > { %v4992_v44 = vpop.eup %4991 }
0x1378   : > { %v2487_v45 = vmul.f32 %v4992_v44, %v4980_v8  ;;  %v2713_v47 = vpop.xlane.xlu0 %2712 }
0x1379   : > { %4997 = vrcp.f32 %v2713_v47 }
0x137a   : > { %4520 = vmatmul.mubr.msk.f32.vlgmr.msra.gmra.mrb[22].mxu0 %vm1409_vm7, %v2487_v45 }
0x137b   : > { %v4994_v46 = vpop.eup %4993  ;;  %4522 = vmatprep.mubr.msk.f32.mxu0 %vm5174_vm4, %v5175_v55 }
0x137c   : > { %v2716_v48 = vpop.xlane.xlu1 %2715  ;;  %v2488_v22 = vmul.f32 %v4994_v46, %v4982_v13  ;;  %v2731_v31 = vpop.permute.xlu0 %2730 }
0x137d   : > { %4999 = vrcp.f32 %v2716_v48 }
0x137e   : > { %4523 = vmatmul.mubr.msk.f32.gmra.mrb[24].mxu0 %vm1409_vm7, %v2488_v22 }
0x137f   : > { %v4996_v19 = vpop.eup %4995  ;;  %4525 = vmatprep.mubr.msk.f32.mxu0 %vm5174_vm4, %v5175_v55 }
0x1380   : > { %v2719_v49 = vpop.xlane.xlu1 %2718  ;;  %v2489_v50 = vmul.f32 %v4996_v19, %v4984_v20 }
0x1381   : > { %5001 = vrcp.f32 %v2719_v49 }
0x1382   : > { %4526 = vmatmul.mubr.msk.f32.gmra.mrb[26].mxu0 %vm1409_vm7, %v2489_v50 }
0x1383   : > { %4549 = vmatprep.mubr.msk.f32.mxu0 %vm5174_vm4, %v5175_v55  ;;  %v4998_v54 = vpop.eup %4997 }
0x1384   : > { %v4912_v51 = vpop.permute.xlu1 %4911  ;;  %v2723_v56 = vmul.f32 %v4998_v54, %v4986_v26  ;;  %v4168_v54 = vld [vmem:[%s5239_s14 + $0x20] sm:$0xff] }
0x1385   : > { %v4914_v32 = vunpack.i.h.bf16 %v4912_v51  ;;  %v4913_v52 = vunpack.i.l.bf16 %v4912_v51 }
0x1387   : > { %v4753_v53 = vpack.c.bf16 %v4914_v32, %v4913_v52  ;;  %v5000_v57 = vpop.eup %4999 }
0x1388   : > { %v2724_v58 = vmul.f32 %v5000_v57, %v4988_v38  ;;  %v4170_v57 = vld [vmem:[%s5239_s14 + $0x30] sm:$0xff] }
0x1389   : > { %4754 = vmatpush3.bf16.msra.mxu0 %v4753_v53 }
0x138a   : > { %4547 = vmatprep.subr.mxu0 %v5175_v55 }
0x138b   : > { %v5002_v59 = vpop.eup %5001 }
0x138c   : > { %v2725_v60 = vmul.f32 %v5002_v59, %v4990_v41 }
0x138d   : > { %4548 = vmatpush3.msk.msra.mxu0 %vm1072_vm1, %v2731_v31  ;;  %vm3851_vm1 = vcmask 23552  }
0x138e   : > { %4550 = vmatmul.mubr.msk.f32.vlgmr.msra.gmra.mrb[28].mxu0 %vm1409_vm7, %v2723_v56  ;;  %4761 = vmatprep.subr.bf16.mxu0 %v5173_v0  ;;  %v4169_v56 = vld [vmem:[%s5239_s14 + $0x28] sm:$0xff] }
0x138f   : > { %4552 = vmatprep.mubr.msk.f32.mxu0 %vm5174_vm4, %v5175_v55  ;;  %v4762_v31 = vpack.c.bf16 %v4169_v56, %v4168_v54 }
0x1391   : > { %4763 = vmatpush3.bf16.msra.mxu0 %v4762_v31 }
0x1392   : > { %4553 = vmatmul.mubr.msk.f32.gmra.mrb[30].mxu0 %vm1409_vm7, %v2724_v58  ;;  %4764 = vmatprep.subr.bf16.mxu0 %v5173_v0  ;;  %v4171_v58 = vld [vmem:[%s5239_s14 + $0x38] sm:$0xff] }
0x1393   : > { %4555 = vmatprep.mubr.msk.f32.mxu0 %vm5174_vm4, %v5175_v55  ;;  %v4765_v59 = vpack.c.bf16 %v4171_v58, %v4170_v57 }
0x1395   : > { %4766 = vmatpush3.bf16.msra.mxu0 %v4765_v59 }
0x1396   : > { %4556 = vmatmul.mubr.msk.f32.gmra.mrb[32].mxu0 %vm1409_vm7, %v2725_v60  ;;  %vm3947_vm7 = vcmask 7168  }
0x1397   : > { %4583 = vmatprep.mubr.msk.f32.mxu0 %vm5174_vm4, %v5175_v55 }
0x144d   : > { %v2575_v4 = vpop.f32.mrb[22].mxu0 }
0x144e   : > { %v4521_v5 = vpop.f32.mrb[23].mxu0 }
0x1451   : > { %v2580_v24 = vpop.f32.mrb[24].mxu0 }
0x1452   : > { %v4524_v6 = vpop.f32.mrb[25].mxu0 }
0x1453   : > { %v4166_v6 = vld [vmem:[%s5279_s4 + $0x1] ss:$0 sm:$0xff] }
0x1455   : > { %v2585_v27 = vpop.f32.mrb[26].mxu0 }
0x1456   : > { %v4527_v7 = vpop.f32.mrb[27].mxu0 }
0x1457   : > { %v4167_v7 = vld [vmem:[%s5274_s27 + $0x1] ss:$0 sm:$0xff] }
0x1461   : > { %v2811_v8 = vpop.f32.mrb[28].mxu0 }
0x1462   : > { %2828 = vrot.lane.b32.xlu1 %v2811_v8, %s5181_s7  ;;  %v4551_v9 = vpop.f32.mrb[29].mxu0 }
0x1465   : > { %v2816_v10 = vpop.f32.mrb[30].mxu0 }
0x1466   : > { %2830 = vrot.lane.b32.xlu0 %v2816_v10, %s5181_s7  ;;  %v4554_v11 = vpop.f32.mrb[31].mxu0 }
0x1469   : > { %v2821_v12 = vpop.f32.mrb[32].mxu0 }
0x146a   : > { %2832 = vrot.lane.b32.xlu1 %v2821_v12, %s5181_s7  ;;  %v4557_v13 = vpop.f32.mrb[33].mxu0  ;;  %s6040_s7 = sld [smem:[#allocation9_spill]] }
0x14d4   : > { %v2829_v14 = vpop.permute.xlu1 %2828 }
0x14d5   : > { %v2837_v15 = vsel %vm1313_vm5, %v2575_v4, %v2829_v14 }
0x14d6   : > { %4567 = vmatmul.mubr.msk.f32.vlgmr.msra.gmra.mrb[48].mxu1 %vm1082_vm2, %v2837_v15 }
0x14d7   : > { %4569 = vmatprep.mubr.msk.f32.mxu1 %vm5174_vm4, %v5175_v55 }
0x14d8   : > { %v2831_v17 = vpop.permute.xlu0 %2830 }
0x14d9   : > { %v2838_v18 = vsel %vm1313_vm5, %v2580_v24, %v2831_v17 }
0x14da   : > { %4570 = vmatmul.mubr.msk.f32.gmra.mrb[50].mxu1 %vm1082_vm2, %v2838_v18 }
0x14db   : > { %4572 = vmatprep.mubr.msk.f32.mxu1 %vm5174_vm4, %v5175_v55 }
0x14dc   : > { %v2833_v20 = vpop.permute.xlu1 %2832 }
0x14dd   : > { %v2839_v23 = vsel %vm1313_vm5, %v2585_v27, %v2833_v20  ;;  %v4177_v20 = vld [vmem:[%s5249_s24 + $0x40] sm:$0xff] }
0x14de   : > { %4573 = vmatmul.mubr.msk.f32.gmra.mrb[52].mxu1 %vm1082_vm2, %v2839_v23  ;;  %v4178_v23 = vld [vmem:[%s5249_s24 + $0x48] sm:$0xff] }
0x14df   : > { %4608 = vmatprep.mubr.msk.f32.mxu1 %vm5174_vm4, %v5175_v55 }
0x15a9   : > { %v2928_v30 = vpop.f32.mrb[48].mxu1 }
0x15aa   : > { %v2929_v35 = vadd.f32 %v4160_v28, %v2928_v30  ;;  %v4568_v36 = vpop.f32.mrb[49].mxu1  ;;  %v4179_v30 = vld [vmem:[%s5249_s24 + $0x50] sm:$0xff] }
0x15ac   : > { %v5852_v26 = vadd.f32 %v2929_v35, %v5703_v16  ;;  %v4180_v35 = vld [vmem:[%s5249_s24 + $0x58] sm:$0xff] }
0x15ad   : > { %v2933_v37 = vpop.f32.mrb[50].mxu1  ;;  %v4771_v36 = vpack.c.bf16 %v4180_v35, %v4179_v30 }
0x15ae   : > { %v2934_v33 = vadd.f32 %v4160_v28, %v2933_v37  ;;  %v4571_v38 = vpop.f32.mrb[51].mxu1  ;;  %v2949_v39 = vsel %vm1082_vm2, %v5852_v26, 0.0  ;;  %v4181_v37 = vld [vmem:[%s5249_s24 + $0x60] sm:$0xff] }
0x15af   : > { %2950 = vadd.xlane.f32.xlu0 %v2949_v39  ;;  %v4183_v39 = vld [vmem:[%s5249_s24 + $0x70] sm:$0xff] }
0x15b0   : > { %v5857_v40 = vadd.f32 %v2934_v33, %v5708_v21  ;;  %v4182_v33 = vld [vmem:[%s5249_s24 + $0x68] sm:$0xff] }
0x15b1   : > { %v2938_v41 = vpop.f32.mrb[52].mxu1  ;;  %v4774_v38 = vpack.c.bf16 %v4182_v33, %v4181_v37 }
0x15b2   : > { %v2939_v25 = vadd.f32 %v4160_v28, %v2938_v41  ;;  %v4574_v42 = vpop.f32.mrb[53].mxu1  ;;  %v2952_v34 = vsel %vm1082_vm2, %v5857_v40, 0.0  ;;  %v4768_v28 = vpack.c.bf16 %v4178_v23, %v4177_v20  ;;  %v4184_v41 = vld [vmem:[%s5249_s24 + $0x78] sm:$0xff] }
0x15b3   : > { %2953 = vadd.xlane.f32.xlu1 %v2952_v34  ;;  %v4173_v42 = vld [vmem:[%s5234_s8 + $0x1] ss:$0 sm:$0xff] }
0x15b4   : > { %v5862_v16 = vadd.f32 %v2939_v25, %v5713_v29  ;;  %4769 = vmatpush3.bf16.msra.mxu1 %v4768_v28  ;;  %v4777_v25 = vpack.c.bf16 %v4184_v41, %v4183_v39 }
0x15b5   : > { %4770 = vmatprep.subr.bf16.mxu1 %v5173_v0 }
0x15b6   : > { %v2955_v43 = vsel %vm1089_vm3, %v5862_v16, 0.0 }
0x15b7   : > { %2956 = vadd.xlane.f32.xlu0 %v2955_v43 }
0x15b8   : > { %4772 = vmatpush3.bf16.msra.mxu1 %v4771_v36 }
0x15b9   : > { %4773 = vmatprep.subr.bf16.mxu1 %v5173_v0 }
0x15bc   : > { %4775 = vmatpush3.bf16.msra.mxu1 %v4774_v38 }
0x15bd   : > { %4776 = vmatprep.subr.bf16.mxu1 %v5173_v0 }
0x15c0   : > { %4778 = vmatpush3.bf16.msra.mxu1 %v4777_v25 }
0x163c   : > { %v2951_v44 = vpop.xlane.xlu0 %2950 }
0x163d   : > { %v2958_v45 = vmul.f32 0.03125, %v2951_v44 }
0x163f   : > { %v2961_v46 = vsub.f32 %v5852_v26, %v2958_v45 }
0x1640   : > { %v2954_v21 = vpop.xlane.xlu1 %2953 }
0x1641   : > { %v2959_v47 = vmul.f32 0.03125, %v2954_v21  ;;  %v2964_v48 = vmul.f32 %v2961_v46, %v2961_v46 }
0x1643   : > { %v2962_v22 = vsub.f32 %v5857_v40, %v2959_v47  ;;  %v2967_v19 = vsel %vm1082_vm2, %v2964_v48, 0.0 }
0x1644   : > { %2968 = vadd.xlane.f32.xlu0 %v2967_v19  ;;  %v2957_v29 = vpop.xlane.xlu0 %2956 }
0x1645   : > { %v2960_v49 = vmul.f32 0.03125, %v2957_v29  ;;  %v2965_v50 = vmul.f32 %v2962_v22, %v2962_v22 }
0x1647   : > { %v2963_v51 = vsub.f32 %v5862_v16, %v2960_v49  ;;  %v2970_v32 = vsel %vm1082_vm2, %v2965_v50, 0.0 }
0x1648   : > { %2971 = vadd.xlane.f32.xlu0 %v2970_v32 }
0x1649   : > { %v2966_v52 = vmul.f32 %v2963_v51, %v2963_v51 }
0x164b   : > { %v2973_v53 = vsel %vm1089_vm3, %v2966_v52, 0.0 }
0x164c   : > { %2974 = vadd.xlane.f32.xlu1 %v2973_v53 }
0x16d1   : > { %v2969_v60 = vpop.xlane.xlu0 %2968 }
0x16d2   : > { %v2976_v61 = vmul.f32 0.03125, %v2969_v60 }
0x16d4   : > { %v2979_v62 = vadd.f32 1e-05, %v2976_v61 }
0x16d5   : > { %v2972_v63 = vpop.xlane.xlu0 %2971 }
0x16d6   : > { %5003 = vrsqrt.f32 %v2979_v62  ;;  %v2977_v1 = vmul.f32 0.03125, %v2972_v63 }
0x16d8   : > { %v2980_v2 = vadd.f32 1e-05, %v2977_v1 }
0x16d9   : > { %v2975_v3 = vpop.xlane.xlu1 %2974 }
0x16da   : > { %5005 = vrsqrt.f32 %v2980_v2  ;;  %v2978_v4 = vmul.f32 0.03125, %v2975_v3  ;;  %v4186_v3 = vld [vmem:[%s6030_s10 + $0x1] ss:$0 sm:$0xff] }
0x16dc   : > { %v2981_v5 = vadd.f32 1e-05, %v2978_v4 }
0x16de   : > { %5007 = vrsqrt.f32 %v2981_v5 }
0x16e0   : > { %v5004_v24 = vpop.eup %5003 }
0x16e1   : > { %v2985_v27 = vmul.f32 %v5004_v24, %v2961_v46 }
0x16e3   : > { %v2994_v8 = vmul.f32 %v4166_v6, %v2985_v27 }
0x16e4   : > { %v5006_v9 = vpop.eup %5005 }
0x16e5   : > { %v3003_v10 = vadd.f32 %v4167_v7, %v2994_v8  ;;  %v2986_v11 = vmul.f32 %v5006_v9, %v2962_v22 }
0x16e7   : > { %4584 = vmatmul.mubr.msk.f32.vlgmr.msra.gmra.mrb[34].mxu0 %vm1082_vm2, %v3003_v10  ;;  %v2995_v12 = vmul.f32 %v4166_v6, %v2986_v11 }
0x16e8   : > { %v5008_v13 = vpop.eup %5007  ;;  %4586 = vmatprep.mubr.msk.f32.mxu0 %vm5174_vm4, %v5175_v55 }
0x16e9   : > { %v3004_v14 = vadd.f32 %v4167_v7, %v2995_v12  ;;  %v2987_v15 = vmul.f32 %v5008_v13, %v2963_v51 }
0x16eb   : > { %4587 = vmatmul.mubr.msk.f32.gmra.mrb[36].mxu0 %vm1082_vm2, %v3004_v14  ;;  %v2996_v17 = vmul.f32 %v4166_v6, %v2987_v15 }
0x16ec   : > { %4589 = vmatprep.mubr.msk.f32.mxu0 %vm5174_vm4, %v5175_v55 }
0x16ed   : > { %v3005_v18 = vadd.f32 %v4167_v7, %v2996_v17 }
0x16ef   : > { %4590 = vmatmul.mubr.msk.f32.gmra.mrb[38].mxu0 %vm1082_vm2, %v3005_v18 }
0x17ba   : > { %v3094_v34 = vpop.f32.mrb[34].mxu0 }
0x17bb   : > { %v3095_v43 = vadd.f32 %v4173_v42, %v3094_v34  ;;  %v4585_v44 = vpop.f32.mrb[35].mxu0 }
0x17bd   : > { %v3108_v45 = vmul.f32 1.702, %v3095_v43 }
0x17be   : > { %v3099_v46 = vpop.f32.mrb[36].mxu0 }
0x17bf   : > { %v3111_v21 = vsub.f32 0.0, %v3108_v45  ;;  %v3100_v47 = vadd.f32 %v4173_v42, %v3099_v46  ;;  %v4588_v48 = vpop.f32.mrb[37].mxu0 }
0x17c1   : > { %v3114_v22 = vmul.f32 1.442695, %v3111_v21  ;;  %v3109_v19 = vmul.f32 1.702, %v3100_v47  ;;  %v3300_v21 = vlaneseq }
0x17c2   : > { %v3104_v29 = vpop.f32.mrb[38].mxu0 }
0x17c3   : > { %5009 = vpow2.f32 %v3114_v22  ;;  %v3112_v49 = vsub.f32 0.0, %v3109_v19  ;;  %v3105_v50 = vadd.f32 %v4173_v42, %v3104_v29  ;;  %v4591_v0 = vpop.f32.mrb[39].mxu0  ;;  %v3301_v48 = vshrl.u32 %v3300_v21, 7  ;;  %v4190_v19 = vld [vmem:[%s6031_s11] ss:$0 sm:$0xff]  ;;  %s6041_s11 = sld [smem:[#allocation11_spill]] }
0x17c5   : > { %v3116_v51 = vmul.f32 1.442695, %v3112_v49  ;;  %v3110_v32 = vmul.f32 1.702, %v3105_v50  ;;  %v4191_v49 = vld [vmem:[%s6032_s18] ss:$0 sm:$0xff] }
0x17c6   : > { %v3302_v0 = vsub.s32 0, %v3301_v48  ;;  %s6042_s18 = sld [smem:[#allocation13_spill]] }
0x17c7   : > { %5011 = vpow2.f32 %v3116_v51  ;;  %v3113_v52 = vsub.f32 0.0, %v3110_v32 }
0x17c9   : > { %v3118_v53 = vmul.f32 1.442695, %v3113_v52 }
0x17cb   : > { %5013 = vpow2.f32 %v3118_v53 }
0x17cd   : > { %v5010_v54 = vpop.eup %5009 }
0x17ce   : > { %v3120_v56 = vadd.f32 1.0, %v5010_v54 }
0x17d0   : > { %5015 = vrcp.f32 %v3120_v56 }
0x17d1   : > { %v5012_v31 = vpop.eup %5011 }
0x17d2   : > { %v3121_v57 = vadd.f32 1.0, %v5012_v31 }
0x17d4   : > { %5017 = vrcp.f32 %v3121_v57 }
0x17d5   : > { %v5014_v58 = vpop.eup %5013 }
0x17d6   : > { %v3122_v59 = vadd.f32 1.0, %v5014_v58 }
0x17d8   : > { %5019 = vrcp.f32 %v3122_v59 }
0x17da   : > { %v5016_v60 = vpop.eup %5015 }
0x17db   : > { %v3129_v61 = vmul.f32 %v5016_v60, %v3095_v43 }
0x17dd   : > { %4609 = vmatmul.mubr.msk.f32.vlgmr.msra.gmra.mrb[54].mxu1 %vm988_vm0, %v3129_v61 }
0x17de   : > { %v5018_v62 = vpop.eup %5017  ;;  %4611 = vmatprep.mubr.msk.f32.mxu1 %vm5174_vm4, %v5175_v55 }
0x17df   : > { %v3130_v63 = vmul.f32 %v5018_v62, %v3100_v47 }
0x17e1   : > { %4612 = vmatmul.mubr.msk.f32.gmra.mrb[56].mxu1 %vm988_vm0, %v3130_v63 }
0x17e2   : > { %v5020_v1 = vpop.eup %5019  ;;  %4614 = vmatprep.mubr.msk.f32.mxu1 %vm5174_vm4, %v5175_v55 }
0x17e3   : > { %v3131_v2 = vmul.f32 %v5020_v1, %v3105_v50 }
0x17e5   : > { %4615 = vmatmul.mubr.msk.f32.gmra.mrb[58].mxu1 %vm988_vm0, %v3131_v2 }
0x18b0   : > { %v3224_v4 = vpop.f32.mrb[54].mxu1 }
0x18b1   : > { %v3225_v5 = vadd.f32 %v4186_v3, %v3224_v4  ;;  %v4610_v24 = vpop.f32.mrb[55].mxu1 }
0x18b3   : > { %v3238_v6 = vadd.f32 %v3225_v5, %v5852_v26 }
0x18b4   : > { %v3229_v27 = vpop.f32.mrb[56].mxu1 }
0x18b5   : > { %v3230_v7 = vadd.f32 %v4186_v3, %v3229_v27  ;;  %v4613_v8 = vpop.f32.mrb[57].mxu1  ;;  %v3243_v9 = vsel %vm1082_vm2, %v3238_v6, 0.0 }
0x18b6   : > { %3244 = vadd.xlane.f32.xlu0 %v3243_v9 }
0x18b7   : > { %v3239_v10 = vadd.f32 %v3230_v7, %v5857_v40 }
0x18b8   : > { %v3234_v11 = vpop.f32.mrb[58].mxu1 }
0x18b9   : > { %v3235_v12 = vadd.f32 %v4186_v3, %v3234_v11  ;;  %v4616_v55 = vpop.f32.mrb[59].mxu1  ;;  %v3246_v13 = vsel %vm1082_vm2, %v3239_v10, 0.0 }
0x18ba   : > { %3247 = vadd.xlane.f32.xlu1 %v3246_v13 }
0x18bb   : > { %v3240_v14 = vadd.f32 %v3235_v12, %v5862_v16 }
0x18bd   : > { %v3249_v15 = vsel %vm1089_vm3, %v3240_v14, 0.0 }
0x18be   : > { %3250 = vadd.xlane.f32.xlu0 %v3249_v15  ;;  %v3367_v15 = vld [vmem:[%s6033_s0] sm:$0xff] }
0x1943   : > { %v3245_v26 = vpop.xlane.xlu0 %3244 }
0x1944   : > { %v3252_v17 = vmul.f32 0.03125, %v3245_v26  ;;  %v3368_v26 = vld [vmem:[%s6033_s0 + $0x8] sm:$0xff] }
0x1946   : > { %v3255_v18 = vsub.f32 %v3238_v6, %v3252_v17  ;;  %v4779_v17 = vpack.c.bf16 %v3368_v26, %v3367_v15 }
0x1947   : > { %v3248_v20 = vpop.xlane.xlu1 %3247 }
0x1948   : > { %v3253_v23 = vmul.f32 0.03125, %v3248_v20  ;;  %v3258_v28 = vmul.f32 %v3255_v18, %v3255_v18  ;;  %v3370_v20 = vld [vmem:[%s6033_s0 + $0x18] sm:$0xff]  ;;  %4780 = vmatprep.subr.bf16.mxu0 %v4779_v17 }
0x1949   : > { %4782 = vmatpush3.bf16.msra.mxu0 %v4779_v17 }
0x194a   : > { %v3256_v30 = vsub.f32 %v3239_v10, %v3253_v23  ;;  %v3261_v40 = vsel %vm1082_vm2, %v3258_v28, 0.0 }
0x194b   : > { %3262 = vadd.xlane.f32.xlu1 %v3261_v40  ;;  %v3251_v35 = vpop.xlane.xlu0 %3250 }
0x194c   : > { %v3254_v36 = vmul.f32 0.03125, %v3251_v35  ;;  %v3259_v37 = vmul.f32 %v3256_v30, %v3256_v30 }
0x194e   : > { %v3257_v33 = vsub.f32 %v3240_v14, %v3254_v36  ;;  %v3264_v38 = vsel %vm1082_vm2, %v3259_v37, 0.0 }
0x194f   : > { %3265 = vadd.xlane.f32.xlu0 %v3264_v38 }
0x1950   : > { %v3260_v16 = vmul.f32 %v3257_v33, %v3257_v33 }
0x1952   : > { %v3267_v39 = vsel %vm1089_vm3, %v3260_v16, 0.0 }
0x1953   : > { %3268 = vadd.xlane.f32.xlu1 %v3267_v39 }
0x19d8   : > { %v3263_v41 = vpop.xlane.xlu1 %3262 }
0x19d9   : > { %v3270_v25 = vmul.f32 0.03125, %v3263_v41  ;;  %v4192_v41 = vld [vmem:[%s6034_s22] ss:$0 sm:$0xff]  ;;  %s5184_s22 = smov 126  }
0x19db   : > { %v3273_v42 = vadd.f32 1e-05, %v3270_v25 }
0x19dc   : > { %v3266_v34 = vpop.xlane.xlu0 %3265 }
0x19dd   : > { %5021 = vrsqrt.f32 %v3273_v42  ;;  %v3271_v43 = vmul.f32 0.03125, %v3266_v34  ;;  %v4193_v34 = vld [vmem:[%s6035_s26] ss:$0 sm:$0xff]  ;;  %s5185_s26 = smov 2  }
0x19df   : > { %v3274_v44 = vadd.f32 1e-05, %v3271_v43 }
0x19e0   : > { %v3269_v45 = vpop.xlane.xlu1 %3268 }
0x19e1   : > { %5023 = vrsqrt.f32 %v3274_v44  ;;  %v3272_v46 = vmul.f32 0.03125, %v3269_v45 }
0x19e3   : > { %v3275_v47 = vadd.f32 1e-05, %v3272_v46 }
0x19e5   : > { %5025 = vrsqrt.f32 %v3275_v47 }
0x19e7   : > { %v5022_v22 = vpop.eup %5021 }
0x19e8   : > { %v3279_v29 = vmul.f32 %v5022_v22, %v3255_v18  ;;  %v3369_v18 = vld [vmem:[%s6033_s0 + $0x10] sm:$0xff] }
0x19e9   : > { %v4783_v23 = vpack.c.bf16 %v3370_v20, %v3369_v18 }
0x19ea   : > { %v3288_v50 = vmul.f32 %v4190_v19, %v3279_v29 }
0x19eb   : > { %v5024_v51 = vpop.eup %5023  ;;  %4784 = vmatprep.subr.bf16.mxu0 %v4783_v23 }
0x19ec   : > { %v3297_v32 = vadd.f32 %v4191_v49, %v3288_v50  ;;  %v3280_v52 = vmul.f32 %v5024_v51, %v3256_v30  ;;  %4786 = vmatpush3.bf16.msra.mxu0 %v4783_v23 }
0x19ee   : > { %v3303_v53 = vrot.slane %v3297_v32, %v3302_v0  ;;  %v3289_v54 = vmul.f32 %v4190_v19, %v3280_v52  ;;  %v5182_v52 = vmov 64  }
0x19ef   : > { %v5026_v56 = vpop.eup %5025  ;;  %4916 = vset.pattern.permute.xlu1 %v5182_v52  ;;  %4915 = vset.pattern.permute.xlu0 %v5182_v52 }
0x19f0   : > { %v3304_v31 = vmul.f32 %v3303_v53, %v3297_v32  ;;  %v3298_v57 = vadd.f32 %v4191_v49, %v3289_v54  ;;  %v3281_v58 = vmul.f32 %v5026_v56, %v3257_v33  ;;  %v3634_v54 = vld [vmem:[%s6036_s28 + $0x8] sm:$0xff]  ;;  %v3635_v56 = vld [vmem:[%s6036_s28 + $0x10] sm:$0xff] }
0x19f2   : > { %v3310_v59 = vsel %vm3309_vm9, %v3304_v31, 0.0  ;;  %v3305_v60 = vmul.f32 %v3303_v53, %v3298_v57  ;;  %v3290_v61 = vmul.f32 %v4190_v19, %v3281_v58  ;;  %v3636_v57 = vld [vmem:[%s6036_s28 + $0x18] sm:$0xff] }
0x19f3   : > { %3311 = vadd.xlane.f32.xlu0 %v3310_v59  ;;  %v4791_v58 = vpack.c.bf16 %v3636_v57, %v3635_v56  ;;  %v4194_v59 = vld [vmem:[%s6037_s1] ss:$0 sm:$0xff]  ;;  %s4211_s1 = sshll.u32 %s6044_s16, 4 }
0x19f4   : > { %v3313_v62 = vsel %vm1082_vm2, %v3305_v60, 0.0  ;;  %v3299_v63 = vadd.f32 %v4191_v49, %v3290_v61  ;;  %v3747_v57 = vld [vmem:[%s6039_s2] sm:$0xff] }
0x19f5   : > { %3314 = vadd.xlane.f32.xlu1 %v3313_v62 }
0x19f6   : > { %v3306_v1 = vmul.f32 %v3303_v53, %v3299_v63  ;;  %v3633_v53 = vld [vmem:[%s6036_s28] sm:$0xff] }
0x19f8   : > { %v3316_v2 = vsel %vm1089_vm3, %v3306_v1, 0.0 }
0x19f9   : > { %3317 = vadd.xlane.f32.xlu0 %v3316_v2 }
0x1a80   : > { %v3312_v3 = vpop.xlane.xlu0 %3311 }
0x1a81   : > { %v3319_v4 = vmul.f32 0.03125, %v3312_v3 }
0x1a82   : > { %v3315_v5 = vpop.xlane.xlu1 %3314 }
0x1a83   : > { %v3322_v24 = vsub.f32 %v3304_v31, %v3319_v4  ;;  %v3320_v6 = vmul.f32 0.03125, %v3315_v5  ;;  %v4787_v31 = vpack.c.bf16 %v3634_v54, %v3633_v53 }
0x1a85   : > { %v3323_v27 = vsub.f32 %v3305_v60, %v3320_v6  ;;  %v3325_v7 = vmul.f32 %v3322_v24, %v3322_v24  ;;  %4788 = vmatprep.subr.bf16.mxu1 %v4787_v31 }
0x1a86   : > { %v3318_v8 = vpop.xlane.xlu0 %3317  ;;  %4790 = vmatpush3.bf16.msra.mxu1 %v4787_v31 }
0x1a87   : > { %v3321_v9 = vmul.f32 0.03125, %v3318_v8  ;;  %v3328_v10 = vsel %vm3309_vm9, %v3325_v7, 0.0  ;;  %v3326_v11 = vmul.f32 %v3323_v27, %v3323_v27  ;;  %4792 = vmatprep.subr.bf16.mxu1 %v4791_v58  ;;  %vm3955_vm9 = vcmask 64512  }
0x1a88   : > { %3329 = vadd.xlane.f32.xlu1 %v3328_v10 }
0x1a89   : > { %v3324_v12 = vsub.f32 %v3306_v1, %v3321_v9  ;;  %v3331_v55 = vsel %vm1082_vm2, %v3326_v11, 0.0 }
0x1a8a   : > { %3332 = vadd.xlane.f32.xlu0 %v3331_v55  ;;  %4794 = vmatpush3.bf16.msra.mxu1 %v4791_v58  ;;  %v3748_v58 = vld [vmem:[%s6039_s2 + $0x8] sm:$0xff] }
0x1a8b   : > { %v3327_v13 = vmul.f32 %v3324_v12, %v3324_v12 }
0x1a8d   : > { %v3334_v14 = vsel %vm1089_vm3, %v3327_v13, 0.0 }
0x1a8e   : > { %3335 = vadd.xlane.f32.xlu1 %v3334_v14 }
0x1b15   : > { %v3330_v28 = vpop.xlane.xlu1 %3329 }
0x1b16   : > { %v3337_v30 = vmul.f32 0.03125, %v3330_v28 }
0x1b17   : > { %v3333_v40 = vpop.xlane.xlu0 %3332 }
0x1b18   : > { %v3340_v35 = vadd.f32 1e-05, %v3337_v30  ;;  %v3338_v36 = vmul.f32 0.03125, %v3333_v40 }
0x1b1a   : > { %5027 = vrsqrt.f32 %v3340_v35  ;;  %v3341_v37 = vadd.f32 1e-05, %v3338_v36 }
0x1b1b   : > { %v3336_v33 = vpop.xlane.xlu1 %3335 }
0x1b1c   : > { %5029 = vrsqrt.f32 %v3341_v37  ;;  %v3339_v38 = vmul.f32 0.03125, %v3336_v33 }
0x1b1e   : > { %v3342_v16 = vadd.f32 1e-05, %v3339_v38 }
0x1b20   : > { %5031 = vrsqrt.f32 %v3342_v16 }
0x1b24   : > { %v5028_v39 = vpop.eup %5027 }
0x1b25   : > { %v3346_v25 = vmul.f32 %v5028_v39, %v3322_v24  ;;  %v5183_v39 = vmov 65  }
0x1b26   : > { %v5030_v42 = vpop.eup %5029 }
0x1b27   : > { %v3347_v43 = vmul.f32 %v5030_v42, %v3323_v27  ;;  %v3355_v44 = vmul.f32 %v4192_v41, %v3346_v25 }
0x1b29   : > { %v3356_v45 = vmul.f32 %v4192_v41, %v3347_v43  ;;  %v3364_v46 = vadd.f32 %v4193_v34, %v3355_v44 }
0x1b2a   : > { %v5032_v47 = vpop.eup %5031 }
0x1b2b   : > { %v3348_v48 = vmul.f32 %v5032_v47, %v3324_v12  ;;  %v3365_v22 = vadd.f32 %v4193_v34, %v3356_v45  ;;  %v3382_v29 = vrot.slane %v3364_v46, 1 }
0x1b2d   : > { %v3357_v19 = vmul.f32 %v4192_v41, %v3348_v48  ;;  %v3383_v49 = vrot.slane %v3365_v22, 1 }
0x1b2f   : > { %v3366_v50 = vadd.f32 %v4193_v34, %v3357_v19  ;;  %v3384_v0 = vsel %vm3381_vm10, %v3382_v29, %v3383_v49 }
0x1b30   : > { %4625 = vmatprep.mubr.msk.f32.mxu0 %vm1082_vm2, %v3384_v0 }
0x1b31   : > { %v3385_v51 = vrot.slane %v3366_v50, 1 }
0x1b33   : > { %v3386_v32 = vsel %vm3381_vm10, %v3383_v49, %v3385_v51 }
0x1b34   : > { %4626 = vmatmul.mubr.msk.f32.vlgmr.msra.gmra.mrb[40].mxu0 %vm1082_vm2, %v3386_v32 }
0x1c07   : > { %v4627_v60 = vpop.f32.mrb[40].mxu0 }
0x1c08   : > { %v5937_v61 = vadd.f32 %v4627_v60, %v4194_v59  ;;  %v3457_v62 = vpop.f32.mrb[41].mxu0  ;;  %v4795_v60 = vpack.c.bf16 %v3748_v58, %v3747_v57 }
0x1c09   : > { %v5939_v63 = vadd.f32 %v4194_v59, %v3457_v62  ;;  %v3749_v59 = vld [vmem:[%s6039_s2 + $0x10] sm:$0xff]  ;;  %v3750_v62 = vld [vmem:[%s6039_s2 + $0x18] sm:$0xff] }
0x1c0a   : > { %v3469_v1 = vmul.f32 0.044715, %v5937_v61  ;;  %v3467_v11 = vmul.f32 0.5, %v5937_v61  ;;  %v3485_v26 = vmul.f32 %v5937_v61, %v5937_v61  ;;  %v3516_v28 = vmin.f32 %v5937_v61, 0.0 }
0x1c0b   : > { %v3468_v2 = vmul.f32 0.044715, %v5939_v63  ;;  %v3466_v55 = vmul.f32 0.5, %v5939_v63  ;;  %v3515_v17 = vmin.f32 %v5939_v63, 0.0  ;;  %v3484_v20 = vmul.f32 %v5939_v63, %v5939_v63 }
0x1c0c   : > { %v3471_v3 = vmul.f32 %v3469_v1, %v5937_v61  ;;  %v3489_v18 = vsel %vm1082_vm2, %v3485_v26, 0.0  ;;  %v3519_v40 = vmul.f32 1.442695, %v3516_v28  ;;  %vm3513_vm11 = vcmp.gt.f32.partialorder %v5939_v63, 0.0 }
0x1c0d   : > { %v3470_v4 = vmul.f32 %v3468_v2, %v5939_v63  ;;  %v3517_v23 = vmul.f32 1.442695, %v3515_v17  ;;  %v3486_v30 = vsel %vm1082_vm2, %v3484_v20, 0.0  ;;  %vm3514_vm12 = vcmp.gt.f32.partialorder %v5937_v61, 0.0  ;;  %v4202_v2 = vld [vmem:[%s6040_s7] ss:$0 sm:$0xff] }
0x1c0e   : > { %v3473_v5 = vmul.f32 %v3471_v3, %v5937_v61  ;;  %v4799_v1 = vpack.c.bf16 %v3750_v62, %v3749_v59 }
0x1c0f   : > { %v3472_v24 = vmul.f32 %v3470_v4, %v5939_v63 }
0x1c10   : > { %v3475_v6 = vadd.f32 %v3473_v5, %v5937_v61 }
0x1c11   : > { %v3474_v27 = vadd.f32 %v3472_v24, %v5939_v63 }
0x1c12   : > { %v3477_v7 = vmul.f32 0.7978846, %v3475_v6 }
0x1c13   : > { %v3476_v8 = vmul.f32 0.7978846, %v3474_v27 }
0x1c14   : > { %5033 = vtanh.f32 %v3477_v7 }
0x1c15   : > { %5035 = vtanh.f32 %v3476_v8 }
0x1c16   : > { %5037 = vpow2.f32 %v3517_v23 }
0x1c17   : > { %5039 = vpow2.f32 %v3519_v40 }
0x1c1e   : > { %v5034_v9 = vpop.eup %5033 }
0x1c1f   : > { %v5036_v10 = vpop.eup %5035  ;;  %v3481_v12 = vadd.f32 1.0, %v5034_v9 }
0x1c20   : > { %v3480_v13 = vadd.f32 1.0, %v5036_v10  ;;  %v5038_v35 = vpop.eup %5037 }
0x1c21   : > { %v3483_v14 = vmul.f32 %v3481_v12, %v3467_v11  ;;  %v4197_v36 = vadd.f32 -1.0, %v5038_v35  ;;  %v5040_v37 = vpop.eup %5039 }
0x1c22   : > { %v3482_v15 = vmul.f32 %v3480_v13, %v3466_v55  ;;  %v4198_v38 = vadd.f32 -1.0, %v5040_v37 }
0x1c23   : > { %3648 = vrot.lane.b32.xlu1 %v3483_v14, %s5176_s23  ;;  %v3523_v33 = vsel %vm3513_vm11, %v5939_v63, %v4197_v36 }
0x1c24   : > { %3646 = vrot.lane.b32.xlu0 %v3482_v15, %s5176_s23  ;;  %s6038_s23 = sld [smem:[#allocation8_spill]]  ;;  %v3525_v16 = vadd.f32 1.0, %v3523_v33  ;;  %v3524_v41 = vsel %vm3514_vm12, %v5937_v61, %v4198_v38 }
0x1c25   : > { %v3526_v25 = vadd.f32 1.0, %v3524_v41 }
0x1c2a   : > { %v3512_v42 = vld [vmem:[%s6038_s23] sm:$0x7]  ;;  %s956_s23 = scalar_lea.vmem %s5344_s19, %s4211_s1 }
0x1c2b   : > { %4628 = vmatprep.subr.msk.mxu0 %vm1082_vm2, %v3512_v42 }
0x1c2c   : > { %4629 = vmatpush3.xpose.msk.msra.mxu0 %vm1082_vm2, %v3512_v42 }
0x1c2d   : > { %4796 = vmatprep.subr.bf16.mxu0 %v4795_v60 }
0x1c43   : > { %3490 = vadd.xlane.f32.xlu0 %v3489_v18 }
0x1c47   : > { %3487 = vadd.xlane.f32.xlu1 %v3486_v30 }
0x1c58   : > { %3534 = vperm.xlu1 %4916, %v5937_v61  }
0x1c59   : > { %3529 = vperm.xlu0 %4915, %v5939_v63  }
0x1c5c   : > { %4917 = vset.pattern.permute.xlu1 %v5183_v39 }
0x1c5d   : > { %3623 = vperm.xlu1 %4917, %v3525_v16   ;;  %4918 = vset.pattern.permute.xlu0 %v5183_v39 }
0x1c61   : > { %3628 = vperm.xlu1 %4917, %v3526_v25  }
0x1c95   : > { %v3649_v43 = vpop.permute.xlu1 %3648 }
0x1c96   : > { %v3647_v34 = vpop.permute.xlu0 %3646 }
0x1c97   : > { %4641 = vmatprep.mubr.msk.f32.mxu1 %vm1082_vm2, %v3647_v34 }
0x1c98   : > { %4642 = vmatmul.mubr.msk.f32.vlgmr.msra.gmra.mrb[60].mxu1 %vm1082_vm2, %v3649_v43 }
0x1cd0   : > { %v3491_v44 = vpop.xlane.xlu0 %3490 }
0x1cd1   : > { %5041 = vrsqrt.f32 %v3491_v44  ;;  %vm3501_vm13 = vcmp.eq.f32.partialorder %v3491_v44, inf  ;;  %v3504_v48 = vand.u32 2147483648, %v3491_v44  ;;  %vm3503_vm14 = vcmp.eq.f32.partialorder %v3491_v44, 0.0 }
0x1cd4   : > { %v3488_v45 = vpop.xlane.xlu1 %3487 }
0x1cd5   : > { %5043 = vrsqrt.f32 %v3488_v45  ;;  %vm3494_vm15 = vcmp.eq.f32.partialorder %v3488_v45, inf  ;;  %v3497_v0 = vand.u32 2147483648, %v3488_v45  ;;  %vm3496_vm0 = vcmp.eq.f32.partialorder %v3488_v45, 0.0 }
0x1cd8   : > { %v3535_v23 = vpop.permute.xlu1 %3534  ;;  %v3530_v40 = vpop.permute.xlu0 %3529 }
0x1cdb   : > { %v5042_v46 = vpop.eup %5041 }
0x1cdc   : > { %v3500_v47 = vmul.f32 %v5042_v46, %v3491_v44  ;;  %v3624_v28 = vpop.permute.xlu1 %3623 }
0x1cde   : > { %v3502_v22 = vsel %vm3501_vm13, %v3491_v44, %v3500_v47 }
0x1cdf   : > { %v5044_v19 = vpop.eup %5043  ;;  %v3505_v29 = vsel %vm3503_vm14, %v3504_v48, %v3502_v22 }
0x1ce0   : > { %v3493_v49 = vmul.f32 %v5044_v19, %v3488_v45  ;;  %v3507_v50 = vadd.f32 1e-06, %v3505_v29  ;;  %v3629_v37 = vpop.permute.xlu1 %3628  ;;  %v4205_v19 = vld [vmem:[%s6041_s11] ss:$0 sm:$0xff] }
0x1ce2   : > { %v3495_v51 = vsel %vm3494_vm15, %v3488_v45, %v3493_v49  ;;  %5045 = vrcp.f32 %v3507_v50  ;;  %v3895_v49 = vld [vmem:[%s6042_s18 + $0x8] sm:$0xff] }
0x1ce3   : > { %v3498_v32 = vsel %vm3496_vm0, %v3497_v0, %v3495_v51  ;;  %v3894_v51 = vld [vmem:[%s6042_s18] sm:$0xff] }
0x1ce4   : > { %v3506_v52 = vadd.f32 1e-06, %v3498_v32 }
0x1ce6   : > { %5047 = vrcp.f32 %v3506_v52 }
0x1cec   : > { %v5046_v53 = vpop.eup %5045 }
0x1ced   : > { %v3511_v31 = vmul.f32 %v5046_v53, %v5937_v61 }
0x1cf0   : > { %v5048_v54 = vpop.eup %5047 }
0x1cf1   : > { %v3509_v56 = vmul.f32 %v5048_v54, %v5939_v63 }
0x1cf3   : > { %4630 = vmatprep.mubr.msk.f32.mxu0 %vm1082_vm2, %v3509_v56 }
0x1cf4   : > { %4631 = vmatmul.mubr.msk.f32.vlgmr.msra.gmra.mrb[42].mxu0 %vm1082_vm2, %v3511_v31 }
0x1cf5   : > { %4798 = vmatpush3.bf16.msra.mxu0 %v4795_v60 }
0x1cf6   : > { %4800 = vmatprep.subr.bf16.mxu0 %v4799_v1 }
0x1cf9   : > { %4802 = vmatpush3.bf16.msra.mxu0 %v4799_v1 }
0x1d6b   : > { %v4643_v3 = vpop.f32.mrb[60].mxu1 }
0x1d6c   : > { %v3726_v4 = vadd.f32 %v4643_v3, %v4202_v2  ;;  %v3720_v63 = vpop.f32.mrb[61].mxu1 }
0x1d6d   : > { %v3721_v5 = vadd.f32 %v4202_v2, %v3720_v63 }
0x1d6e   : > { %v3732_v61 = vmul.f32 0.044715, %v3726_v4  ;;  %v3730_v17 = vmul.f32 0.5, %v3726_v4 }
0x1d6f   : > { %v3731_v24 = vmul.f32 0.044715, %v3721_v5  ;;  %v3729_v15 = vmul.f32 0.5, %v3721_v5 }
0x1d70   : > { %v3734_v6 = vmul.f32 %v3732_v61, %v3726_v4 }
0x1d71   : > { %v3733_v27 = vmul.f32 %v3731_v24, %v3721_v5 }
0x1d72   : > { %v3736_v7 = vmul.f32 %v3734_v6, %v3726_v4 }
0x1d73   : > { %v3735_v8 = vmul.f32 %v3733_v27, %v3721_v5 }
0x1d74   : > { %v3738_v9 = vadd.f32 %v3736_v7, %v3726_v4 }
0x1d75   : > { %v3737_v10 = vadd.f32 %v3735_v8, %v3721_v5  ;;  %v3859_v5 = vand.u32 127, %v3300_v21 }
0x1d76   : > { %v3740_v11 = vmul.f32 0.7978846, %v3738_v9 }
0x1d77   : > { %v3739_v12 = vmul.f32 0.7978846, %v3737_v10 }
0x1d78   : > { %5049 = vtanh.f32 %v3740_v11 }
0x1d79   : > { %5051 = vtanh.f32 %v3739_v12 }
0x1d82   : > { %v5050_v55 = vpop.eup %5049 }
0x1d83   : > { %v5052_v13 = vpop.eup %5051  ;;  %v3744_v14 = vadd.f32 1.0, %v5050_v55 }
0x1d84   : > { %v3743_v26 = vadd.f32 1.0, %v5052_v13 }
0x1d85   : > { %v3746_v20 = vmul.f32 %v3744_v14, %v3730_v17 }
0x1d86   : > { %v3745_v18 = vmul.f32 %v3743_v26, %v3729_v15 }
0x1d88   : > { %4652 = vmatprep.mubr.msk.f32.mxu0 %vm1082_vm2, %v3745_v18 }
0x1d89   : > { %4653 = vmatmul.mubr.msk.f32.vlgmr.msra.gmra.mrb[44].mxu0 %vm1082_vm2, %v3746_v20 }
0x1dc7   : > { %v4632_v30 = vpop.f32.mrb[42].mxu0 }
0x1dc8   : > { %v3618_v35 = vadd.f32 %v4632_v30, %v3535_v23  ;;  %v3612_v36 = vpop.f32.mrb[43].mxu0 }
0x1dc9   : > { %v3613_v33 = vadd.f32 %v3612_v36, %v3530_v40 }
0x1dca   : > { %v3632_v38 = vmul.f32 %v3629_v37, %v3618_v35 }
0x1dcb   : > { %v3631_v16 = vmul.f32 %v3624_v28, %v3613_v33 }
0x1dcc   : > { %v3840_v39 = vsub.f32 0.0, %v3632_v38 }
0x1dcd   : > { %v3839_v41 = vsub.f32 0.0, %v3631_v16 }
0x1dce   : > { %v3843_v25 = vmul.f32 1.442695, %v3840_v39 }
0x1dcf   : > { %v3841_v42 = vmul.f32 1.442695, %v3839_v41 }
0x1dd0   : > { %5053 = vpow2.f32 %v3843_v25 }
0x1dd1   : > { %5055 = vpow2.f32 %v3841_v42 }
0x1dda   : > { %v5054_v34 = vpop.eup %5053 }
0x1ddb   : > { %v5056_v43 = vpop.eup %5055  ;;  %v3846_v44 = vadd.f32 1.0, %v5054_v34 }
0x1ddc   : > { %v3845_v45 = vadd.f32 1.0, %v5056_v43 }
0x1ddd   : > { %5057 = vrcp.f32 %v3846_v44 }
0x1dde   : > { %5059 = vrcp.f32 %v3845_v45 }
0x1de7   : > { %v5058_v46 = vpop.eup %5057 }
0x1de8   : > { %v5060_v47 = vpop.eup %5059  ;;  %v3855_v48 = vsel %vm3851_vm1, %v5058_v46, -inf }
0x1de9   : > { %3856 = vmax.xlane.f32.xlu0 %v3855_v48  ;;  %v3852_v22 = vsel %vm3851_vm1, %v5060_v47, -inf }
0x1dea   : > { %3853 = vmax.xlane.f32.xlu1 %v3852_v22 }
0x1e5c   : > { %v4654_v29 = vpop.f32.mrb[44].mxu0 }
0x1e5d   : > { %v3836_v50 = vadd.f32 %v4654_v29, %v4205_v19  ;;  %v3830_v0 = vpop.f32.mrb[45].mxu0 }
0x1e5e   : > { %v3831_v32 = vadd.f32 %v4205_v19, %v3830_v0 }
0x1e5f   : > { %v3897_v52 = vadd.f32 %v3895_v49, %v3836_v50 }
0x1e60   : > { %v3896_v53 = vadd.f32 %v3894_v51, %v3831_v32 }
0x1e61   : > { %v3899_v54 = vsub.f32 0.0, %v3897_v52 }
0x1e62   : > { %v3898_v56 = vsub.f32 0.0, %v3896_v53 }
0x1e63   : > { %v3902_v31 = vmul.f32 1.442695, %v3899_v54 }
0x1e64   : > { %v3900_v57 = vmul.f32 1.442695, %v3898_v56 }
0x1e65   : > { %5061 = vpow2.f32 %v3902_v31 }
0x1e66   : > { %5063 = vpow2.f32 %v3900_v57 }
0x1e6f   : > { %v5062_v58 = vpop.eup %5061 }
0x1e70   : > { %v5064_v59 = vpop.eup %5063  ;;  %v3905_v60 = vadd.f32 1.0, %v5062_v58 }
0x1e71   : > { %v3904_v62 = vadd.f32 1.0, %v5064_v59 }
0x1e72   : > { %5065 = vrcp.f32 %v3905_v60 }
0x1e73   : > { %5067 = vrcp.f32 %v3904_v62 }
0x1e76   : > { %v3857_v63 = vpop.xlane.xlu0 %3856 }
0x1e77   : > { %vm3861_vm2 = vcmp.ge.f32.partialorder %v5058_v46, %v3857_v63  ;;  %v3854_v24 = vpop.xlane.xlu1 %3853 }
0x1e78   : > { %v3863_v61 = vsel %vm3861_vm2, %v3859_v5, 3  ;;  %vm3860_vm3 = vcmp.ge.f32.partialorder %v5060_v47, %v3854_v24 }
0x1e79   : > { %v3879_v6 = vsel %vm3851_vm1, %v3863_v61, 2147483647  ;;  %v3862_v27 = vsel %vm3860_vm3, %v3859_v5, 3 }
0x1e7a   : > { %v3881_v7 = vshra.s32 %v3879_v6, 16  ;;  %v3864_v8 = vsel %vm3851_vm1, %v3862_v27, 2147483647  ;;  %v3880_v21 = vand.u32 65535, %v3879_v6 }
0x1e7b   : > { %v3866_v10 = vshra.s32 %v3864_v8, 16  ;;  %v3865_v18 = vand.u32 65535, %v3864_v8 }
0x1e7c   : > { %v5066_v1 = vpop.eup %5065  ;;  %v3883_v9 = vcvt.s32.f32 %v3881_v7  ;;  %v3882_v26 = vcvt.s32.f32 %v3880_v21 }
0x1e7d   : > { %v5068_v2 = vpop.eup %5067  ;;  %v3911_v3 = vmul.f32 0.5, %v5066_v1  ;;  %v3868_v11 = vcvt.s32.f32 %v3866_v10  ;;  %v3867_v23 = vcvt.s32.f32 %v3865_v18 }
0x1e7e   : > { %v3910_v4 = vmul.f32 0.5, %v5068_v2 }
0x1e7f   : > { %3916 = vrot.lane.b32.xlu0 %v3911_v3, %s5184_s22 }
0x1e80   : > { %3914 = vrot.lane.b32.xlu1 %v3910_v4, %s5184_s22 }
0x1e9e   : > { %3884 = vmin.xlane.f32.xlu0 %v3883_v9 }
0x1ea4   : > { %3869 = vmin.xlane.f32.xlu1 %v3868_v11 }
0x1ef1   : > { %v3917_v12 = vpop.permute.xlu0 %3916 }
0x1ef2   : > { %v3923_v55 = vadd.f32 %v5066_v1, %v3917_v12  ;;  %v3915_v13 = vpop.permute.xlu1 %3914  ;;  %v3921_v30 = vsub.f32 %v5066_v1, %v3917_v12 }
0x1ef3   : > { %v3922_v14 = vadd.f32 %v5068_v2, %v3915_v13  ;;  %v3920_v40 = vsub.f32 %v5068_v2, %v3915_v13 }
0x1ef4   : > { %3928 = vrot.lane.b32.xlu0 %v3923_v55, %s5185_s26 }
0x1ef5   : > { %3926 = vrot.lane.b32.xlu1 %v3922_v14, %s5185_s26 }
0x1f2b   : > { %v3885_v15 = vpop.xlane.xlu0 %3884 }
0x1f2c   : > { %vm3886_vm4 = vcmp.eq.f32.partialorder %v3883_v9, %v3885_v15  ;;  %v3891_v41 = vcvt.f32.s32 %v3885_v15 }
0x1f2d   : > { %v3887_v17 = vsel %vm3886_vm4, %v3882_v26, inf }
0x1f2e   : > { %3888 = vmin.xlane.f32.xlu0 %v3887_v17  ;;  %v3892_v44 = vshll.u32 %v3891_v41, 16 }
0x1f31   : > { %v3870_v20 = vpop.xlane.xlu1 %3869 }
0x1f32   : > { %vm3871_vm5 = vcmp.eq.f32.partialorder %v3868_v11, %v3870_v20  ;;  %v3876_v42 = vcvt.f32.s32 %v3870_v20 }
0x1f33   : > { %v3872_v28 = vsel %vm3871_vm5, %v3867_v23, inf }
0x1f34   : > { %3873 = vmin.xlane.f32.xlu1 %v3872_v28  ;;  %v3877_v45 = vshll.u32 %v3876_v42, 16 }
0x1f66   : > { %v3929_v35 = vpop.permute.xlu0 %3928 }
0x1f67   : > { %v3934_v36 = vsel %vm3932_vm6, %v3921_v30, %v3929_v35  ;;  %v3927_v37 = vpop.permute.xlu1 %3926 }
0x1f68   : > { %v3936_v33 = vmul.f32 32.0, %v3934_v36  ;;  %v3933_v38 = vsel %vm3932_vm6, %v3920_v40, %v3927_v37 }
0x1f69   : > { %v3935_v16 = vmul.f32 32.0, %v3933_v38 }
0x1f6a   : > { %3943 = vrot.lane.b32.xlu0 %v3936_v33, %s5185_s26 }
0x1f6b   : > { %3941 = vrot.lane.b32.xlu1 %v3935_v16, %s5185_s26 }
0x1fbb   : > { %v3889_v39 = vpop.xlane.xlu0 %3888 }
0x1fbc   : > { %v3890_v34 = vcvt.f32.s32 %v3889_v39 }
0x1fbe   : > { %v3893_v46 = vadd.s32 %v3892_v44, %v3890_v34 }
0x1fc0   : > { %v3938_v48 = vcvt.s32.f32 %v3893_v46 }
0x1fc1   : > { %v3874_v25 = vpop.xlane.xlu1 %3873 }
0x1fc2   : > { %v3875_v43 = vcvt.f32.s32 %v3874_v25  ;;  %v3949_v19 = vsel %vm3947_vm7, %v3857_v63, %v3938_v48 }
0x1fc4   : > { %v3878_v47 = vadd.s32 %v3877_v45, %v3875_v43 }
0x1fc6   : > { %v3937_v22 = vcvt.s32.f32 %v3878_v47 }
0x1fc8   : > { %v3948_v50 = vsel %vm3947_vm7, %v3854_v24, %v3937_v22 }
0x1fdc   : > { %v3944_v29 = vpop.permute.xlu0 %3943 }
0x1fdd   : > { %v3951_v49 = vsel %vm3932_vm6, %v3949_v19, %v3944_v29  ;;  %v3942_v0 = vpop.permute.xlu1 %3941 }
0x1fde   : > { %v3954_v51 = vsel %vm3952_vm8, %v3951_v49, 0.0  ;;  %v3950_v32 = vsel %vm3932_vm6, %v3948_v50, %v3942_v0 }
0x1fdf   : > { %3957 = vst.msk [vmem:[%s956_s23 + $0x8] sm:$0xff] %vm3955_vm9, %v3954_v51  ;;  %v3953_v52 = vsel %vm3952_vm8, %v3950_v32, 0.0 }
0x1fe0   : > { %3956 = vst.msk [vmem:[%s956_s23] sm:$0xff] %vm3955_vm9, %v3953_v52 }
0x1fe1 PF: > { %s73_s15 = sadd.s32 1, %s5139_s15  }
0x1fe2   : > { %p70_p11 = scmp.ge.s32.totalorder %s73_s15, 4  }
0x1fe4   :  { %72 = sbr.rel (!%p70_p11) target bundleno = 48 (0x30), region = 221 }
0x1feb   :  { %3979 = vsyncpa [#allocation3], 1 }
0x1fec   :  { %3981 = vsyncpa [#allocation3 + $0x1], 1 }
0x1fed   :  { %3982 = vsyncpa [#allocation5], 1 }

</bundles_post_ra>
